<compile_context>
chip_gen: v5e
topology: v5e:2x2
jax: 0.10.0
libtpu: 0.0.40
codegen_flags: <defaults>
</compile_context>

<pallas_src>
import numpy as np
import jax
import jax.numpy as jnp
from jax import lax
from jax.experimental import pallas as pl
from jax.experimental.pallas import tpu as pltpu

# LeNet geometry (valid 5x5 convs, 2x2 max-pools)
H1 = W1 = 32          # input spatial size (Cin = 1)
K = 5                 # conv kernel size
HO1 = WO1 = 28        # conv1 output
C1 = 6                # conv1 channels
HP1 = WP1 = 14        # after pool1
HO2 = WO2 = 10        # conv2 output
C2 = 16               # conv2 channels
HP2 = WP2 = 5         # after pool2
LANE = 128            # lane width used to align the flattened fc1 input
FCIN = HP2 * LANE     # 640 (fc1 K-dim, zero-padded from 400)


# ------------------------------ fused kernel -------------------------------

def _lenet_fused_kernel(x_ref, c1e_ref, c1o_ref, b1_ref,
                        c2e_ref, c2o_ref, b2_ref,
                        w1_ref, fb1_ref, w2_ref, fb2_ref, w3_ref, fb3_ref,
                        o_ref, pool1_ref, fcin_ref):
    f32 = jnp.float32
    batch = x_ref.shape[0]

    # fc1 weight rows for the lane-padding region are zero, but the scratch is
    # uninitialized VMEM -> zero it so pad lanes can never contribute NaN/Inf.
    fcin_ref[...] = jnp.zeros_like(fcin_ref)

    b1 = b1_ref[...]                                      # (1, 84)  tiled conv1 bias
    b2 = b2_ref[...]                                      # (1, 80)  tiled conv2 bias

    for b in range(batch):                                # B is tiny -> unrolled
        xb = x_ref[b]                                     # (32, 32)

        # ---- conv1 (5x5 valid, 1->6 ch); W-direction 2x max folded into the
        #      even/odd banded matrices -------------------------------------
        ev = jnp.zeros((HO1, WP1 * C1), f32)
        od = jnp.zeros((HO1, WP1 * C1), f32)
        for di in range(K):
            rows = xb[di:di + HO1, :]                     # (28, 32)
            ev = ev + jnp.dot(rows, c1e_ref[di], preferred_element_type=f32)
            od = od + jnp.dot(rows, c1o_ref[di], preferred_element_type=f32)
        wpool = jnp.maximum(ev, od)                       # (28, 84)

        # ---- H-direction 2x max + bias + ReLU -> pool1 scratch (14, 84) ----
        for h in range(HP1):
            r = jnp.maximum(wpool[2 * h:2 * h + 1, :], wpool[2 * h + 1:2 * h + 2, :])
            pool1_ref[pl.ds(h, 1), :] = jnp.maximum(r + b1, 0.0)
        p1 = pool1_ref[...]                               # (14, 84)  layout: w*6 + c

        # ---- conv2 (5x5 valid, 6->16 ch), same scheme ----------------------
        ev2 = jnp.zeros((HO2, WP2 * C2), f32)
        od2 = jnp.zeros((HO2, WP2 * C2), f32)
        for di in range(K):
            rows = p1[di:di + HO2, :]                     # (10, 84)
            ev2 = ev2 + jnp.dot(rows, c2e_ref[di], preferred_element_type=f32)
            od2 = od2 + jnp.dot(rows, c2o_ref[di], preferred_element_type=f32)
        wpool2 = jnp.maximum(ev2, od2)                    # (10, 80)

        # ---- H pool + bias + ReLU, written lane-aligned into the fc input --
        for h in range(HP2):
            r = jnp.maximum(wpool2[2 * h:2 * h + 1, :], wpool2[2 * h + 1:2 * h + 2, :])
            fcin_ref[pl.ds(b, 1), pl.ds(h * LANE, WP2 * C2)] = jnp.maximum(r + b2, 0.0)

    # ---- fc1 -> fc2 -> fc3 on the whole batch, all VMEM resident -----------
    z = fcin_ref[...]                                                        # (B, 640)
    z = jnp.maximum(jnp.dot(z, w1_ref[...], preferred_element_type=f32) + fb1_ref[...], 0.0)
    z = jnp.maximum(jnp.dot(z, w2_ref[...], preferred_element_type=f32) + fb2_ref[...], 0.0)
    z = jnp.dot(z, w3_ref[...], preferred_element_type=f32) + fb3_ref[...]
    o_ref[...] = z.astype(o_ref.dtype)


def net_forward(params, x):
    """x: (B, 1, 32, 32) NCHW float32 -> logits (B, 10)."""
    B = x.shape[0]
    xs = x.reshape(B, H1, W1)                 # Cin == 1, trivial squeeze

    operands = (xs,
                params["c1e"], params["c1o"], params["b1"],
                params["c2e"], params["c2o"], params["b2"],
                params["w1"], params["fb1"],
                params["w2"], params["fb2"],
                params["w3"], params["fb3"])

    def full_spec(shape):
        n = len(shape)
        return pl.BlockSpec(shape, lambda i, _n=n: (0,) * _n)

    return pl.pallas_call(
        _lenet_fused_kernel,
        out_shape=jax.ShapeDtypeStruct((B, 10), jnp.float32),
        grid=(1,),
        in_specs=[full_spec(op.shape) for op in operands],
        out_specs=full_spec((B, 10)),
        scratch_shapes=[pltpu.VMEM((HP1, WP1 * C1), jnp.float32),   # pool1
                        pltpu.VMEM((B, FCIN), jnp.float32)],        # flattened fc input
        compiler_params=pltpu.CompilerParams(dimension_semantics=("arbitrary",)),
    )(*operands)


# ------------------- one-time weight preparation (host) --------------------

def _banded_conv_mats(w, width):
    """Toeplitz-along-W conv matrices with an even/odd output-column split.

    w: (Cout, Cin, k, k) PyTorch conv weight.  Returns (Me, Mo), each of shape
    (k, width*Cin, (Wo//2)*Cout): for input rows X[h, w*Cin+ci],
    sum_di X[di:di+Ho] @ Me[di] yields conv columns wo = 0,2,4,... and Mo the
    odd ones, both laid out as w2*Cout + co.
    """
    cout, cin, k, _ = w.shape
    wo = width - k + 1
    wp = wo // 2
    me = np.zeros((k, width * cin, wp * cout), np.float32)
    mo = np.zeros_like(me)
    wt = np.transpose(np.asarray(w, np.float32), (2, 3, 1, 0))   # (di, dj, Cin, Cout)
    for di in range(k):
        for dj in range(k):
            blk = wt[di, dj]                                     # (Cin, Cout)
            for w2 in range(wp):
                re = (2 * w2 + dj) * cin
                ro = (2 * w2 + 1 + dj) * cin
                me[di, re:re + cin, w2 * cout:(w2 + 1) * cout] = blk
                mo[di, ro:ro + cin, w2 * cout:(w2 + 1) * cout] = blk
    return me, mo


def prepare_params(raw):
    c1e, c1o = _banded_conv_mats(raw["conv1_w"], W1)            # (5, 32, 84)
    c2e, c2o = _banded_conv_mats(raw["conv2_w"], WP1)           # (5, 84, 80)
    b1 = np.tile(np.asarray(raw["conv1_b"], np.float32), WP1).reshape(1, WP1 * C1)
    b2 = np.tile(np.asarray(raw["conv2_b"], np.float32), WP2).reshape(1, WP2 * C2)

    # fc1: reorder the 400 input features from PyTorch's (c, h, w) flatten
    # order to the kernel's (h, w, c) order, pad each h-block to 128 lanes.
    f1 = np.asarray(raw["fc1_w"], np.float32)                   # (120, 400)
    f1 = f1.reshape(120, C2, HP2, WP2).transpose(2, 3, 1, 0)    # (h, w, c, 120)
    f1 = f1.reshape(HP2, WP2 * C2, 120)                         # (5, 80, 120)
    w1 = np.zeros((HP2, LANE, 120), np.float32)
    w1[:, :WP2 * C2, :] = f1
    w1 = w1.reshape(FCIN, 120)                                  # (640, 120)

    return {
        "c1e": jnp.asarray(c1e), "c1o": jnp.asarray(c1o), "b1": jnp.asarray(b1),
        "c2e": jnp.asarray(c2e), "c2o": jnp.asarray(c2o), "b2": jnp.asarray(b2),
        "w1": jnp.asarray(w1),
        "fb1": jnp.asarray(np.asarray(raw["fc1_b"], np.float32).reshape(1, 120)),
        "w2": jnp.asarray(np.asarray(raw["fc2_w"], np.float32).T.copy()),
        "fb2": jnp.asarray(np.asarray(raw["fc2_b"], np.float32).reshape(1, 84)),
        "w3": jnp.asarray(np.asarray(raw["fc3_w"], np.float32).T.copy()),
        "fb3": jnp.asarray(np.asarray(raw["fc3_b"], np.float32).reshape(1, 10)),
    }


# --------------------------- raw (PyTorch-shaped) params -------------------

def init_params(key):
    ks = jax.random.split(key, 10)

    def u(k, shape, fan_in):
        bound = 1.0 / float(fan_in) ** 0.5
        return jax.random.uniform(k, shape, jnp.float32, -bound, bound)

    return {
        "conv1_w": u(ks[0], (6, 1, 5, 5), 1 * 5 * 5),
        "conv1_b": u(ks[1], (6,), 1 * 5 * 5),
        "conv2_w": u(ks[2], (16, 6, 5, 5), 6 * 5 * 5),
        "conv2_b": u(ks[3], (16,), 6 * 5 * 5),
        "fc1_w": u(ks[4], (120, 400), 400),
        "fc1_b": u(ks[5], (120,), 400),
        "fc2_w": u(ks[6], (84, 120), 120),
        "fc2_b": u(ks[7], (84,), 120),
        "fc3_w": u(ks[8], (10, 84), 84),
        "fc3_b": u(ks[9], (10,), 84),
    }


# --------------------------- pure-JAX reference ----------------------------

def net_forward_ref(raw, x):
    dn = ("NCHW", "OIHW", "NCHW")
    y = lax.conv_general_dilated(x, raw["conv1_w"], (1, 1), "VALID",
                                 dimension_numbers=dn,
                                 precision=lax.Precision.HIGHEST)
    y = jnp.maximum(y + raw["conv1_b"].reshape(1, -1, 1, 1), 0.0)
    y = lax.reduce_window(y, -jnp.inf, lax.max, (1, 1, 2, 2), (1, 1, 2, 2), "VALID")
    y = lax.conv_general_dilated(y, raw["conv2_w"], (1, 1), "VALID",
                                 dimension_numbers=dn,
                                 precision=lax.Precision.HIGHEST)
    y = jnp.maximum(y + raw["conv2_b"].reshape(1, -1, 1, 1), 0.0)
    y = lax.reduce_window(y, -jnp.inf, lax.max, (1, 1, 2, 2), (1, 1, 2, 2), "VALID")
    z = y.reshape(y.shape[0], -1)
    z = jnp.maximum(z @ raw["fc1_w"].T + raw["fc1_b"], 0.0)
    z = jnp.maximum(z @ raw["fc2_w"].T + raw["fc2_b"], 0.0)
    return z @ raw["fc3_w"].T + raw["fc3_b"]


# ---------------------------------- main ------------------------------------

if __name__ == "__main__":
    key = jax.random.PRNGKey(0)
    pkey, xkey = jax.random.split(key)
    raw = init_params(pkey)
    params = prepare_params(raw)          # one-time host-side weight transform
    x = jax.random.normal(xkey, (2, 1, 32, 32), jnp.float32)

    out = jax.jit(net_forward)(params, x)
    out = jax.block_until_ready(out)

    ref = net_forward_ref(raw, x)
    rel = jnp.linalg.norm(out - ref) / jnp.linalg.norm(ref)
    assert out.shape == (2, 10)
    assert bool(jnp.all(jnp.isfinite(out)))
    assert float(rel) < 2e-2, f"mismatch vs reference: rel={float(rel):.3e}"
    print("KERNEL_OK")
</pallas_src>

<mosaic_0001>
module attributes {stable_mosaic.version = 11 : i64} {
  func.func @_lenet_fused_kernel(%arg0: i32, %arg1: memref<2x32x32xf32, #tpu.memory_space<vmem>>, %arg2: memref<5x32x84xf32, #tpu.memory_space<vmem>>, %arg3: memref<5x32x84xf32, #tpu.memory_space<vmem>>, %arg4: memref<1x84xf32, #tpu.memory_space<vmem>>, %arg5: memref<5x84x80xf32, #tpu.memory_space<vmem>>, %arg6: memref<5x84x80xf32, #tpu.memory_space<vmem>>, %arg7: memref<1x80xf32, #tpu.memory_space<vmem>>, %arg8: memref<640x120xf32, #tpu.memory_space<vmem>>, %arg9: memref<1x120xf32, #tpu.memory_space<vmem>>, %arg10: memref<120x84xf32, #tpu.memory_space<vmem>>, %arg11: memref<1x84xf32, #tpu.memory_space<vmem>>, %arg12: memref<84x10xf32, #tpu.memory_space<vmem>>, %arg13: memref<1x10xf32, #tpu.memory_space<vmem>>, %arg14: memref<2x10xf32, #tpu.memory_space<vmem>>, %arg15: memref<14x84xf32, #tpu.memory_space<vmem>>, %arg16: memref<2x640xf32, #tpu.memory_space<vmem>>) attributes {dimension_semantics = [#tpu.dimension_semantics<arbitrary>], iteration_bounds = array<i64: 1>, scalar_prefetch = 0 : i64, scratch_operands = 2 : i64, tpu.core_type = #tpu.core_type<tc>, window_params = [{pipeline_mode = #tpu.pipeline_mode<synchronous>, transform_indices = @transform_0, window_bounds = array<i64: 2, 32, 32>}, {pipeline_mode = #tpu.pipeline_mode<synchronous>, transform_indices = @transform_1, window_bounds = array<i64: 5, 32, 84>}, {pipeline_mode = #tpu.pipeline_mode<synchronous>, transform_indices = @transform_2, window_bounds = array<i64: 5, 32, 84>}, {pipeline_mode = #tpu.pipeline_mode<synchronous>, transform_indices = @transform_3, window_bounds = array<i64: 1, 84>}, {pipeline_mode = #tpu.pipeline_mode<synchronous>, transform_indices = @transform_4, window_bounds = array<i64: 5, 84, 80>}, {pipeline_mode = #tpu.pipeline_mode<synchronous>, transform_indices = @transform_5, window_bounds = array<i64: 5, 84, 80>}, {pipeline_mode = #tpu.pipeline_mode<synchronous>, transform_indices = @transform_6, window_bounds = array<i64: 1, 80>}, {pipeline_mode = #tpu.pipeline_mode<synchronous>, transform_indices = @transform_7, window_bounds = array<i64: 640, 120>}, {pipeline_mode = #tpu.pipeline_mode<synchronous>, transform_indices = @transform_8, window_bounds = array<i64: 1, 120>}, {pipeline_mode = #tpu.pipeline_mode<synchronous>, transform_indices = @transform_9, window_bounds = array<i64: 120, 84>}, {pipeline_mode = #tpu.pipeline_mode<synchronous>, transform_indices = @transform_10, window_bounds = array<i64: 1, 84>}, {pipeline_mode = #tpu.pipeline_mode<synchronous>, transform_indices = @transform_11, window_bounds = array<i64: 84, 10>}, {pipeline_mode = #tpu.pipeline_mode<synchronous>, transform_indices = @transform_12, window_bounds = array<i64: 1, 10>}, {pipeline_mode = #tpu.pipeline_mode<synchronous>, transform_indices = @transform_13, window_bounds = array<i64: 2, 10>}]} {
    %cst = arith.constant 0.000000e+00 : f32
    %0 = vector.broadcast %cst : f32 to vector<2x640xf32>
    %c0 = arith.constant 0 : index
    %c0_0 = arith.constant 0 : index
    %1 = vector.load %arg16[%c0, %c0_0] : memref<2x640xf32, #tpu.memory_space<vmem>>, vector<2x640xf32>
    tpu.vector_store %arg16[%c0, %c0_0], %0 {strides = array<i32>} : memref<2x640xf32, #tpu.memory_space<vmem>>, vector<2x640xf32>,
    %c0_1 = arith.constant 0 : index
    %c0_2 = arith.constant 0 : index
    %2 = vector.load %arg4[%c0_1, %c0_2] : memref<1x84xf32, #tpu.memory_space<vmem>>, vector<1x84xf32>
    %c0_3 = arith.constant 0 : index
    %c0_4 = arith.constant 0 : index
    %3 = vector.load %arg7[%c0_3, %c0_4] : memref<1x80xf32, #tpu.memory_space<vmem>>, vector<1x80xf32>
    %c0_5 = arith.constant 0 : index
    %c0_6 = arith.constant 0 : index
    %c0_7 = arith.constant 0 : index
    %4 = vector.load %arg1[%c0_5, %c0_6, %c0_7] : memref<2x32x32xf32, #tpu.memory_space<vmem>>, vector<1x32x32xf32>
    %5 = vector.shape_cast %4 : vector<1x32x32xf32> to vector<32x32xf32>
    %cst_8 = arith.constant 0.000000e+00 : f32
    %6 = vector.broadcast %cst_8 : f32 to vector<28x84xf32>
    %cst_9 = arith.constant 0.000000e+00 : f32
    %7 = vector.broadcast %cst_9 : f32 to vector<28x84xf32>
    %8 = vector.extract_strided_slice %5 {offsets = [0, 0], sizes = [28, 32], strides = [1, 1]} : vector<32x32xf32> to vector<28x32xf32>
    %c0_10 = arith.constant 0 : index
    %c0_11 = arith.constant 0 : index
    %c0_12 = arith.constant 0 : index
    %9 = vector.load %arg2[%c0_10, %c0_11, %c0_12] : memref<5x32x84xf32, #tpu.memory_space<vmem>>, vector<1x32x84xf32>
    %10 = vector.shape_cast %9 : vector<1x32x84xf32> to vector<32x84xf32>
    %cst_13 = arith.constant dense<0.000000e+00> : vector<28x84xf32>
    %11 = tpu.matmul %8, %10, %cst_13 {dimension_numbers = #tpu.dot_dimension_numbers<[1], [0], [0], [1], [0, 0, 1, 1], [], []>} : vector<28x32xf32>, vector<32x84xf32>, vector<28x84xf32> -> vector<28x84xf32>
    %12 = arith.addf %6, %11 : vector<28x84xf32>
    %c0_14 = arith.constant 0 : index
    %c0_15 = arith.constant 0 : index
    %c0_16 = arith.constant 0 : index
    %13 = vector.load %arg3[%c0_14, %c0_15, %c0_16] : memref<5x32x84xf32, #tpu.memory_space<vmem>>, vector<1x32x84xf32>
    %14 = vector.shape_cast %13 : vector<1x32x84xf32> to vector<32x84xf32>
    %cst_17 = arith.constant dense<0.000000e+00> : vector<28x84xf32>
    %15 = tpu.matmul %8, %14, %cst_17 {dimension_numbers = #tpu.dot_dimension_numbers<[1], [0], [0], [1], [0, 0, 1, 1], [], []>} : vector<28x32xf32>, vector<32x84xf32>, vector<28x84xf32> -> vector<28x84xf32>
    %16 = arith.addf %7, %15 : vector<28x84xf32>
    %17 = vector.extract_strided_slice %5 {offsets = [1, 0], sizes = [28, 32], strides = [1, 1]} : vector<32x32xf32> to vector<28x32xf32>
    %c1 = arith.constant 1 : index
    %c0_18 = arith.constant 0 : index
    %c0_19 = arith.constant 0 : index
    %18 = vector.load %arg2[%c1, %c0_18, %c0_19] : memref<5x32x84xf32, #tpu.memory_space<vmem>>, vector<1x32x84xf32>
    %19 = vector.shape_cast %18 : vector<1x32x84xf32> to vector<32x84xf32>
    %cst_20 = arith.constant dense<0.000000e+00> : vector<28x84xf32>
    %20 = tpu.matmul %17, %19, %cst_20 {dimension_numbers = #tpu.dot_dimension_numbers<[1], [0], [0], [1], [0, 0, 1, 1], [], []>} : vector<28x32xf32>, vector<32x84xf32>, vector<28x84xf32> -> vector<28x84xf32>
    %21 = arith.addf %12, %20 : vector<28x84xf32>
    %c1_21 = arith.constant 1 : index
    %c0_22 = arith.constant 0 : index
    %c0_23 = arith.constant 0 : index
    %22 = vector.load %arg3[%c1_21, %c0_22, %c0_23] : memref<5x32x84xf32, #tpu.memory_space<vmem>>, vector<1x32x84xf32>
    %23 = vector.shape_cast %22 : vector<1x32x84xf32> to vector<32x84xf32>
    %cst_24 = arith.constant dense<0.000000e+00> : vector<28x84xf32>
    %24 = tpu.matmul %17, %23, %cst_24 {dimension_numbers = #tpu.dot_dimension_numbers<[1], [0], [0], [1], [0, 0, 1, 1], [], []>} : vector<28x32xf32>, vector<32x84xf32>, vector<28x84xf32> -> vector<28x84xf32>
    %25 = arith.addf %16, %24 : vector<28x84xf32>
    %26 = vector.extract_strided_slice %5 {offsets = [2, 0], sizes = [28, 32], strides = [1, 1]} : vector<32x32xf32> to vector<28x32xf32>
    %c2 = arith.constant 2 : index
    %c0_25 = arith.constant 0 : index
    %c0_26 = arith.constant 0 : index
    %27 = vector.load %arg2[%c2, %c0_25, %c0_26] : memref<5x32x84xf32, #tpu.memory_space<vmem>>, vector<1x32x84xf32>
    %28 = vector.shape_cast %27 : vector<1x32x84xf32> to vector<32x84xf32>
    %cst_27 = arith.constant dense<0.000000e+00> : vector<28x84xf32>
    %29 = tpu.matmul %26, %28, %cst_27 {dimension_numbers = #tpu.dot_dimension_numbers<[1], [0], [0], [1], [0, 0, 1, 1], [], []>} : vector<28x32xf32>, vector<32x84xf32>, vector<28x84xf32> -> vector<28x84xf32>
    %30 = arith.addf %21, %29 : vector<28x84xf32>
    %c2_28 = arith.constant 2 : index
    %c0_29 = arith.constant 0 : index
    %c0_30 = arith.constant 0 : index
    %31 = vector.load %arg3[%c2_28, %c0_29, %c0_30] : memref<5x32x84xf32, #tpu.memory_space<vmem>>, vector<1x32x84xf32>
    %32 = vector.shape_cast %31 : vector<1x32x84xf32> to vector<32x84xf32>
    %cst_31 = arith.constant dense<0.000000e+00> : vector<28x84xf32>
    %33 = tpu.matmul %26, %32, %cst_31 {dimension_numbers = #tpu.dot_dimension_numbers<[1], [0], [0], [1], [0, 0, 1, 1], [], []>} : vector<28x32xf32>, vector<32x84xf32>, vector<28x84xf32> -> vector<28x84xf32>
    %34 = arith.addf %25, %33 : vector<28x84xf32>
    %35 = vector.extract_strided_slice %5 {offsets = [3, 0], sizes = [28, 32], strides = [1, 1]} : vector<32x32xf32> to vector<28x32xf32>
    %c3 = arith.constant 3 : index
    %c0_32 = arith.constant 0 : index
    %c0_33 = arith.constant 0 : index
    %36 = vector.load %arg2[%c3, %c0_32, %c0_33] : memref<5x32x84xf32, #tpu.memory_space<vmem>>, vector<1x32x84xf32>
    %37 = vector.shape_cast %36 : vector<1x32x84xf32> to vector<32x84xf32>
    %cst_34 = arith.constant dense<0.000000e+00> : vector<28x84xf32>
    %38 = tpu.matmul %35, %37, %cst_34 {dimension_numbers = #tpu.dot_dimension_numbers<[1], [0], [0], [1], [0, 0, 1, 1], [], []>} : vector<28x32xf32>, vector<32x84xf32>, vector<28x84xf32> -> vector<28x84xf32>
    %39 = arith.addf %30, %38 : vector<28x84xf32>
    %c3_35 = arith.constant 3 : index
    %c0_36 = arith.constant 0 : index
    %c0_37 = arith.constant 0 : index
    %40 = vector.load %arg3[%c3_35, %c0_36, %c0_37] : memref<5x32x84xf32, #tpu.memory_space<vmem>>, vector<1x32x84xf32>
    %41 = vector.shape_cast %40 : vector<1x32x84xf32> to vector<32x84xf32>
    %cst_38 = arith.constant dense<0.000000e+00> : vector<28x84xf32>
    %42 = tpu.matmul %35, %41, %cst_38 {dimension_numbers = #tpu.dot_dimension_numbers<[1], [0], [0], [1], [0, 0, 1, 1], [], []>} : vector<28x32xf32>, vector<32x84xf32>, vector<28x84xf32> -> vector<28x84xf32>
    %43 = arith.addf %34, %42 : vector<28x84xf32>
    %44 = vector.extract_strided_slice %5 {offsets = [4, 0], sizes = [28, 32], strides = [1, 1]} : vector<32x32xf32> to vector<28x32xf32>
    %c4 = arith.constant 4 : index
    %c0_39 = arith.constant 0 : index
    %c0_40 = arith.constant 0 : index
    %45 = vector.load %arg2[%c4, %c0_39, %c0_40] : memref<5x32x84xf32, #tpu.memory_space<vmem>>, vector<1x32x84xf32>
    %46 = vector.shape_cast %45 : vector<1x32x84xf32> to vector<32x84xf32>
    %cst_41 = arith.constant dense<0.000000e+00> : vector<28x84xf32>
    %47 = tpu.matmul %44, %46, %cst_41 {dimension_numbers = #tpu.dot_dimension_numbers<[1], [0], [0], [1], [0, 0, 1, 1], [], []>} : vector<28x32xf32>, vector<32x84xf32>, vector<28x84xf32> -> vector<28x84xf32>
    %48 = arith.addf %39, %47 : vector<28x84xf32>
    %c4_42 = arith.constant 4 : index
    %c0_43 = arith.constant 0 : index
    %c0_44 = arith.constant 0 : index
    %49 = vector.load %arg3[%c4_42, %c0_43, %c0_44] : memref<5x32x84xf32, #tpu.memory_space<vmem>>, vector<1x32x84xf32>
    %50 = vector.shape_cast %49 : vector<1x32x84xf32> to vector<32x84xf32>
    %cst_45 = arith.constant dense<0.000000e+00> : vector<28x84xf32>
    %51 = tpu.matmul %44, %50, %cst_45 {dimension_numbers = #tpu.dot_dimension_numbers<[1], [0], [0], [1], [0, 0, 1, 1], [], []>} : vector<28x32xf32>, vector<32x84xf32>, vector<28x84xf32> -> vector<28x84xf32>
    %52 = arith.addf %43, %51 : vector<28x84xf32>
    %53 = arith.maximumf %48, %52 : vector<28x84xf32>
    %54 = vector.extract_strided_slice %53 {offsets = [0, 0], sizes = [1, 84], strides = [1, 1]} : vector<28x84xf32> to vector<1x84xf32>
    %55 = vector.extract_strided_slice %53 {offsets = [1, 0], sizes = [1, 84], strides = [1, 1]} : vector<28x84xf32> to vector<1x84xf32>
    %56 = arith.maximumf %54, %55 : vector<1x84xf32>
    %57 = arith.addf %56, %2 : vector<1x84xf32>
    %cst_46 = arith.constant 0.000000e+00 : f32
    %58 = vector.broadcast %cst_46 : f32 to vector<1x84xf32>
    %59 = arith.maximumf %57, %58 : vector<1x84xf32>
    %c0_47 = arith.constant 0 : index
    %c0_48 = arith.constant 0 : index
    %60 = vector.load %arg15[%c0_47, %c0_48] : memref<14x84xf32, #tpu.memory_space<vmem>>, vector<1x84xf32>
    tpu.vector_store %arg15[%c0_47, %c0_48], %59 {strides = array<i32>} : memref<14x84xf32, #tpu.memory_space<vmem>>, vector<1x84xf32>,
    %61 = vector.extract_strided_slice %53 {offsets = [2, 0], sizes = [1, 84], strides = [1, 1]} : vector<28x84xf32> to vector<1x84xf32>
    %62 = vector.extract_strided_slice %53 {offsets = [3, 0], sizes = [1, 84], strides = [1, 1]} : vector<28x84xf32> to vector<1x84xf32>
    %63 = arith.maximumf %61, %62 : vector<1x84xf32>
    %64 = arith.addf %63, %2 : vector<1x84xf32>
    %cst_49 = arith.constant 0.000000e+00 : f32
    %65 = vector.broadcast %cst_49 : f32 to vector<1x84xf32>
    %66 = arith.maximumf %64, %65 : vector<1x84xf32>
    %c1_50 = arith.constant 1 : index
    %c0_51 = arith.constant 0 : index
    %67 = vector.load %arg15[%c1_50, %c0_51] : memref<14x84xf32, #tpu.memory_space<vmem>>, vector<1x84xf32>
    tpu.vector_store %arg15[%c1_50, %c0_51], %66 {strides = array<i32>} : memref<14x84xf32, #tpu.memory_space<vmem>>, vector<1x84xf32>,
    %68 = vector.extract_strided_slice %53 {offsets = [4, 0], sizes = [1, 84], strides = [1, 1]} : vector<28x84xf32> to vector<1x84xf32>
    %69 = vector.extract_strided_slice %53 {offsets = [5, 0], sizes = [1, 84], strides = [1, 1]} : vector<28x84xf32> to vector<1x84xf32>
    %70 = arith.maximumf %68, %69 : vector<1x84xf32>
    %71 = arith.addf %70, %2 : vector<1x84xf32>
    %cst_52 = arith.constant 0.000000e+00 : f32
    %72 = vector.broadcast %cst_52 : f32 to vector<1x84xf32>
    %73 = arith.maximumf %71, %72 : vector<1x84xf32>
    %c2_53 = arith.constant 2 : index
    %c0_54 = arith.constant 0 : index
    %74 = vector.load %arg15[%c2_53, %c0_54] : memref<14x84xf32, #tpu.memory_space<vmem>>, vector<1x84xf32>
    tpu.vector_store %arg15[%c2_53, %c0_54], %73 {strides = array<i32>} : memref<14x84xf32, #tpu.memory_space<vmem>>, vector<1x84xf32>,
    %75 = vector.extract_strided_slice %53 {offsets = [6, 0], sizes = [1, 84], strides = [1, 1]} : vector<28x84xf32> to vector<1x84xf32>
    %76 = vector.extract_strided_slice %53 {offsets = [7, 0], sizes = [1, 84], strides = [1, 1]} : vector<28x84xf32> to vector<1x84xf32>
    %77 = arith.maximumf %75, %76 : vector<1x84xf32>
    %78 = arith.addf %77, %2 : vector<1x84xf32>
    %cst_55 = arith.constant 0.000000e+00 : f32
    %79 = vector.broadcast %cst_55 : f32 to vector<1x84xf32>
    %80 = arith.maximumf %78, %79 : vector<1x84xf32>
    %c3_56 = arith.constant 3 : index
    %c0_57 = arith.constant 0 : index
    %81 = vector.load %arg15[%c3_56, %c0_57] : memref<14x84xf32, #tpu.memory_space<vmem>>, vector<1x84xf32>
    tpu.vector_store %arg15[%c3_56, %c0_57], %80 {strides = array<i32>} : memref<14x84xf32, #tpu.memory_space<vmem>>, vector<1x84xf32>,
    %82 = vector.extract_strided_slice %53 {offsets = [8, 0], sizes = [1, 84], strides = [1, 1]} : vector<28x84xf32> to vector<1x84xf32>
    %83 = vector.extract_strided_slice %53 {offsets = [9, 0], sizes = [1, 84], strides = [1, 1]} : vector<28x84xf32> to vector<1x84xf32>
    %84 = arith.maximumf %82, %83 : vector<1x84xf32>
    %85 = arith.addf %84, %2 : vector<1x84xf32>
    %cst_58 = arith.constant 0.000000e+00 : f32
    %86 = vector.broadcast %cst_58 : f32 to vector<1x84xf32>
    %87 = arith.maximumf %85, %86 : vector<1x84xf32>
    %c4_59 = arith.constant 4 : index
    %c0_60 = arith.constant 0 : index
    %88 = vector.load %arg15[%c4_59, %c0_60] : memref<14x84xf32, #tpu.memory_space<vmem>>, vector<1x84xf32>
    tpu.vector_store %arg15[%c4_59, %c0_60], %87 {strides = array<i32>} : memref<14x84xf32, #tpu.memory_space<vmem>>, vector<1x84xf32>,
    %89 = vector.extract_strided_slice %53 {offsets = [10, 0], sizes = [1, 84], strides = [1, 1]} : vector<28x84xf32> to vector<1x84xf32>
    %90 = vector.extract_strided_slice %53 {offsets = [11, 0], sizes = [1, 84], strides = [1, 1]} : vector<28x84xf32> to vector<1x84xf32>
    %91 = arith.maximumf %89, %90 : vector<1x84xf32>
    %92 = arith.addf %91, %2 : vector<1x84xf32>
    %cst_61 = arith.constant 0.000000e+00 : f32
    %93 = vector.broadcast %cst_61 : f32 to vector<1x84xf32>
    %94 = arith.maximumf %92, %93 : vector<1x84xf32>
    %c5 = arith.constant 5 : index
    %c0_62 = arith.constant 0 : index
    %95 = vector.load %arg15[%c5, %c0_62] : memref<14x84xf32, #tpu.memory_space<vmem>>, vector<1x84xf32>
    tpu.vector_store %arg15[%c5, %c0_62], %94 {strides = array<i32>} : memref<14x84xf32, #tpu.memory_space<vmem>>, vector<1x84xf32>,
    %96 = vector.extract_strided_slice %53 {offsets = [12, 0], sizes = [1, 84], strides = [1, 1]} : vector<28x84xf32> to vector<1x84xf32>
    %97 = vector.extract_strided_slice %53 {offsets = [13, 0], sizes = [1, 84], strides = [1, 1]} : vector<28x84xf32> to vector<1x84xf32>
    %98 = arith.maximumf %96, %97 : vector<1x84xf32>
    %99 = arith.addf %98, %2 : vector<1x84xf32>
    %cst_63 = arith.constant 0.000000e+00 : f32
    %100 = vector.broadcast %cst_63 : f32 to vector<1x84xf32>
    %101 = arith.maximumf %99, %100 : vector<1x84xf32>
    %c6 = arith.constant 6 : index
    %c0_64 = arith.constant 0 : index
    %102 = vector.load %arg15[%c6, %c0_64] : memref<14x84xf32, #tpu.memory_space<vmem>>, vector<1x84xf32>
    tpu.vector_store %arg15[%c6, %c0_64], %101 {strides = array<i32>} : memref<14x84xf32, #tpu.memory_space<vmem>>, vector<1x84xf32>,
    %103 = vector.extract_strided_slice %53 {offsets = [14, 0], sizes = [1, 84], strides = [1, 1]} : vector<28x84xf32> to vector<1x84xf32>
    %104 = vector.extract_strided_slice %53 {offsets = [15, 0], sizes = [1, 84], strides = [1, 1]} : vector<28x84xf32> to vector<1x84xf32>
    %105 = arith.maximumf %103, %104 : vector<1x84xf32>
    %106 = arith.addf %105, %2 : vector<1x84xf32>
    %cst_65 = arith.constant 0.000000e+00 : f32
    %107 = vector.broadcast %cst_65 : f32 to vector<1x84xf32>
    %108 = arith.maximumf %106, %107 : vector<1x84xf32>
    %c7 = arith.constant 7 : index
    %c0_66 = arith.constant 0 : index
    %109 = vector.load %arg15[%c7, %c0_66] : memref<14x84xf32, #tpu.memory_space<vmem>>, vector<1x84xf32>
    tpu.vector_store %arg15[%c7, %c0_66], %108 {strides = array<i32>} : memref<14x84xf32, #tpu.memory_space<vmem>>, vector<1x84xf32>,
    %110 = vector.extract_strided_slice %53 {offsets = [16, 0], sizes = [1, 84], strides = [1, 1]} : vector<28x84xf32> to vector<1x84xf32>
    %111 = vector.extract_strided_slice %53 {offsets = [17, 0], sizes = [1, 84], strides = [1, 1]} : vector<28x84xf32> to vector<1x84xf32>
    %112 = arith.maximumf %110, %111 : vector<1x84xf32>
    %113 = arith.addf %112, %2 : vector<1x84xf32>
    %cst_67 = arith.constant 0.000000e+00 : f32
    %114 = vector.broadcast %cst_67 : f32 to vector<1x84xf32>
    %115 = arith.maximumf %113, %114 : vector<1x84xf32>
    %c8 = arith.constant 8 : index
    %c0_68 = arith.constant 0 : index
    %116 = vector.load %arg15[%c8, %c0_68] : memref<14x84xf32, #tpu.memory_space<vmem>>, vector<1x84xf32>
    tpu.vector_store %arg15[%c8, %c0_68], %115 {strides = array<i32>} : memref<14x84xf32, #tpu.memory_space<vmem>>, vector<1x84xf32>,
    %117 = vector.extract_strided_slice %53 {offsets = [18, 0], sizes = [1, 84], strides = [1, 1]} : vector<28x84xf32> to vector<1x84xf32>
    %118 = vector.extract_strided_slice %53 {offsets = [19, 0], sizes = [1, 84], strides = [1, 1]} : vector<28x84xf32> to vector<1x84xf32>
    %119 = arith.maximumf %117, %118 : vector<1x84xf32>
    %120 = arith.addf %119, %2 : vector<1x84xf32>
    %cst_69 = arith.constant 0.000000e+00 : f32
    %121 = vector.broadcast %cst_69 : f32 to vector<1x84xf32>
    %122 = arith.maximumf %120, %121 : vector<1x84xf32>
    %c9 = arith.constant 9 : index
    %c0_70 = arith.constant 0 : index
    %123 = vector.load %arg15[%c9, %c0_70] : memref<14x84xf32, #tpu.memory_space<vmem>>, vector<1x84xf32>
    tpu.vector_store %arg15[%c9, %c0_70], %122 {strides = array<i32>} : memref<14x84xf32, #tpu.memory_space<vmem>>, vector<1x84xf32>,
    %124 = vector.extract_strided_slice %53 {offsets = [20, 0], sizes = [1, 84], strides = [1, 1]} : vector<28x84xf32> to vector<1x84xf32>
    %125 = vector.extract_strided_slice %53 {offsets = [21, 0], sizes = [1, 84], strides = [1, 1]} : vector<28x84xf32> to vector<1x84xf32>
    %126 = arith.maximumf %124, %125 : vector<1x84xf32>
    %127 = arith.addf %126, %2 : vector<1x84xf32>
    %cst_71 = arith.constant 0.000000e+00 : f32
    %128 = vector.broadcast %cst_71 : f32 to vector<1x84xf32>
    %129 = arith.maximumf %127, %128 : vector<1x84xf32>
    %c10 = arith.constant 10 : index
    %c0_72 = arith.constant 0 : index
    %130 = vector.load %arg15[%c10, %c0_72] : memref<14x84xf32, #tpu.memory_space<vmem>>, vector<1x84xf32>
    tpu.vector_store %arg15[%c10, %c0_72], %129 {strides = array<i32>} : memref<14x84xf32, #tpu.memory_space<vmem>>, vector<1x84xf32>,
    %131 = vector.extract_strided_slice %53 {offsets = [22, 0], sizes = [1, 84], strides = [1, 1]} : vector<28x84xf32> to vector<1x84xf32>
    %132 = vector.extract_strided_slice %53 {offsets = [23, 0], sizes = [1, 84], strides = [1, 1]} : vector<28x84xf32> to vector<1x84xf32>
    %133 = arith.maximumf %131, %132 : vector<1x84xf32>
    %134 = arith.addf %133, %2 : vector<1x84xf32>
    %cst_73 = arith.constant 0.000000e+00 : f32
    %135 = vector.broadcast %cst_73 : f32 to vector<1x84xf32>
    %136 = arith.maximumf %134, %135 : vector<1x84xf32>
    %c11 = arith.constant 11 : index
    %c0_74 = arith.constant 0 : index
    %137 = vector.load %arg15[%c11, %c0_74] : memref<14x84xf32, #tpu.memory_space<vmem>>, vector<1x84xf32>
    tpu.vector_store %arg15[%c11, %c0_74], %136 {strides = array<i32>} : memref<14x84xf32, #tpu.memory_space<vmem>>, vector<1x84xf32>,
    %138 = vector.extract_strided_slice %53 {offsets = [24, 0], sizes = [1, 84], strides = [1, 1]} : vector<28x84xf32> to vector<1x84xf32>
    %139 = vector.extract_strided_slice %53 {offsets = [25, 0], sizes = [1, 84], strides = [1, 1]} : vector<28x84xf32> to vector<1x84xf32>
    %140 = arith.maximumf %138, %139 : vector<1x84xf32>
    %141 = arith.addf %140, %2 : vector<1x84xf32>
    %cst_75 = arith.constant 0.000000e+00 : f32
    %142 = vector.broadcast %cst_75 : f32 to vector<1x84xf32>
    %143 = arith.maximumf %141, %142 : vector<1x84xf32>
    %c12 = arith.constant 12 : index
    %c0_76 = arith.constant 0 : index
    %144 = vector.load %arg15[%c12, %c0_76] : memref<14x84xf32, #tpu.memory_space<vmem>>, vector<1x84xf32>
    tpu.vector_store %arg15[%c12, %c0_76], %143 {strides = array<i32>} : memref<14x84xf32, #tpu.memory_space<vmem>>, vector<1x84xf32>,
    %145 = vector.extract_strided_slice %53 {offsets = [26, 0], sizes = [1, 84], strides = [1, 1]} : vector<28x84xf32> to vector<1x84xf32>
    %146 = vector.extract_strided_slice %53 {offsets = [27, 0], sizes = [1, 84], strides = [1, 1]} : vector<28x84xf32> to vector<1x84xf32>
    %147 = arith.maximumf %145, %146 : vector<1x84xf32>
    %148 = arith.addf %147, %2 : vector<1x84xf32>
    %cst_77 = arith.constant 0.000000e+00 : f32
    %149 = vector.broadcast %cst_77 : f32 to vector<1x84xf32>
    %150 = arith.maximumf %148, %149 : vector<1x84xf32>
    %c13 = arith.constant 13 : index
    %c0_78 = arith.constant 0 : index
    %151 = vector.load %arg15[%c13, %c0_78] : memref<14x84xf32, #tpu.memory_space<vmem>>, vector<1x84xf32>
    tpu.vector_store %arg15[%c13, %c0_78], %150 {strides = array<i32>} : memref<14x84xf32, #tpu.memory_space<vmem>>, vector<1x84xf32>,
    %c0_79 = arith.constant 0 : index
    %c0_80 = arith.constant 0 : index
    %152 = vector.load %arg15[%c0_79, %c0_80] : memref<14x84xf32, #tpu.memory_space<vmem>>, vector<14x84xf32>
    %cst_81 = arith.constant 0.000000e+00 : f32
    %153 = vector.broadcast %cst_81 : f32 to vector<10x80xf32>
    %cst_82 = arith.constant 0.000000e+00 : f32
    %154 = vector.broadcast %cst_82 : f32 to vector<10x80xf32>
    %155 = vector.extract_strided_slice %152 {offsets = [0, 0], sizes = [10, 84], strides = [1, 1]} : vector<14x84xf32> to vector<10x84xf32>
    %c0_83 = arith.constant 0 : index
    %c0_84 = arith.constant 0 : index
    %c0_85 = arith.constant 0 : index
    %156 = vector.load %arg5[%c0_83, %c0_84, %c0_85] : memref<5x84x80xf32, #tpu.memory_space<vmem>>, vector<1x84x80xf32>
    %157 = vector.shape_cast %156 : vector<1x84x80xf32> to vector<84x80xf32>
    %cst_86 = arith.constant dense<0.000000e+00> : vector<10x80xf32>
    %158 = tpu.matmul %155, %157, %cst_86 {dimension_numbers = #tpu.dot_dimension_numbers<[1], [0], [0], [1], [0, 0, 1, 1], [], []>} : vector<10x84xf32>, vector<84x80xf32>, vector<10x80xf32> -> vector<10x80xf32>
    %159 = arith.addf %153, %158 : vector<10x80xf32>
    %c0_87 = arith.constant 0 : index
    %c0_88 = arith.constant 0 : index
    %c0_89 = arith.constant 0 : index
    %160 = vector.load %arg6[%c0_87, %c0_88, %c0_89] : memref<5x84x80xf32, #tpu.memory_space<vmem>>, vector<1x84x80xf32>
    %161 = vector.shape_cast %160 : vector<1x84x80xf32> to vector<84x80xf32>
    %cst_90 = arith.constant dense<0.000000e+00> : vector<10x80xf32>
    %162 = tpu.matmul %155, %161, %cst_90 {dimension_numbers = #tpu.dot_dimension_numbers<[1], [0], [0], [1], [0, 0, 1, 1], [], []>} : vector<10x84xf32>, vector<84x80xf32>, vector<10x80xf32> -> vector<10x80xf32>
    %163 = arith.addf %154, %162 : vector<10x80xf32>
    %164 = vector.extract_strided_slice %152 {offsets = [1, 0], sizes = [10, 84], strides = [1, 1]} : vector<14x84xf32> to vector<10x84xf32>
    %c1_91 = arith.constant 1 : index
    %c0_92 = arith.constant 0 : index
    %c0_93 = arith.constant 0 : index
    %165 = vector.load %arg5[%c1_91, %c0_92, %c0_93] : memref<5x84x80xf32, #tpu.memory_space<vmem>>, vector<1x84x80xf32>
    %166 = vector.shape_cast %165 : vector<1x84x80xf32> to vector<84x80xf32>
    %cst_94 = arith.constant dense<0.000000e+00> : vector<10x80xf32>
    %167 = tpu.matmul %164, %166, %cst_94 {dimension_numbers = #tpu.dot_dimension_numbers<[1], [0], [0], [1], [0, 0, 1, 1], [], []>} : vector<10x84xf32>, vector<84x80xf32>, vector<10x80xf32> -> vector<10x80xf32>
    %168 = arith.addf %159, %167 : vector<10x80xf32>
    %c1_95 = arith.constant 1 : index
    %c0_96 = arith.constant 0 : index
    %c0_97 = arith.constant 0 : index
    %169 = vector.load %arg6[%c1_95, %c0_96, %c0_97] : memref<5x84x80xf32, #tpu.memory_space<vmem>>, vector<1x84x80xf32>
    %170 = vector.shape_cast %169 : vector<1x84x80xf32> to vector<84x80xf32>
    %cst_98 = arith.constant dense<0.000000e+00> : vector<10x80xf32>
    %171 = tpu.matmul %164, %170, %cst_98 {dimension_numbers = #tpu.dot_dimension_numbers<[1], [0], [0], [1], [0, 0, 1, 1], [], []>} : vector<10x84xf32>, vector<84x80xf32>, vector<10x80xf32> -> vector<10x80xf32>
    %172 = arith.addf %163, %171 : vector<10x80xf32>
    %173 = vector.extract_strided_slice %152 {offsets = [2, 0], sizes = [10, 84], strides = [1, 1]} : vector<14x84xf32> to vector<10x84xf32>
    %c2_99 = arith.constant 2 : index
    %c0_100 = arith.constant 0 : index
    %c0_101 = arith.constant 0 : index
    %174 = vector.load %arg5[%c2_99, %c0_100, %c0_101] : memref<5x84x80xf32, #tpu.memory_space<vmem>>, vector<1x84x80xf32>
    %175 = vector.shape_cast %174 : vector<1x84x80xf32> to vector<84x80xf32>
    %cst_102 = arith.constant dense<0.000000e+00> : vector<10x80xf32>
    %176 = tpu.matmul %173, %175, %cst_102 {dimension_numbers = #tpu.dot_dimension_numbers<[1], [0], [0], [1], [0, 0, 1, 1], [], []>} : vector<10x84xf32>, vector<84x80xf32>, vector<10x80xf32> -> vector<10x80xf32>
    %177 = arith.addf %168, %176 : vector<10x80xf32>
    %c2_103 = arith.constant 2 : index
    %c0_104 = arith.constant 0 : index
    %c0_105 = arith.constant 0 : index
    %178 = vector.load %arg6[%c2_103, %c0_104, %c0_105] : memref<5x84x80xf32, #tpu.memory_space<vmem>>, vector<1x84x80xf32>
    %179 = vector.shape_cast %178 : vector<1x84x80xf32> to vector<84x80xf32>
    %cst_106 = arith.constant dense<0.000000e+00> : vector<10x80xf32>
    %180 = tpu.matmul %173, %179, %cst_106 {dimension_numbers = #tpu.dot_dimension_numbers<[1], [0], [0], [1], [0, 0, 1, 1], [], []>} : vector<10x84xf32>, vector<84x80xf32>, vector<10x80xf32> -> vector<10x80xf32>
    %181 = arith.addf %172, %180 : vector<10x80xf32>
    %182 = vector.extract_strided_slice %152 {offsets = [3, 0], sizes = [10, 84], strides = [1, 1]} : vector<14x84xf32> to vector<10x84xf32>
    %c3_107 = arith.constant 3 : index
    %c0_108 = arith.constant 0 : index
    %c0_109 = arith.constant 0 : index
    %183 = vector.load %arg5[%c3_107, %c0_108, %c0_109] : memref<5x84x80xf32, #tpu.memory_space<vmem>>, vector<1x84x80xf32>
    %184 = vector.shape_cast %183 : vector<1x84x80xf32> to vector<84x80xf32>
    %cst_110 = arith.constant dense<0.000000e+00> : vector<10x80xf32>
    %185 = tpu.matmul %182, %184, %cst_110 {dimension_numbers = #tpu.dot_dimension_numbers<[1], [0], [0], [1], [0, 0, 1, 1], [], []>} : vector<10x84xf32>, vector<84x80xf32>, vector<10x80xf32> -> vector<10x80xf32>
    %186 = arith.addf %177, %185 : vector<10x80xf32>
    %c3_111 = arith.constant 3 : index
    %c0_112 = arith.constant 0 : index
    %c0_113 = arith.constant 0 : index
    %187 = vector.load %arg6[%c3_111, %c0_112, %c0_113] : memref<5x84x80xf32, #tpu.memory_space<vmem>>, vector<1x84x80xf32>
    %188 = vector.shape_cast %187 : vector<1x84x80xf32> to vector<84x80xf32>
    %cst_114 = arith.constant dense<0.000000e+00> : vector<10x80xf32>
    %189 = tpu.matmul %182, %188, %cst_114 {dimension_numbers = #tpu.dot_dimension_numbers<[1], [0], [0], [1], [0, 0, 1, 1], [], []>} : vector<10x84xf32>, vector<84x80xf32>, vector<10x80xf32> -> vector<10x80xf32>
    %190 = arith.addf %181, %189 : vector<10x80xf32>
    %191 = vector.extract_strided_slice %152 {offsets = [4, 0], sizes = [10, 84], strides = [1, 1]} : vector<14x84xf32> to vector<10x84xf32>
    %c4_115 = arith.constant 4 : index
    %c0_116 = arith.constant 0 : index
    %c0_117 = arith.constant 0 : index
    %192 = vector.load %arg5[%c4_115, %c0_116, %c0_117] : memref<5x84x80xf32, #tpu.memory_space<vmem>>, vector<1x84x80xf32>
    %193 = vector.shape_cast %192 : vector<1x84x80xf32> to vector<84x80xf32>
    %cst_118 = arith.constant dense<0.000000e+00> : vector<10x80xf32>
    %194 = tpu.matmul %191, %193, %cst_118 {dimension_numbers = #tpu.dot_dimension_numbers<[1], [0], [0], [1], [0, 0, 1, 1], [], []>} : vector<10x84xf32>, vector<84x80xf32>, vector<10x80xf32> -> vector<10x80xf32>
    %195 = arith.addf %186, %194 : vector<10x80xf32>
    %c4_119 = arith.constant 4 : index
    %c0_120 = arith.constant 0 : index
    %c0_121 = arith.constant 0 : index
    %196 = vector.load %arg6[%c4_119, %c0_120, %c0_121] : memref<5x84x80xf32, #tpu.memory_space<vmem>>, vector<1x84x80xf32>
    %197 = vector.shape_cast %196 : vector<1x84x80xf32> to vector<84x80xf32>
    %cst_122 = arith.constant dense<0.000000e+00> : vector<10x80xf32>
    %198 = tpu.matmul %191, %197, %cst_122 {dimension_numbers = #tpu.dot_dimension_numbers<[1], [0], [0], [1], [0, 0, 1, 1], [], []>} : vector<10x84xf32>, vector<84x80xf32>, vector<10x80xf32> -> vector<10x80xf32>
    %199 = arith.addf %190, %198 : vector<10x80xf32>
    %200 = arith.maximumf %195, %199 : vector<10x80xf32>
    %201 = vector.extract_strided_slice %200 {offsets = [0, 0], sizes = [1, 80], strides = [1, 1]} : vector<10x80xf32> to vector<1x80xf32>
    %202 = vector.extract_strided_slice %200 {offsets = [1, 0], sizes = [1, 80], strides = [1, 1]} : vector<10x80xf32> to vector<1x80xf32>
    %203 = arith.maximumf %201, %202 : vector<1x80xf32>
    %204 = arith.addf %203, %3 : vector<1x80xf32>
    %cst_123 = arith.constant 0.000000e+00 : f32
    %205 = vector.broadcast %cst_123 : f32 to vector<1x80xf32>
    %206 = arith.maximumf %204, %205 : vector<1x80xf32>
    %c0_124 = arith.constant 0 : index
    %c0_125 = arith.constant 0 : index
    %207 = vector.load %arg16[%c0_124, %c0_125] : memref<2x640xf32, #tpu.memory_space<vmem>>, vector<1x80xf32>
    tpu.vector_store %arg16[%c0_124, %c0_125], %206 {strides = array<i32>} : memref<2x640xf32, #tpu.memory_space<vmem>>, vector<1x80xf32>,
    %208 = vector.extract_strided_slice %200 {offsets = [2, 0], sizes = [1, 80], strides = [1, 1]} : vector<10x80xf32> to vector<1x80xf32>
    %209 = vector.extract_strided_slice %200 {offsets = [3, 0], sizes = [1, 80], strides = [1, 1]} : vector<10x80xf32> to vector<1x80xf32>
    %210 = arith.maximumf %208, %209 : vector<1x80xf32>
    %211 = arith.addf %210, %3 : vector<1x80xf32>
    %cst_126 = arith.constant 0.000000e+00 : f32
    %212 = vector.broadcast %cst_126 : f32 to vector<1x80xf32>
    %213 = arith.maximumf %211, %212 : vector<1x80xf32>
    %c0_127 = arith.constant 0 : index
    %c128 = arith.constant 128 : index
    %214 = vector.load %arg16[%c0_127, %c128] : memref<2x640xf32, #tpu.memory_space<vmem>>, vector<1x80xf32>
    tpu.vector_store %arg16[%c0_127, %c128], %213 {strides = array<i32>} : memref<2x640xf32, #tpu.memory_space<vmem>>, vector<1x80xf32>,
    %215 = vector.extract_strided_slice %200 {offsets = [4, 0], sizes = [1, 80], strides = [1, 1]} : vector<10x80xf32> to vector<1x80xf32>
    %216 = vector.extract_strided_slice %200 {offsets = [5, 0], sizes = [1, 80], strides = [1, 1]} : vector<10x80xf32> to vector<1x80xf32>
    %217 = arith.maximumf %215, %216 : vector<1x80xf32>
    %218 = arith.addf %217, %3 : vector<1x80xf32>
    %cst_128 = arith.constant 0.000000e+00 : f32
    %219 = vector.broadcast %cst_128 : f32 to vector<1x80xf32>
    %220 = arith.maximumf %218, %219 : vector<1x80xf32>
    %c0_129 = arith.constant 0 : index
    %c256 = arith.constant 256 : index
    %221 = vector.load %arg16[%c0_129, %c256] : memref<2x640xf32, #tpu.memory_space<vmem>>, vector<1x80xf32>
    tpu.vector_store %arg16[%c0_129, %c256], %220 {strides = array<i32>} : memref<2x640xf32, #tpu.memory_space<vmem>>, vector<1x80xf32>,
    %222 = vector.extract_strided_slice %200 {offsets = [6, 0], sizes = [1, 80], strides = [1, 1]} : vector<10x80xf32> to vector<1x80xf32>
    %223 = vector.extract_strided_slice %200 {offsets = [7, 0], sizes = [1, 80], strides = [1, 1]} : vector<10x80xf32> to vector<1x80xf32>
    %224 = arith.maximumf %222, %223 : vector<1x80xf32>
    %225 = arith.addf %224, %3 : vector<1x80xf32>
    %cst_130 = arith.constant 0.000000e+00 : f32
    %226 = vector.broadcast %cst_130 : f32 to vector<1x80xf32>
    %227 = arith.maximumf %225, %226 : vector<1x80xf32>
    %c0_131 = arith.constant 0 : index
    %c384 = arith.constant 384 : index
    %228 = vector.load %arg16[%c0_131, %c384] : memref<2x640xf32, #tpu.memory_space<vmem>>, vector<1x80xf32>
    tpu.vector_store %arg16[%c0_131, %c384], %227 {strides = array<i32>} : memref<2x640xf32, #tpu.memory_space<vmem>>, vector<1x80xf32>,
    %229 = vector.extract_strided_slice %200 {offsets = [8, 0], sizes = [1, 80], strides = [1, 1]} : vector<10x80xf32> to vector<1x80xf32>
    %230 = vector.extract_strided_slice %200 {offsets = [9, 0], sizes = [1, 80], strides = [1, 1]} : vector<10x80xf32> to vector<1x80xf32>
    %231 = arith.maximumf %229, %230 : vector<1x80xf32>
    %232 = arith.addf %231, %3 : vector<1x80xf32>
    %cst_132 = arith.constant 0.000000e+00 : f32
    %233 = vector.broadcast %cst_132 : f32 to vector<1x80xf32>
    %234 = arith.maximumf %232, %233 : vector<1x80xf32>
    %c0_133 = arith.constant 0 : index
    %c512 = arith.constant 512 : index
    %235 = vector.load %arg16[%c0_133, %c512] : memref<2x640xf32, #tpu.memory_space<vmem>>, vector<1x80xf32>
    tpu.vector_store %arg16[%c0_133, %c512], %234 {strides = array<i32>} : memref<2x640xf32, #tpu.memory_space<vmem>>, vector<1x80xf32>,
    %c1_134 = arith.constant 1 : index
    %c0_135 = arith.constant 0 : index
    %c0_136 = arith.constant 0 : index
    %236 = vector.load %arg1[%c1_134, %c0_135, %c0_136] : memref<2x32x32xf32, #tpu.memory_space<vmem>>, vector<1x32x32xf32>
    %237 = vector.shape_cast %236 : vector<1x32x32xf32> to vector<32x32xf32>
    %cst_137 = arith.constant 0.000000e+00 : f32
    %238 = vector.broadcast %cst_137 : f32 to vector<28x84xf32>
    %cst_138 = arith.constant 0.000000e+00 : f32
    %239 = vector.broadcast %cst_138 : f32 to vector<28x84xf32>
    %240 = vector.extract_strided_slice %237 {offsets = [0, 0], sizes = [28, 32], strides = [1, 1]} : vector<32x32xf32> to vector<28x32xf32>
    %c0_139 = arith.constant 0 : index
    %c0_140 = arith.constant 0 : index
    %c0_141 = arith.constant 0 : index
    %241 = vector.load %arg2[%c0_139, %c0_140, %c0_141] : memref<5x32x84xf32, #tpu.memory_space<vmem>>, vector<1x32x84xf32>
    %242 = vector.shape_cast %241 : vector<1x32x84xf32> to vector<32x84xf32>
    %cst_142 = arith.constant dense<0.000000e+00> : vector<28x84xf32>
    %243 = tpu.matmul %240, %242, %cst_142 {dimension_numbers = #tpu.dot_dimension_numbers<[1], [0], [0], [1], [0, 0, 1, 1], [], []>} : vector<28x32xf32>, vector<32x84xf32>, vector<28x84xf32> -> vector<28x84xf32>
    %244 = arith.addf %238, %243 : vector<28x84xf32>
    %c0_143 = arith.constant 0 : index
    %c0_144 = arith.constant 0 : index
    %c0_145 = arith.constant 0 : index
    %245 = vector.load %arg3[%c0_143, %c0_144, %c0_145] : memref<5x32x84xf32, #tpu.memory_space<vmem>>, vector<1x32x84xf32>
    %246 = vector.shape_cast %245 : vector<1x32x84xf32> to vector<32x84xf32>
    %cst_146 = arith.constant dense<0.000000e+00> : vector<28x84xf32>
    %247 = tpu.matmul %240, %246, %cst_146 {dimension_numbers = #tpu.dot_dimension_numbers<[1], [0], [0], [1], [0, 0, 1, 1], [], []>} : vector<28x32xf32>, vector<32x84xf32>, vector<28x84xf32> -> vector<28x84xf32>
    %248 = arith.addf %239, %247 : vector<28x84xf32>
    %249 = vector.extract_strided_slice %237 {offsets = [1, 0], sizes = [28, 32], strides = [1, 1]} : vector<32x32xf32> to vector<28x32xf32>
    %c1_147 = arith.constant 1 : index
    %c0_148 = arith.constant 0 : index
    %c0_149 = arith.constant 0 : index
    %250 = vector.load %arg2[%c1_147, %c0_148, %c0_149] : memref<5x32x84xf32, #tpu.memory_space<vmem>>, vector<1x32x84xf32>
    %251 = vector.shape_cast %250 : vector<1x32x84xf32> to vector<32x84xf32>
    %cst_150 = arith.constant dense<0.000000e+00> : vector<28x84xf32>
    %252 = tpu.matmul %249, %251, %cst_150 {dimension_numbers = #tpu.dot_dimension_numbers<[1], [0], [0], [1], [0, 0, 1, 1], [], []>} : vector<28x32xf32>, vector<32x84xf32>, vector<28x84xf32> -> vector<28x84xf32>
    %253 = arith.addf %244, %252 : vector<28x84xf32>
    %c1_151 = arith.constant 1 : index
    %c0_152 = arith.constant 0 : index
    %c0_153 = arith.constant 0 : index
    %254 = vector.load %arg3[%c1_151, %c0_152, %c0_153] : memref<5x32x84xf32, #tpu.memory_space<vmem>>, vector<1x32x84xf32>
    %255 = vector.shape_cast %254 : vector<1x32x84xf32> to vector<32x84xf32>
    %cst_154 = arith.constant dense<0.000000e+00> : vector<28x84xf32>
    %256 = tpu.matmul %249, %255, %cst_154 {dimension_numbers = #tpu.dot_dimension_numbers<[1], [0], [0], [1], [0, 0, 1, 1], [], []>} : vector<28x32xf32>, vector<32x84xf32>, vector<28x84xf32> -> vector<28x84xf32>
    %257 = arith.addf %248, %256 : vector<28x84xf32>
    %258 = vector.extract_strided_slice %237 {offsets = [2, 0], sizes = [28, 32], strides = [1, 1]} : vector<32x32xf32> to vector<28x32xf32>
    %c2_155 = arith.constant 2 : index
    %c0_156 = arith.constant 0 : index
    %c0_157 = arith.constant 0 : index
    %259 = vector.load %arg2[%c2_155, %c0_156, %c0_157] : memref<5x32x84xf32, #tpu.memory_space<vmem>>, vector<1x32x84xf32>
    %260 = vector.shape_cast %259 : vector<1x32x84xf32> to vector<32x84xf32>
    %cst_158 = arith.constant dense<0.000000e+00> : vector<28x84xf32>
    %261 = tpu.matmul %258, %260, %cst_158 {dimension_numbers = #tpu.dot_dimension_numbers<[1], [0], [0], [1], [0, 0, 1, 1], [], []>} : vector<28x32xf32>, vector<32x84xf32>, vector<28x84xf32> -> vector<28x84xf32>
    %262 = arith.addf %253, %261 : vector<28x84xf32>
    %c2_159 = arith.constant 2 : index
    %c0_160 = arith.constant 0 : index
    %c0_161 = arith.constant 0 : index
    %263 = vector.load %arg3[%c2_159, %c0_160, %c0_161] : memref<5x32x84xf32, #tpu.memory_space<vmem>>, vector<1x32x84xf32>
    %264 = vector.shape_cast %263 : vector<1x32x84xf32> to vector<32x84xf32>
    %cst_162 = arith.constant dense<0.000000e+00> : vector<28x84xf32>
    %265 = tpu.matmul %258, %264, %cst_162 {dimension_numbers = #tpu.dot_dimension_numbers<[1], [0], [0], [1], [0, 0, 1, 1], [], []>} : vector<28x32xf32>, vector<32x84xf32>, vector<28x84xf32> -> vector<28x84xf32>
    %266 = arith.addf %257, %265 : vector<28x84xf32>
    %267 = vector.extract_strided_slice %237 {offsets = [3, 0], sizes = [28, 32], strides = [1, 1]} : vector<32x32xf32> to vector<28x32xf32>
    %c3_163 = arith.constant 3 : index
    %c0_164 = arith.constant 0 : index
    %c0_165 = arith.constant 0 : index
    %268 = vector.load %arg2[%c3_163, %c0_164, %c0_165] : memref<5x32x84xf32, #tpu.memory_space<vmem>>, vector<1x32x84xf32>
    %269 = vector.shape_cast %268 : vector<1x32x84xf32> to vector<32x84xf32>
    %cst_166 = arith.constant dense<0.000000e+00> : vector<28x84xf32>
    %270 = tpu.matmul %267, %269, %cst_166 {dimension_numbers = #tpu.dot_dimension_numbers<[1], [0], [0], [1], [0, 0, 1, 1], [], []>} : vector<28x32xf32>, vector<32x84xf32>, vector<28x84xf32> -> vector<28x84xf32>
    %271 = arith.addf %262, %270 : vector<28x84xf32>
    %c3_167 = arith.constant 3 : index
    %c0_168 = arith.constant 0 : index
    %c0_169 = arith.constant 0 : index
    %272 = vector.load %arg3[%c3_167, %c0_168, %c0_169] : memref<5x32x84xf32, #tpu.memory_space<vmem>>, vector<1x32x84xf32>
    %273 = vector.shape_cast %272 : vector<1x32x84xf32> to vector<32x84xf32>
    %cst_170 = arith.constant dense<0.000000e+00> : vector<28x84xf32>
    %274 = tpu.matmul %267, %273, %cst_170 {dimension_numbers = #tpu.dot_dimension_numbers<[1], [0], [0], [1], [0, 0, 1, 1], [], []>} : vector<28x32xf32>, vector<32x84xf32>, vector<28x84xf32> -> vector<28x84xf32>
    %275 = arith.addf %266, %274 : vector<28x84xf32>
    %276 = vector.extract_strided_slice %237 {offsets = [4, 0], sizes = [28, 32], strides = [1, 1]} : vector<32x32xf32> to vector<28x32xf32>
    %c4_171 = arith.constant 4 : index
    %c0_172 = arith.constant 0 : index
    %c0_173 = arith.constant 0 : index
    %277 = vector.load %arg2[%c4_171, %c0_172, %c0_173] : memref<5x32x84xf32, #tpu.memory_space<vmem>>, vector<1x32x84xf32>
    %278 = vector.shape_cast %277 : vector<1x32x84xf32> to vector<32x84xf32>
    %cst_174 = arith.constant dense<0.000000e+00> : vector<28x84xf32>
    %279 = tpu.matmul %276, %278, %cst_174 {dimension_numbers = #tpu.dot_dimension_numbers<[1], [0], [0], [1], [0, 0, 1, 1], [], []>} : vector<28x32xf32>, vector<32x84xf32>, vector<28x84xf32> -> vector<28x84xf32>
    %280 = arith.addf %271, %279 : vector<28x84xf32>
    %c4_175 = arith.constant 4 : index
    %c0_176 = arith.constant 0 : index
    %c0_177 = arith.constant 0 : index
    %281 = vector.load %arg3[%c4_175, %c0_176, %c0_177] : memref<5x32x84xf32, #tpu.memory_space<vmem>>, vector<1x32x84xf32>
    %282 = vector.shape_cast %281 : vector<1x32x84xf32> to vector<32x84xf32>
    %cst_178 = arith.constant dense<0.000000e+00> : vector<28x84xf32>
    %283 = tpu.matmul %276, %282, %cst_178 {dimension_numbers = #tpu.dot_dimension_numbers<[1], [0], [0], [1], [0, 0, 1, 1], [], []>} : vector<28x32xf32>, vector<32x84xf32>, vector<28x84xf32> -> vector<28x84xf32>
    %284 = arith.addf %275, %283 : vector<28x84xf32>
    %285 = arith.maximumf %280, %284 : vector<28x84xf32>
    %286 = vector.extract_strided_slice %285 {offsets = [0, 0], sizes = [1, 84], strides = [1, 1]} : vector<28x84xf32> to vector<1x84xf32>
    %287 = vector.extract_strided_slice %285 {offsets = [1, 0], sizes = [1, 84], strides = [1, 1]} : vector<28x84xf32> to vector<1x84xf32>
    %288 = arith.maximumf %286, %287 : vector<1x84xf32>
    %289 = arith.addf %288, %2 : vector<1x84xf32>
    %cst_179 = arith.constant 0.000000e+00 : f32
    %290 = vector.broadcast %cst_179 : f32 to vector<1x84xf32>
    %291 = arith.maximumf %289, %290 : vector<1x84xf32>
    %c0_180 = arith.constant 0 : index
    %c0_181 = arith.constant 0 : index
    %292 = vector.load %arg15[%c0_180, %c0_181] : memref<14x84xf32, #tpu.memory_space<vmem>>, vector<1x84xf32>
    tpu.vector_store %arg15[%c0_180, %c0_181], %291 {strides = array<i32>} : memref<14x84xf32, #tpu.memory_space<vmem>>, vector<1x84xf32>,
    %293 = vector.extract_strided_slice %285 {offsets = [2, 0], sizes = [1, 84], strides = [1, 1]} : vector<28x84xf32> to vector<1x84xf32>
    %294 = vector.extract_strided_slice %285 {offsets = [3, 0], sizes = [1, 84], strides = [1, 1]} : vector<28x84xf32> to vector<1x84xf32>
    %295 = arith.maximumf %293, %294 : vector<1x84xf32>
    %296 = arith.addf %295, %2 : vector<1x84xf32>
    %cst_182 = arith.constant 0.000000e+00 : f32
    %297 = vector.broadcast %cst_182 : f32 to vector<1x84xf32>
    %298 = arith.maximumf %296, %297 : vector<1x84xf32>
    %c1_183 = arith.constant 1 : index
    %c0_184 = arith.constant 0 : index
    %299 = vector.load %arg15[%c1_183, %c0_184] : memref<14x84xf32, #tpu.memory_space<vmem>>, vector<1x84xf32>
    tpu.vector_store %arg15[%c1_183, %c0_184], %298 {strides = array<i32>} : memref<14x84xf32, #tpu.memory_space<vmem>>, vector<1x84xf32>,
    %300 = vector.extract_strided_slice %285 {offsets = [4, 0], sizes = [1, 84], strides = [1, 1]} : vector<28x84xf32> to vector<1x84xf32>
    %301 = vector.extract_strided_slice %285 {offsets = [5, 0], sizes = [1, 84], strides = [1, 1]} : vector<28x84xf32> to vector<1x84xf32>
    %302 = arith.maximumf %300, %301 : vector<1x84xf32>
    %303 = arith.addf %302, %2 : vector<1x84xf32>
    %cst_185 = arith.constant 0.000000e+00 : f32
    %304 = vector.broadcast %cst_185 : f32 to vector<1x84xf32>
    %305 = arith.maximumf %303, %304 : vector<1x84xf32>
    %c2_186 = arith.constant 2 : index
    %c0_187 = arith.constant 0 : index
    %306 = vector.load %arg15[%c2_186, %c0_187] : memref<14x84xf32, #tpu.memory_space<vmem>>, vector<1x84xf32>
    tpu.vector_store %arg15[%c2_186, %c0_187], %305 {strides = array<i32>} : memref<14x84xf32, #tpu.memory_space<vmem>>, vector<1x84xf32>,
    %307 = vector.extract_strided_slice %285 {offsets = [6, 0], sizes = [1, 84], strides = [1, 1]} : vector<28x84xf32> to vector<1x84xf32>
    %308 = vector.extract_strided_slice %285 {offsets = [7, 0], sizes = [1, 84], strides = [1, 1]} : vector<28x84xf32> to vector<1x84xf32>
    %309 = arith.maximumf %307, %308 : vector<1x84xf32>
    %310 = arith.addf %309, %2 : vector<1x84xf32>
    %cst_188 = arith.constant 0.000000e+00 : f32
    %311 = vector.broadcast %cst_188 : f32 to vector<1x84xf32>
    %312 = arith.maximumf %310, %311 : vector<1x84xf32>
    %c3_189 = arith.constant 3 : index
    %c0_190 = arith.constant 0 : index
    %313 = vector.load %arg15[%c3_189, %c0_190] : memref<14x84xf32, #tpu.memory_space<vmem>>, vector<1x84xf32>
    tpu.vector_store %arg15[%c3_189, %c0_190], %312 {strides = array<i32>} : memref<14x84xf32, #tpu.memory_space<vmem>>, vector<1x84xf32>,
    %314 = vector.extract_strided_slice %285 {offsets = [8, 0], sizes = [1, 84], strides = [1, 1]} : vector<28x84xf32> to vector<1x84xf32>
    %315 = vector.extract_strided_slice %285 {offsets = [9, 0], sizes = [1, 84], strides = [1, 1]} : vector<28x84xf32> to vector<1x84xf32>
    %316 = arith.maximumf %314, %315 : vector<1x84xf32>
    %317 = arith.addf %316, %2 : vector<1x84xf32>
    %cst_191 = arith.constant 0.000000e+00 : f32
    %318 = vector.broadcast %cst_191 : f32 to vector<1x84xf32>
    %319 = arith.maximumf %317, %318 : vector<1x84xf32>
    %c4_192 = arith.constant 4 : index
    %c0_193 = arith.constant 0 : index
    %320 = vector.load %arg15[%c4_192, %c0_193] : memref<14x84xf32, #tpu.memory_space<vmem>>, vector<1x84xf32>
    tpu.vector_store %arg15[%c4_192, %c0_193], %319 {strides = array<i32>} : memref<14x84xf32, #tpu.memory_space<vmem>>, vector<1x84xf32>,
    %321 = vector.extract_strided_slice %285 {offsets = [10, 0], sizes = [1, 84], strides = [1, 1]} : vector<28x84xf32> to vector<1x84xf32>
    %322 = vector.extract_strided_slice %285 {offsets = [11, 0], sizes = [1, 84], strides = [1, 1]} : vector<28x84xf32> to vector<1x84xf32>
    %323 = arith.maximumf %321, %322 : vector<1x84xf32>
    %324 = arith.addf %323, %2 : vector<1x84xf32>
    %cst_194 = arith.constant 0.000000e+00 : f32
    %325 = vector.broadcast %cst_194 : f32 to vector<1x84xf32>
    %326 = arith.maximumf %324, %325 : vector<1x84xf32>
    %c5_195 = arith.constant 5 : index
    %c0_196 = arith.constant 0 : index
    %327 = vector.load %arg15[%c5_195, %c0_196] : memref<14x84xf32, #tpu.memory_space<vmem>>, vector<1x84xf32>
    tpu.vector_store %arg15[%c5_195, %c0_196], %326 {strides = array<i32>} : memref<14x84xf32, #tpu.memory_space<vmem>>, vector<1x84xf32>,
    %328 = vector.extract_strided_slice %285 {offsets = [12, 0], sizes = [1, 84], strides = [1, 1]} : vector<28x84xf32> to vector<1x84xf32>
    %329 = vector.extract_strided_slice %285 {offsets = [13, 0], sizes = [1, 84], strides = [1, 1]} : vector<28x84xf32> to vector<1x84xf32>
    %330 = arith.maximumf %328, %329 : vector<1x84xf32>
    %331 = arith.addf %330, %2 : vector<1x84xf32>
    %cst_197 = arith.constant 0.000000e+00 : f32
    %332 = vector.broadcast %cst_197 : f32 to vector<1x84xf32>
    %333 = arith.maximumf %331, %332 : vector<1x84xf32>
    %c6_198 = arith.constant 6 : index
    %c0_199 = arith.constant 0 : index
    %334 = vector.load %arg15[%c6_198, %c0_199] : memref<14x84xf32, #tpu.memory_space<vmem>>, vector<1x84xf32>
    tpu.vector_store %arg15[%c6_198, %c0_199], %333 {strides = array<i32>} : memref<14x84xf32, #tpu.memory_space<vmem>>, vector<1x84xf32>,
    %335 = vector.extract_strided_slice %285 {offsets = [14, 0], sizes = [1, 84], strides = [1, 1]} : vector<28x84xf32> to vector<1x84xf32>
    %336 = vector.extract_strided_slice %285 {offsets = [15, 0], sizes = [1, 84], strides = [1, 1]} : vector<28x84xf32> to vector<1x84xf32>
    %337 = arith.maximumf %335, %336 : vector<1x84xf32>
    %338 = arith.addf %337, %2 : vector<1x84xf32>
    %cst_200 = arith.constant 0.000000e+00 : f32
    %339 = vector.broadcast %cst_200 : f32 to vector<1x84xf32>
    %340 = arith.maximumf %338, %339 : vector<1x84xf32>
    %c7_201 = arith.constant 7 : index
    %c0_202 = arith.constant 0 : index
    %341 = vector.load %arg15[%c7_201, %c0_202] : memref<14x84xf32, #tpu.memory_space<vmem>>, vector<1x84xf32>
    tpu.vector_store %arg15[%c7_201, %c0_202], %340 {strides = array<i32>} : memref<14x84xf32, #tpu.memory_space<vmem>>, vector<1x84xf32>,
    %342 = vector.extract_strided_slice %285 {offsets = [16, 0], sizes = [1, 84], strides = [1, 1]} : vector<28x84xf32> to vector<1x84xf32>
    %343 = vector.extract_strided_slice %285 {offsets = [17, 0], sizes = [1, 84], strides = [1, 1]} : vector<28x84xf32> to vector<1x84xf32>
    %344 = arith.maximumf %342, %343 : vector<1x84xf32>
    %345 = arith.addf %344, %2 : vector<1x84xf32>
    %cst_203 = arith.constant 0.000000e+00 : f32
    %346 = vector.broadcast %cst_203 : f32 to vector<1x84xf32>
    %347 = arith.maximumf %345, %346 : vector<1x84xf32>
    %c8_204 = arith.constant 8 : index
    %c0_205 = arith.constant 0 : index
    %348 = vector.load %arg15[%c8_204, %c0_205] : memref<14x84xf32, #tpu.memory_space<vmem>>, vector<1x84xf32>
    tpu.vector_store %arg15[%c8_204, %c0_205], %347 {strides = array<i32>} : memref<14x84xf32, #tpu.memory_space<vmem>>, vector<1x84xf32>,
    %349 = vector.extract_strided_slice %285 {offsets = [18, 0], sizes = [1, 84], strides = [1, 1]} : vector<28x84xf32> to vector<1x84xf32>
    %350 = vector.extract_strided_slice %285 {offsets = [19, 0], sizes = [1, 84], strides = [1, 1]} : vector<28x84xf32> to vector<1x84xf32>
    %351 = arith.maximumf %349, %350 : vector<1x84xf32>
    %352 = arith.addf %351, %2 : vector<1x84xf32>
    %cst_206 = arith.constant 0.000000e+00 : f32
    %353 = vector.broadcast %cst_206 : f32 to vector<1x84xf32>
    %354 = arith.maximumf %352, %353 : vector<1x84xf32>
    %c9_207 = arith.constant 9 : index
    %c0_208 = arith.constant 0 : index
    %355 = vector.load %arg15[%c9_207, %c0_208] : memref<14x84xf32, #tpu.memory_space<vmem>>, vector<1x84xf32>
    tpu.vector_store %arg15[%c9_207, %c0_208], %354 {strides = array<i32>} : memref<14x84xf32, #tpu.memory_space<vmem>>, vector<1x84xf32>,
    %356 = vector.extract_strided_slice %285 {offsets = [20, 0], sizes = [1, 84], strides = [1, 1]} : vector<28x84xf32> to vector<1x84xf32>
    %357 = vector.extract_strided_slice %285 {offsets = [21, 0], sizes = [1, 84], strides = [1, 1]} : vector<28x84xf32> to vector<1x84xf32>
    %358 = arith.maximumf %356, %357 : vector<1x84xf32>
    %359 = arith.addf %358, %2 : vector<1x84xf32>
    %cst_209 = arith.constant 0.000000e+00 : f32
    %360 = vector.broadcast %cst_209 : f32 to vector<1x84xf32>
    %361 = arith.maximumf %359, %360 : vector<1x84xf32>
    %c10_210 = arith.constant 10 : index
    %c0_211 = arith.constant 0 : index
    %362 = vector.load %arg15[%c10_210, %c0_211] : memref<14x84xf32, #tpu.memory_space<vmem>>, vector<1x84xf32>
    tpu.vector_store %arg15[%c10_210, %c0_211], %361 {strides = array<i32>} : memref<14x84xf32, #tpu.memory_space<vmem>>, vector<1x84xf32>,
    %363 = vector.extract_strided_slice %285 {offsets = [22, 0], sizes = [1, 84], strides = [1, 1]} : vector<28x84xf32> to vector<1x84xf32>
    %364 = vector.extract_strided_slice %285 {offsets = [23, 0], sizes = [1, 84], strides = [1, 1]} : vector<28x84xf32> to vector<1x84xf32>
    %365 = arith.maximumf %363, %364 : vector<1x84xf32>
    %366 = arith.addf %365, %2 : vector<1x84xf32>
    %cst_212 = arith.constant 0.000000e+00 : f32
    %367 = vector.broadcast %cst_212 : f32 to vector<1x84xf32>
    %368 = arith.maximumf %366, %367 : vector<1x84xf32>
    %c11_213 = arith.constant 11 : index
    %c0_214 = arith.constant 0 : index
    %369 = vector.load %arg15[%c11_213, %c0_214] : memref<14x84xf32, #tpu.memory_space<vmem>>, vector<1x84xf32>
    tpu.vector_store %arg15[%c11_213, %c0_214], %368 {strides = array<i32>} : memref<14x84xf32, #tpu.memory_space<vmem>>, vector<1x84xf32>,
    %370 = vector.extract_strided_slice %285 {offsets = [24, 0], sizes = [1, 84], strides = [1, 1]} : vector<28x84xf32> to vector<1x84xf32>
    %371 = vector.extract_strided_slice %285 {offsets = [25, 0], sizes = [1, 84], strides = [1, 1]} : vector<28x84xf32> to vector<1x84xf32>
    %372 = arith.maximumf %370, %371 : vector<1x84xf32>
    %373 = arith.addf %372, %2 : vector<1x84xf32>
    %cst_215 = arith.constant 0.000000e+00 : f32
    %374 = vector.broadcast %cst_215 : f32 to vector<1x84xf32>
    %375 = arith.maximumf %373, %374 : vector<1x84xf32>
    %c12_216 = arith.constant 12 : index
    %c0_217 = arith.constant 0 : index
    %376 = vector.load %arg15[%c12_216, %c0_217] : memref<14x84xf32, #tpu.memory_space<vmem>>, vector<1x84xf32>
    tpu.vector_store %arg15[%c12_216, %c0_217], %375 {strides = array<i32>} : memref<14x84xf32, #tpu.memory_space<vmem>>, vector<1x84xf32>,
    %377 = vector.extract_strided_slice %285 {offsets = [26, 0], sizes = [1, 84], strides = [1, 1]} : vector<28x84xf32> to vector<1x84xf32>
    %378 = vector.extract_strided_slice %285 {offsets = [27, 0], sizes = [1, 84], strides = [1, 1]} : vector<28x84xf32> to vector<1x84xf32>
    %379 = arith.maximumf %377, %378 : vector<1x84xf32>
    %380 = arith.addf %379, %2 : vector<1x84xf32>
    %cst_218 = arith.constant 0.000000e+00 : f32
    %381 = vector.broadcast %cst_218 : f32 to vector<1x84xf32>
    %382 = arith.maximumf %380, %381 : vector<1x84xf32>
    %c13_219 = arith.constant 13 : index
    %c0_220 = arith.constant 0 : index
    %383 = vector.load %arg15[%c13_219, %c0_220] : memref<14x84xf32, #tpu.memory_space<vmem>>, vector<1x84xf32>
    tpu.vector_store %arg15[%c13_219, %c0_220], %382 {strides = array<i32>} : memref<14x84xf32, #tpu.memory_space<vmem>>, vector<1x84xf32>,
    %c0_221 = arith.constant 0 : index
    %c0_222 = arith.constant 0 : index
    %384 = vector.load %arg15[%c0_221, %c0_222] : memref<14x84xf32, #tpu.memory_space<vmem>>, vector<14x84xf32>
    %cst_223 = arith.constant 0.000000e+00 : f32
    %385 = vector.broadcast %cst_223 : f32 to vector<10x80xf32>
    %cst_224 = arith.constant 0.000000e+00 : f32
    %386 = vector.broadcast %cst_224 : f32 to vector<10x80xf32>
    %387 = vector.extract_strided_slice %384 {offsets = [0, 0], sizes = [10, 84], strides = [1, 1]} : vector<14x84xf32> to vector<10x84xf32>
    %c0_225 = arith.constant 0 : index
    %c0_226 = arith.constant 0 : index
    %c0_227 = arith.constant 0 : index
    %388 = vector.load %arg5[%c0_225, %c0_226, %c0_227] : memref<5x84x80xf32, #tpu.memory_space<vmem>>, vector<1x84x80xf32>
    %389 = vector.shape_cast %388 : vector<1x84x80xf32> to vector<84x80xf32>
    %cst_228 = arith.constant dense<0.000000e+00> : vector<10x80xf32>
    %390 = tpu.matmul %387, %389, %cst_228 {dimension_numbers = #tpu.dot_dimension_numbers<[1], [0], [0], [1], [0, 0, 1, 1], [], []>} : vector<10x84xf32>, vector<84x80xf32>, vector<10x80xf32> -> vector<10x80xf32>
    %391 = arith.addf %385, %390 : vector<10x80xf32>
    %c0_229 = arith.constant 0 : index
    %c0_230 = arith.constant 0 : index
    %c0_231 = arith.constant 0 : index
    %392 = vector.load %arg6[%c0_229, %c0_230, %c0_231] : memref<5x84x80xf32, #tpu.memory_space<vmem>>, vector<1x84x80xf32>
    %393 = vector.shape_cast %392 : vector<1x84x80xf32> to vector<84x80xf32>
    %cst_232 = arith.constant dense<0.000000e+00> : vector<10x80xf32>
    %394 = tpu.matmul %387, %393, %cst_232 {dimension_numbers = #tpu.dot_dimension_numbers<[1], [0], [0], [1], [0, 0, 1, 1], [], []>} : vector<10x84xf32>, vector<84x80xf32>, vector<10x80xf32> -> vector<10x80xf32>
    %395 = arith.addf %386, %394 : vector<10x80xf32>
    %396 = vector.extract_strided_slice %384 {offsets = [1, 0], sizes = [10, 84], strides = [1, 1]} : vector<14x84xf32> to vector<10x84xf32>
    %c1_233 = arith.constant 1 : index
    %c0_234 = arith.constant 0 : index
    %c0_235 = arith.constant 0 : index
    %397 = vector.load %arg5[%c1_233, %c0_234, %c0_235] : memref<5x84x80xf32, #tpu.memory_space<vmem>>, vector<1x84x80xf32>
    %398 = vector.shape_cast %397 : vector<1x84x80xf32> to vector<84x80xf32>
    %cst_236 = arith.constant dense<0.000000e+00> : vector<10x80xf32>
    %399 = tpu.matmul %396, %398, %cst_236 {dimension_numbers = #tpu.dot_dimension_numbers<[1], [0], [0], [1], [0, 0, 1, 1], [], []>} : vector<10x84xf32>, vector<84x80xf32>, vector<10x80xf32> -> vector<10x80xf32>
    %400 = arith.addf %391, %399 : vector<10x80xf32>
    %c1_237 = arith.constant 1 : index
    %c0_238 = arith.constant 0 : index
    %c0_239 = arith.constant 0 : index
    %401 = vector.load %arg6[%c1_237, %c0_238, %c0_239] : memref<5x84x80xf32, #tpu.memory_space<vmem>>, vector<1x84x80xf32>
    %402 = vector.shape_cast %401 : vector<1x84x80xf32> to vector<84x80xf32>
    %cst_240 = arith.constant dense<0.000000e+00> : vector<10x80xf32>
    %403 = tpu.matmul %396, %402, %cst_240 {dimension_numbers = #tpu.dot_dimension_numbers<[1], [0], [0], [1], [0, 0, 1, 1], [], []>} : vector<10x84xf32>, vector<84x80xf32>, vector<10x80xf32> -> vector<10x80xf32>
    %404 = arith.addf %395, %403 : vector<10x80xf32>
    %405 = vector.extract_strided_slice %384 {offsets = [2, 0], sizes = [10, 84], strides = [1, 1]} : vector<14x84xf32> to vector<10x84xf32>
    %c2_241 = arith.constant 2 : index
    %c0_242 = arith.constant 0 : index
    %c0_243 = arith.constant 0 : index
    %406 = vector.load %arg5[%c2_241, %c0_242, %c0_243] : memref<5x84x80xf32, #tpu.memory_space<vmem>>, vector<1x84x80xf32>
    %407 = vector.shape_cast %406 : vector<1x84x80xf32> to vector<84x80xf32>
    %cst_244 = arith.constant dense<0.000000e+00> : vector<10x80xf32>
    %408 = tpu.matmul %405, %407, %cst_244 {dimension_numbers = #tpu.dot_dimension_numbers<[1], [0], [0], [1], [0, 0, 1, 1], [], []>} : vector<10x84xf32>, vector<84x80xf32>, vector<10x80xf32> -> vector<10x80xf32>
    %409 = arith.addf %400, %408 : vector<10x80xf32>
    %c2_245 = arith.constant 2 : index
    %c0_246 = arith.constant 0 : index
    %c0_247 = arith.constant 0 : index
    %410 = vector.load %arg6[%c2_245, %c0_246, %c0_247] : memref<5x84x80xf32, #tpu.memory_space<vmem>>, vector<1x84x80xf32>
    %411 = vector.shape_cast %410 : vector<1x84x80xf32> to vector<84x80xf32>
    %cst_248 = arith.constant dense<0.000000e+00> : vector<10x80xf32>
    %412 = tpu.matmul %405, %411, %cst_248 {dimension_numbers = #tpu.dot_dimension_numbers<[1], [0], [0], [1], [0, 0, 1, 1], [], []>} : vector<10x84xf32>, vector<84x80xf32>, vector<10x80xf32> -> vector<10x80xf32>
    %413 = arith.addf %404, %412 : vector<10x80xf32>
    %414 = vector.extract_strided_slice %384 {offsets = [3, 0], sizes = [10, 84], strides = [1, 1]} : vector<14x84xf32> to vector<10x84xf32>
    %c3_249 = arith.constant 3 : index
    %c0_250 = arith.constant 0 : index
    %c0_251 = arith.constant 0 : index
    %415 = vector.load %arg5[%c3_249, %c0_250, %c0_251] : memref<5x84x80xf32, #tpu.memory_space<vmem>>, vector<1x84x80xf32>
    %416 = vector.shape_cast %415 : vector<1x84x80xf32> to vector<84x80xf32>
    %cst_252 = arith.constant dense<0.000000e+00> : vector<10x80xf32>
    %417 = tpu.matmul %414, %416, %cst_252 {dimension_numbers = #tpu.dot_dimension_numbers<[1], [0], [0], [1], [0, 0, 1, 1], [], []>} : vector<10x84xf32>, vector<84x80xf32>, vector<10x80xf32> -> vector<10x80xf32>
    %418 = arith.addf %409, %417 : vector<10x80xf32>
    %c3_253 = arith.constant 3 : index
    %c0_254 = arith.constant 0 : index
    %c0_255 = arith.constant 0 : index
    %419 = vector.load %arg6[%c3_253, %c0_254, %c0_255] : memref<5x84x80xf32, #tpu.memory_space<vmem>>, vector<1x84x80xf32>
    %420 = vector.shape_cast %419 : vector<1x84x80xf32> to vector<84x80xf32>
    %cst_256 = arith.constant dense<0.000000e+00> : vector<10x80xf32>
    %421 = tpu.matmul %414, %420, %cst_256 {dimension_numbers = #tpu.dot_dimension_numbers<[1], [0], [0], [1], [0, 0, 1, 1], [], []>} : vector<10x84xf32>, vector<84x80xf32>, vector<10x80xf32> -> vector<10x80xf32>
    %422 = arith.addf %413, %421 : vector<10x80xf32>
    %423 = vector.extract_strided_slice %384 {offsets = [4, 0], sizes = [10, 84], strides = [1, 1]} : vector<14x84xf32> to vector<10x84xf32>
    %c4_257 = arith.constant 4 : index
    %c0_258 = arith.constant 0 : index
    %c0_259 = arith.constant 0 : index
    %424 = vector.load %arg5[%c4_257, %c0_258, %c0_259] : memref<5x84x80xf32, #tpu.memory_space<vmem>>, vector<1x84x80xf32>
    %425 = vector.shape_cast %424 : vector<1x84x80xf32> to vector<84x80xf32>
    %cst_260 = arith.constant dense<0.000000e+00> : vector<10x80xf32>
    %426 = tpu.matmul %423, %425, %cst_260 {dimension_numbers = #tpu.dot_dimension_numbers<[1], [0], [0], [1], [0, 0, 1, 1], [], []>} : vector<10x84xf32>, vector<84x80xf32>, vector<10x80xf32> -> vector<10x80xf32>
    %427 = arith.addf %418, %426 : vector<10x80xf32>
    %c4_261 = arith.constant 4 : index
    %c0_262 = arith.constant 0 : index
    %c0_263 = arith.constant 0 : index
    %428 = vector.load %arg6[%c4_261, %c0_262, %c0_263] : memref<5x84x80xf32, #tpu.memory_space<vmem>>, vector<1x84x80xf32>
    %429 = vector.shape_cast %428 : vector<1x84x80xf32> to vector<84x80xf32>
    %cst_264 = arith.constant dense<0.000000e+00> : vector<10x80xf32>
    %430 = tpu.matmul %423, %429, %cst_264 {dimension_numbers = #tpu.dot_dimension_numbers<[1], [0], [0], [1], [0, 0, 1, 1], [], []>} : vector<10x84xf32>, vector<84x80xf32>, vector<10x80xf32> -> vector<10x80xf32>
    %431 = arith.addf %422, %430 : vector<10x80xf32>
    %432 = arith.maximumf %427, %431 : vector<10x80xf32>
    %433 = vector.extract_strided_slice %432 {offsets = [0, 0], sizes = [1, 80], strides = [1, 1]} : vector<10x80xf32> to vector<1x80xf32>
    %434 = vector.extract_strided_slice %432 {offsets = [1, 0], sizes = [1, 80], strides = [1, 1]} : vector<10x80xf32> to vector<1x80xf32>
    %435 = arith.maximumf %433, %434 : vector<1x80xf32>
    %436 = arith.addf %435, %3 : vector<1x80xf32>
    %cst_265 = arith.constant 0.000000e+00 : f32
    %437 = vector.broadcast %cst_265 : f32 to vector<1x80xf32>
    %438 = arith.maximumf %436, %437 : vector<1x80xf32>
    %c1_266 = arith.constant 1 : index
    %c0_267 = arith.constant 0 : index
    %439 = vector.load %arg16[%c1_266, %c0_267] : memref<2x640xf32, #tpu.memory_space<vmem>>, vector<1x80xf32>
    tpu.vector_store %arg16[%c1_266, %c0_267], %438 {strides = array<i32>} : memref<2x640xf32, #tpu.memory_space<vmem>>, vector<1x80xf32>,
    %440 = vector.extract_strided_slice %432 {offsets = [2, 0], sizes = [1, 80], strides = [1, 1]} : vector<10x80xf32> to vector<1x80xf32>
    %441 = vector.extract_strided_slice %432 {offsets = [3, 0], sizes = [1, 80], strides = [1, 1]} : vector<10x80xf32> to vector<1x80xf32>
    %442 = arith.maximumf %440, %441 : vector<1x80xf32>
    %443 = arith.addf %442, %3 : vector<1x80xf32>
    %cst_268 = arith.constant 0.000000e+00 : f32
    %444 = vector.broadcast %cst_268 : f32 to vector<1x80xf32>
    %445 = arith.maximumf %443, %444 : vector<1x80xf32>
    %c1_269 = arith.constant 1 : index
    %c128_270 = arith.constant 128 : index
    %446 = vector.load %arg16[%c1_269, %c128_270] : memref<2x640xf32, #tpu.memory_space<vmem>>, vector<1x80xf32>
    tpu.vector_store %arg16[%c1_269, %c128_270], %445 {strides = array<i32>} : memref<2x640xf32, #tpu.memory_space<vmem>>, vector<1x80xf32>,
    %447 = vector.extract_strided_slice %432 {offsets = [4, 0], sizes = [1, 80], strides = [1, 1]} : vector<10x80xf32> to vector<1x80xf32>
    %448 = vector.extract_strided_slice %432 {offsets = [5, 0], sizes = [1, 80], strides = [1, 1]} : vector<10x80xf32> to vector<1x80xf32>
    %449 = arith.maximumf %447, %448 : vector<1x80xf32>
    %450 = arith.addf %449, %3 : vector<1x80xf32>
    %cst_271 = arith.constant 0.000000e+00 : f32
    %451 = vector.broadcast %cst_271 : f32 to vector<1x80xf32>
    %452 = arith.maximumf %450, %451 : vector<1x80xf32>
    %c1_272 = arith.constant 1 : index
    %c256_273 = arith.constant 256 : index
    %453 = vector.load %arg16[%c1_272, %c256_273] : memref<2x640xf32, #tpu.memory_space<vmem>>, vector<1x80xf32>
    tpu.vector_store %arg16[%c1_272, %c256_273], %452 {strides = array<i32>} : memref<2x640xf32, #tpu.memory_space<vmem>>, vector<1x80xf32>,
    %454 = vector.extract_strided_slice %432 {offsets = [6, 0], sizes = [1, 80], strides = [1, 1]} : vector<10x80xf32> to vector<1x80xf32>
    %455 = vector.extract_strided_slice %432 {offsets = [7, 0], sizes = [1, 80], strides = [1, 1]} : vector<10x80xf32> to vector<1x80xf32>
    %456 = arith.maximumf %454, %455 : vector<1x80xf32>
    %457 = arith.addf %456, %3 : vector<1x80xf32>
    %cst_274 = arith.constant 0.000000e+00 : f32
    %458 = vector.broadcast %cst_274 : f32 to vector<1x80xf32>
    %459 = arith.maximumf %457, %458 : vector<1x80xf32>
    %c1_275 = arith.constant 1 : index
    %c384_276 = arith.constant 384 : index
    %460 = vector.load %arg16[%c1_275, %c384_276] : memref<2x640xf32, #tpu.memory_space<vmem>>, vector<1x80xf32>
    tpu.vector_store %arg16[%c1_275, %c384_276], %459 {strides = array<i32>} : memref<2x640xf32, #tpu.memory_space<vmem>>, vector<1x80xf32>,
    %461 = vector.extract_strided_slice %432 {offsets = [8, 0], sizes = [1, 80], strides = [1, 1]} : vector<10x80xf32> to vector<1x80xf32>
    %462 = vector.extract_strided_slice %432 {offsets = [9, 0], sizes = [1, 80], strides = [1, 1]} : vector<10x80xf32> to vector<1x80xf32>
    %463 = arith.maximumf %461, %462 : vector<1x80xf32>
    %464 = arith.addf %463, %3 : vector<1x80xf32>
    %cst_277 = arith.constant 0.000000e+00 : f32
    %465 = vector.broadcast %cst_277 : f32 to vector<1x80xf32>
    %466 = arith.maximumf %464, %465 : vector<1x80xf32>
    %c1_278 = arith.constant 1 : index
    %c512_279 = arith.constant 512 : index
    %467 = vector.load %arg16[%c1_278, %c512_279] : memref<2x640xf32, #tpu.memory_space<vmem>>, vector<1x80xf32>
    tpu.vector_store %arg16[%c1_278, %c512_279], %466 {strides = array<i32>} : memref<2x640xf32, #tpu.memory_space<vmem>>, vector<1x80xf32>,
    %c0_280 = arith.constant 0 : index
    %c0_281 = arith.constant 0 : index
    %468 = vector.load %arg16[%c0_280, %c0_281] : memref<2x640xf32, #tpu.memory_space<vmem>>, vector<2x640xf32>
    %c0_282 = arith.constant 0 : index
    %c0_283 = arith.constant 0 : index
    %469 = vector.load %arg8[%c0_282, %c0_283] : memref<640x120xf32, #tpu.memory_space<vmem>>, vector<640x120xf32>
    %cst_284 = arith.constant dense<0.000000e+00> : vector<2x120xf32>
    %470 = tpu.matmul %468, %469, %cst_284 {dimension_numbers = #tpu.dot_dimension_numbers<[1], [0], [0], [1], [0, 0, 1, 1], [], []>} : vector<2x640xf32>, vector<640x120xf32>, vector<2x120xf32> -> vector<2x120xf32>
    %c0_285 = arith.constant 0 : index
    %c0_286 = arith.constant 0 : index
    %471 = vector.load %arg9[%c0_285, %c0_286] : memref<1x120xf32, #tpu.memory_space<vmem>>, vector<1x120xf32>
    %472 = vector.broadcast %471 : vector<1x120xf32> to vector<2x120xf32>
    %473 = arith.addf %470, %472 : vector<2x120xf32>
    %cst_287 = arith.constant 0.000000e+00 : f32
    %474 = vector.broadcast %cst_287 : f32 to vector<2x120xf32>
    %475 = arith.maximumf %473, %474 : vector<2x120xf32>
    %c0_288 = arith.constant 0 : index
    %c0_289 = arith.constant 0 : index
    %476 = vector.load %arg10[%c0_288, %c0_289] : memref<120x84xf32, #tpu.memory_space<vmem>>, vector<120x84xf32>
    %cst_290 = arith.constant dense<0.000000e+00> : vector<2x84xf32>
    %477 = tpu.matmul %475, %476, %cst_290 {dimension_numbers = #tpu.dot_dimension_numbers<[1], [0], [0], [1], [0, 0, 1, 1], [], []>} : vector<2x120xf32>, vector<120x84xf32>, vector<2x84xf32> -> vector<2x84xf32>
    %c0_291 = arith.constant 0 : index
    %c0_292 = arith.constant 0 : index
    %478 = vector.load %arg11[%c0_291, %c0_292] : memref<1x84xf32, #tpu.memory_space<vmem>>, vector<1x84xf32>
    %479 = vector.broadcast %478 : vector<1x84xf32> to vector<2x84xf32>
    %480 = arith.addf %477, %479 : vector<2x84xf32>
    %cst_293 = arith.constant 0.000000e+00 : f32
    %481 = vector.broadcast %cst_293 : f32 to vector<2x84xf32>
    %482 = arith.maximumf %480, %481 : vector<2x84xf32>
    %c0_294 = arith.constant 0 : index
    %c0_295 = arith.constant 0 : index
    %483 = vector.load %arg12[%c0_294, %c0_295] : memref<84x10xf32, #tpu.memory_space<vmem>>, vector<84x10xf32>
    %cst_296 = arith.constant dense<0.000000e+00> : vector<2x10xf32>
    %484 = tpu.matmul %482, %483, %cst_296 {dimension_numbers = #tpu.dot_dimension_numbers<[1], [0], [0], [1], [0, 0, 1, 1], [], []>} : vector<2x84xf32>, vector<84x10xf32>, vector<2x10xf32> -> vector<2x10xf32>
    %c0_297 = arith.constant 0 : index
    %c0_298 = arith.constant 0 : index
    %485 = vector.load %arg13[%c0_297, %c0_298] : memref<1x10xf32, #tpu.memory_space<vmem>>, vector<1x10xf32>
    %486 = vector.broadcast %485 : vector<1x10xf32> to vector<2x10xf32>
    %487 = arith.addf %484, %486 : vector<2x10xf32>
    %c0_299 = arith.constant 0 : index
    %c0_300 = arith.constant 0 : index
    %488 = vector.load %arg14[%c0_299, %c0_300] : memref<2x10xf32, #tpu.memory_space<vmem>>, vector<2x10xf32>
    tpu.vector_store %arg14[%c0_299, %c0_300], %487 {strides = array<i32>} : memref<2x10xf32, #tpu.memory_space<vmem>>, vector<2x10xf32>,
    return
  }
  func.func @transform_0(%arg0: i32) -> (i32, i32, i32) {
    %c0_i32 = arith.constant 0 : i32
    %c0_i32_0 = arith.constant 0 : i32
    %c0_i32_1 = arith.constant 0 : i32
    %c0_i32_2 = arith.constant 0 : i32
    return %c0_i32, %c0_i32_0, %c0_i32_1 : i32, i32, i32
  }
  func.func @transform_1(%arg0: i32) -> (i32, i32, i32) {
    %c0_i32 = arith.constant 0 : i32
    %c0_i32_0 = arith.constant 0 : i32
    %c0_i32_1 = arith.constant 0 : i32
    %c0_i32_2 = arith.constant 0 : i32
    return %c0_i32, %c0_i32_0, %c0_i32_1 : i32, i32, i32
  }
  func.func @transform_2(%arg0: i32) -> (i32, i32, i32) {
    %c0_i32 = arith.constant 0 : i32
    %c0_i32_0 = arith.constant 0 : i32
    %c0_i32_1 = arith.constant 0 : i32
    %c0_i32_2 = arith.constant 0 : i32
    return %c0_i32, %c0_i32_0, %c0_i32_1 : i32, i32, i32
  }
  func.func @transform_3(%arg0: i32) -> (i32, i32) {
    %c0_i32 = arith.constant 0 : i32
    %c0_i32_0 = arith.constant 0 : i32
    %c0_i32_1 = arith.constant 0 : i32
    return %c0_i32, %c0_i32_0 : i32, i32
  }
  func.func @transform_4(%arg0: i32) -> (i32, i32, i32) {
    %c0_i32 = arith.constant 0 : i32
    %c0_i32_0 = arith.constant 0 : i32
    %c0_i32_1 = arith.constant 0 : i32
    %c0_i32_2 = arith.constant 0 : i32
    return %c0_i32, %c0_i32_0, %c0_i32_1 : i32, i32, i32
  }
  func.func @transform_5(%arg0: i32) -> (i32, i32, i32) {
    %c0_i32 = arith.constant 0 : i32
    %c0_i32_0 = arith.constant 0 : i32
    %c0_i32_1 = arith.constant 0 : i32
    %c0_i32_2 = arith.constant 0 : i32
    return %c0_i32, %c0_i32_0, %c0_i32_1 : i32, i32, i32
  }
  func.func @transform_6(%arg0: i32) -> (i32, i32) {
    %c0_i32 = arith.constant 0 : i32
    %c0_i32_0 = arith.constant 0 : i32
    %c0_i32_1 = arith.constant 0 : i32
    return %c0_i32, %c0_i32_0 : i32, i32
  }
  func.func @transform_7(%arg0: i32) -> (i32, i32) {
    %c0_i32 = arith.constant 0 : i32
    %c0_i32_0 = arith.constant 0 : i32
    %c0_i32_1 = arith.constant 0 : i32
    return %c0_i32, %c0_i32_0 : i32, i32
  }
  func.func @transform_8(%arg0: i32) -> (i32, i32) {
    %c0_i32 = arith.constant 0 : i32
    %c0_i32_0 = arith.constant 0 : i32
    %c0_i32_1 = arith.constant 0 : i32
    return %c0_i32, %c0_i32_0 : i32, i32
  }
  func.func @transform_9(%arg0: i32) -> (i32, i32) {
    %c0_i32 = arith.constant 0 : i32
    %c0_i32_0 = arith.constant 0 : i32
    %c0_i32_1 = arith.constant 0 : i32
    return %c0_i32, %c0_i32_0 : i32, i32
  }
  func.func @transform_10(%arg0: i32) -> (i32, i32) {
    %c0_i32 = arith.constant 0 : i32
    %c0_i32_0 = arith.constant 0 : i32
    %c0_i32_1 = arith.constant 0 : i32
    return %c0_i32, %c0_i32_0 : i32, i32
  }
  func.func @transform_11(%arg0: i32) -> (i32, i32) {
    %c0_i32 = arith.constant 0 : i32
    %c0_i32_0 = arith.constant 0 : i32
    %c0_i32_1 = arith.constant 0 : i32
    return %c0_i32, %c0_i32_0 : i32, i32
  }
  func.func @transform_12(%arg0: i32) -> (i32, i32) {
    %c0_i32 = arith.constant 0 : i32
    %c0_i32_0 = arith.constant 0 : i32
    %c0_i32_1 = arith.constant 0 : i32
    return %c0_i32, %c0_i32_0 : i32, i32
  }
  func.func @transform_13(%arg0: i32) -> (i32, i32) {
    %c0_i32 = arith.constant 0 : i32
    %c0_i32_0 = arith.constant 0 : i32
    %c0_i32_1 = arith.constant 0 : i32
    return %c0_i32, %c0_i32_0 : i32, i32
  }
}

</mosaic_0001>

<bundles_post_ra>
// kernel: net_forward.1
= control target key start
LH: loop header
LB: loop body
LE: loop exit
PB: predicated region body
PF: predicated region fallthrough
CT: control target
= control target key end

     0   :  { %vm70_vm0 = vcmask 1046528   ;;  %vm78_vm1 = vcmask 261120   ;;  %s4506_s0 = inlined_call_operand.vmem [shape: f32[2,32,32], index: 0, kind: input, shape index: {}]   ;;  %s4507_s1 = inlined_call_operand.vmem [shape: f32[5,32,84], index: 1, kind: input, shape index: {}]   ;;  %s4508_s2 = inlined_call_operand.vmem [shape: f32[5,32,84], index: 2, kind: input, shape index: {}]   ;;  %s4509_s3 = inlined_call_operand.vmem [shape: f32[1,84], index: 3, kind: input, shape index: {}]   ;;  %s4510_s4 = inlined_call_operand.vmem [shape: f32[5,84,80], index: 4, kind: input, shape index: {}]   ;;  %s4511_s5 = inlined_call_operand.vmem [shape: f32[5,84,80], index: 5, kind: input, shape index: {}]   ;;  %s4512_s6 = inlined_call_operand.vmem [shape: f32[1,80], index: 6, kind: input, shape index: {}]   ;;  %s4513_s7 = inlined_call_operand.vmem [shape: f32[640,120], index: 7, kind: input, shape index: {}]   ;;  %s4514_s8 = inlined_call_operand.vmem [shape: f32[1,120], index: 8, kind: input, shape index: {}]   ;;  %s4515_s9 = inlined_call_operand.vmem [shape: f32[120,84], index: 9, kind: input, shape index: {}]   ;;  %s4516_s10 = inlined_call_operand.vmem [shape: f32[1,84], index: 10, kind: input, shape index: {}]   ;;  %s4517_s11 = inlined_call_operand.vmem [shape: f32[84,10], index: 11, kind: input, shape index: {}]   ;;  %s4518_s12 = inlined_call_operand.vmem [shape: f32[1,10], index: 12, kind: input, shape index: {}]   ;;  %s4519_s13 = inlined_call_operand.hbm [shape: f32[2,10], index: 13, kind: output, shape index: {}]  }
   0x1   :  { %v2255_v0 = vld [vmem:[%s4507_s1 + $0x38] sm:$0xff]  ;;  %v2254_v2 = vld [vmem:[%s4507_s1 + $0x30] sm:$0xff]  ;;  %v2253_v4 = vld [vmem:[%s4507_s1 + $0x28] sm:$0xff] }
   0x2   :  { %v56_v1 = vld [vmem:[%s4507_s1 + $0x18] sm:$0xff]  ;;  %99 = vmatpush.msra.mxu0 %v2255_v0  ;;  %v55_v3 = vld [vmem:[%s4507_s1 + $0x10] sm:$0xff]  ;;  %v54_v5 = vld [vmem:[%s4507_s1 + $0x8] sm:$0xff] }
   0x3   :  { %2639 = vmatpush.msra.mxu1 %v56_v1  ;;  %v2267_v6 = vld [vmem:[%s4508_s2 + $0x38] sm:$0xff]  ;;  %v2252_v8 = vld [vmem:[%s4507_s1 + $0x20] sm:$0xff]  ;;  %v2266_v9 = vld [vmem:[%s4508_s2 + $0x30] sm:$0xff] }
   0x4   :  { %v60_v7 = vld [vmem:[%s4508_s2 + $0x18] sm:$0xff]  ;;  %100 = vmatpush.msra.mxu0 %v2254_v2  ;;  %v59_v10 = vld [vmem:[%s4508_s2 + $0x10] sm:$0xff]  ;;  %170 = vmatpush.msra.mxu2 %v2267_v6  ;;  %v53_v11 = vld [vmem:[%s4507_s1] sm:$0xff] }
   0x5   :  { %2640 = vmatpush.msra.mxu1 %v55_v3  ;;  %199 = vmatpush.msra.mxu3 %v60_v7  ;;  %v2789_v12 = vld [vmem:[%s4506_s0] sm:$0xff]  ;;  %v2794_v13 = vld [vmem:[%s4506_s0 + $0x8] sm:$0xff]  ;;  %v2804_v17 = vld [vmem:[%s4506_s0 + $0x10] sm:$0xff] }
   0x6   :  { %101 = vmatpush.msra.mxu0 %v2253_v4  ;;  %v71_v14 = vrot.slane %v2789_v12, 1  ;;  %v72_v15 = vrot.slane %v2794_v13, 1  ;;  %171 = vmatpush.msra.mxu2 %v2266_v9  ;;  %v2265_v16 = vld [vmem:[%s4508_s2 + $0x28] sm:$0xff]  ;;  %v2287_v20 = vld [vmem:[%s4508_s2 + $0x58] sm:$0xff]  ;;  %v2264_v21 = vld [vmem:[%s4508_s2 + $0x20] sm:$0xff]  ;;  %v74_v23 = vrot.slane %v2804_v17, 1 }
   0x7   :  { %2641 = vmatpush.msra.mxu1 %v54_v5  ;;  %200 = vmatpush.msra.mxu3 %v59_v10  ;;  %v58_v19 = vld [vmem:[%s4508_s2 + $0x8] sm:$0xff]  ;;  %v57_v22 = vld [vmem:[%s4508_s2] sm:$0xff]  ;;  %v2286_v24 = vld [vmem:[%s4508_s2 + $0x50] sm:$0xff] }
   0x8   :  { %102 = vmatpush.msra.mxu0 %v2252_v8  ;;  %v73_v18 = vsel %vm70_vm0, %v71_v14, %v72_v15  ;;  %172 = vmatpush.msra.mxu2 %v2265_v16  ;;  %v2295_v25 = vld [vmem:[%s4507_s1 + $0x78] sm:$0xff] }
   0x9   :  { %2642 = vmatpush.msra.mxu1 %v53_v11  ;;  %2256 = vmatmul.msk.f32.vlgmr.msra.gmra.mxu0 %vm78_vm1, %v73_v18  ;;  %v2303_v26 = vld [vmem:[%s4508_s2 + $0x78] sm:$0xff] }
   0xa   :  { %2261 = vmatmul.msk.f32.vlgmr.msra.gmra.mxu1 %vm78_vm1, %v2794_v13  ;;  %136 = vmatpush.msrb.mxu0 %v56_v1 }
   0xb   :  { %201 = vmatpush.msra.mxu3 %v58_v19  ;;  %287 = vmatpush.msrb.mxu1 %v2287_v20 }
   0xc   :  { %173 = vmatpush.msra.mxu2 %v2264_v21  ;;  %137 = vmatpush.msrb.mxu0 %v55_v3 }
   0xd   :  { %202 = vmatpush.msra.mxu3 %v57_v22  ;;  %2268 = vmatmul.msk.f32.vlgmr.msra.gmra.mxu2 %vm78_vm1, %v73_v18 }
   0xe   :  { %18 = vsyncpa [#allocation5], 0  ;;  %2272 = vmatmul.msk.f32.vlgmr.msra.gmra.mxu3 %vm78_vm1, %v2789_v12  ;;  %v75_v27 = vsel %vm70_vm0, %v72_v15, %v74_v23  ;;  %138 = vmatpush.msrb.mxu0 %v54_v5  ;;  %v2839_v28 = vld [vmem:[%s4506_s0 + $0x18] sm:$0xff]  ;;  %v2285_v29 = vld [vmem:[%s4508_s2 + $0x48] sm:$0xff]  ;;  %v222_v45 = vrot.slane %v2789_v12, 2  ;;  %v223_v46 = vrot.slane %v2794_v13, 2 }
   0xf   :  { %288 = vmatpush.msrb.mxu1 %v2286_v24  ;;  %341 = vmatpush.msrb.mxu2 %v2295_v25  ;;  %v2294_v30 = vld [vmem:[%s4507_s1 + $0x70] sm:$0xff]  ;;  %v2853_v32 = vld [vmem:[%s4507_s1 + $0x58] sm:$0xff]  ;;  %v2284_v33 = vld [vmem:[%s4508_s2 + $0x40] sm:$0xff]  ;;  %v76_v35 = vrot.slane %v2839_v28, 1  ;;  %vm221_vm2 = vcmask 1045504   ;;  %v225_v50 = vrot.slane %v2804_v17, 2 }
  0x10   :  { %139 = vmatpush.msrb.mxu0 %v53_v11  ;;  %379 = vmatpush.msrb.mxu3 %v2303_v26  ;;  %v2302_v31 = vld [vmem:[%s4508_s2 + $0x70] sm:$0xff]  ;;  %v2293_v34 = vld [vmem:[%s4507_s1 + $0x68] sm:$0xff]  ;;  %v2292_v38 = vld [vmem:[%s4507_s1 + $0x60] sm:$0xff]  ;;  %v224_v47 = vsel %vm221_vm2, %v222_v45, %v223_v46  ;;  %v314_v52 = vrot.slane %v2789_v12, 3  ;;  %v315_v53 = vrot.slane %v2794_v13, 3  ;;  %vm313_vm3 = vcmask 1044480  }
  0x11   :  { %2257 = vmatmul.msk.f32.gmra.mxu0 %vm78_vm1, %v75_v27  ;;  %289 = vmatpush.msrb.mxu1 %v2285_v29  ;;  %v2301_v36 = vld [vmem:[%s4508_s2 + $0x68] sm:$0xff]  ;;  %v2872_v37 = vld [vmem:[%s4507_s1 + $0x50] sm:$0xff]  ;;  %v2300_v39 = vld [vmem:[%s4508_s2 + $0x60] sm:$0xff]  ;;  %v77_v42 = vsel %vm70_vm0, %v74_v23, %v76_v35  ;;  %v226_v51 = vsel %vm221_vm2, %v223_v46, %v225_v50  ;;  %v227_v57 = vrot.slane %v2839_v28, 2  ;;  %v317_v61 = vrot.slane %v2804_v17, 3 }
  0x12   :  { %2262 = vmatmul.msk.f32.gmra.mxu1 %vm78_vm1, %v2804_v17  ;;  %342 = vmatpush.msrb.mxu2 %v2294_v30  ;;  %v2884_v40 = vld [vmem:[%s4507_s1 + $0x48] sm:$0xff]  ;;  %v2319_v41 = vld [vmem:[%s4508_s2 + $0x98] sm:$0xff]  ;;  %v2896_v43 = vld [vmem:[%s4507_s1 + $0x40] sm:$0xff]  ;;  %v316_v56 = vsel %vm313_vm3, %v314_v52, %v315_v53  ;;  %v319_v63 = vrot.slane %v2839_v28, 3  ;;  %v406_v1 = vrot.slane %v2789_v12, 4  ;;  %v407_v2 = vrot.slane %v2794_v13, 4 }
  0x13   :  { %380 = vmatpush.msrb.mxu3 %v2302_v31  ;;  %249 = vmatpush.msra.mxu0 %v2853_v32  ;;  %v2318_v44 = vld [vmem:[%s4508_s2 + $0x90] sm:$0xff]  ;;  %v2317_v48 = vld [vmem:[%s4508_s2 + $0x88] sm:$0xff]  ;;  %v2316_v49 = vld [vmem:[%s4508_s2 + $0x80] sm:$0xff]  ;;  %v228_v60 = vsel %vm221_vm2, %v225_v50, %v227_v57  ;;  %v318_v62 = vsel %vm313_vm3, %v315_v53, %v317_v61  ;;  %vm405_vm4 = vcmask 1043456   ;;  %v409_v4 = vrot.slane %v2804_v17, 4 }
  0x14   :  { %290 = vmatpush.msrb.mxu1 %v2284_v33  ;;  %343 = vmatpush.msrb.mxu2 %v2293_v34  ;;  %v2930_v54 = vld [vmem:[%s4507_s1 + $0x98] sm:$0xff]  ;;  %v2310_v55 = vld [vmem:[%s4507_s1 + $0x90] sm:$0xff]  ;;  %v2309_v58 = vld [vmem:[%s4507_s1 + $0x88] sm:$0xff]  ;;  %v320_v0 = vsel %vm313_vm3, %v317_v61, %v319_v63  ;;  %v408_v3 = vsel %vm405_vm4, %v406_v1, %v407_v2  ;;  %v411_v6 = vrot.slane %v2839_v28, 4  ;;  %vm502_vm5 = vcmask 679936  }
  0x15   :  { %2269 = vmatmul.msk.f32.gmra.mxu2 %vm78_vm1, %v75_v27  ;;  %381 = vmatpush.msrb.mxu3 %v2301_v36  ;;  %v2308_v59 = vld [vmem:[%s4507_s1 + $0x80] sm:$0xff]  ;;  %v410_v5 = vsel %vm405_vm4, %v407_v2, %v409_v4  ;;  %v561_v25 = vld [vmem:[%s4510_s4 + $0x50] sm:$0xf]  ;;  %v560_v27 = vld [vmem:[%s4510_s4 + $0x48] sm:$0xff]  ;;  %vm509_vm6 = vcmask 681986   ;;  %vm511_vm7 = vcmask 684036  }
  0x16   :  { %2273 = vmatmul.msk.f32.gmra.mxu3 %vm78_vm1, %v2794_v13  ;;  %250 = vmatpush.msra.mxu0 %v2872_v37  ;;  %v412_v7 = vsel %vm405_vm4, %v409_v4, %v411_v6  ;;  %v558_v30 = vld [vmem:[%s4510_s4 + $0x38] sm:$0xff]  ;;  %v557_v33 = vld [vmem:[%s4510_s4 + $0x30] sm:$0xff]  ;;  %v2333_v46 = vld [vmem:[%s4510_s4 + $0xa0] sm:$0xff]  ;;  %vm513_vm8 = vcmask 686086   ;;  %vm590_vm9 = vcmask 687104   ;;  %vm984_vm10 = vcmask 647168  }
  0x17   :  { %344 = vmatpush.msrb.mxu2 %v2292_v38  ;;  %382 = vmatpush.msrb.mxu3 %v2300_v39  ;;  %v555_v38 = vld [vmem:[%s4510_s4 + $0x20] sm:$0xff]  ;;  %v2332_v50 = vld [vmem:[%s4510_s4 + $0x98] sm:$0xff]  ;;  %v2380_v1 = vld [vmem:[%s4511_s5 + $0xf0] sm:$0xff]  ;;  %vm2168_vm11 = vcmask 982016   ;;  %vm2234_vm12 = vcmask 74752  }
  0x18   :  { %251 = vmatpush.msra.mxu0 %v2884_v40  ;;  %471 = vmatpush.msra.mxu1 %v2319_v41  ;;  %v554_v41 = vld [vmem:[%s4510_s4 + $0x18] sm:$0xff]  ;;  %v2329_v2 = vld [vmem:[%s4510_s4 + $0x80] sm:$0xff] }
  0x19   :  { %2258 = vmatmul.msk.f32.gmra.mxu0 %vm78_vm1, %v77_v42  ;;  %2338 = vmatpush.msk.msra.mxu3 %vm405_vm4, %v561_v25  ;;  %v569_v4 = vld [vmem:[%s4511_s5 + $0x38] sm:$0xff] }
  0x1a   :  { %2263 = vmatmul.msk.f32.gmra.mxu1 %vm78_vm1, %v2839_v28  ;;  %252 = vmatpush.msra.mxu0 %v2896_v43 }
  0x1b   :  { %472 = vmatpush.msra.mxu1 %v2318_v44  ;;  %634 = vmatpush.msra.mxu3 %v560_v27  ;;  %v553_v44 = vld [vmem:[%s4510_s4 + $0x10] sm:$0xff] }
  0x1d   :  { %2270 = vmatmul.msk.f32.gmra.mxu2 %vm78_vm1, %v77_v42  ;;  %473 = vmatpush.msra.mxu1 %v2317_v48  ;;  %v2334_v42 = vld [vmem:[%s4510_s4 + $0xa8] sm:$0xf] }
  0x1e   :  { %2274 = vmatmul.msk.f32.gmra.mxu3 %vm78_vm1, %v2804_v17  ;;  %2335 = vmatpush.msk.msra.mxu2 %vm405_vm4, %v2334_v42 }
  0x1f   :  { %474 = vmatpush.msra.mxu1 %v2316_v49 }
  0x20   :  { %604 = vmatpush.msra.mxu2 %v2333_v46  ;;  %v2421_v46 = vld [vmem:[%s4510_s4 + $0x198] sm:$0xff] }
  0x21   :  { %2259 = vmatmul.msk.f32.gmra.mxu0 %vm78_vm1, %v76_v35 }
  0x22   :  { %2288 = vmatmul.msk.f32.vlgmr.msrb.gmra.mxu1 %vm78_vm1, %v224_v47  ;;  %605 = vmatpush.msra.mxu2 %v2332_v50  ;;  %v2420_v50 = vld [vmem:[%s4510_s4 + $0x190] sm:$0xff] }
  0x25   :  { %2271 = vmatmul.msk.f32.gmra.mxu2 %vm78_vm1, %v76_v35  ;;  %v556_v35 = vld [vmem:[%s4510_s4 + $0x28] sm:$0xff] }
  0x26   :  { %2275 = vmatmul.msk.f32.gmra.mxu3 %vm78_vm1, %v2839_v28  ;;  %v559_v28 = vld [vmem:[%s4510_s4 + $0x40] sm:$0xff] }
  0x27   :  { %635 = vmatpush.msra.mxu3 %v559_v28 }
  0x29   :  { %2260 = vmatmul.msk.f32.vlgmr.msrb.gmra.mxu0 %vm78_vm1, %v2789_v12  ;;  %636 = vmatpush.msra.mxu3 %v558_v30  ;;  %v2327_v30 = vld [vmem:[%s4510_s4 + $0x70] sm:$0xff] }
  0x2a   :  { %2289 = vmatmul.msk.f32.gmra.mxu1 %vm78_vm1, %v226_v51  ;;  %433 = vmatpush.msrb.mxu0 %v2930_v54 }
  0x2b   :  { %637 = vmatpush.msra.mxu3 %v557_v33  ;;  %v2422_v33 = vld [vmem:[%s4510_s4 + $0x1a0] sm:$0xff] }
  0x2c   :  { %434 = vmatpush.msrb.mxu0 %v2310_v55  ;;  %v572_v55 = vld [vmem:[%s4511_s5 + $0x50] sm:$0xf] }
  0x2d   :  { %2296 = vmatmul.msk.f32.vlgmr.msrb.gmra.mxu2 %vm78_vm1, %v316_v56  ;;  %638 = vmatpush.msra.mxu3 %v556_v35 }
  0x2e   :  { %2304 = vmatmul.msk.f32.vlgmr.msrb.gmra.mxu3 %vm78_vm1, %v316_v56  ;;  %435 = vmatpush.msrb.mxu0 %v2309_v58  ;;  %v2382_v56 = vld [vmem:[%s4511_s5 + $0x100] sm:$0xf]  ;;  %v2331_v58 = vld [vmem:[%s4510_s4 + $0x90] sm:$0xff] }
  0x2f   :  { %639 = vmatpush.msra.mxu3 %v555_v38  ;;  %2383 = vmatpush.msk.msrb.mxu1 %vm405_vm4, %v2382_v56  ;;  %v3125_v38 = vld [vmem:[%s4509_s3] sm:$0x1]  ;;  %v2324_v56 = vld [vmem:[%s4510_s4 + $0x58] sm:$0xff] }
  0x30   :  { %436 = vmatpush.msrb.mxu0 %v2308_v59  ;;  %606 = vmatpush.msra.mxu2 %v2331_v58  ;;  %v571_v59 = vld [vmem:[%s4511_s5 + $0x48] sm:$0xff] }
  0x31   :  { %2280 = vmatmul.msk.f32.vlgmr.msra.gmra.mxu0 %vm78_vm1, %v224_v47  ;;  %640 = vmatpush.msra.mxu3 %v554_v41  ;;  %v552_v47 = vld [vmem:[%s4510_s4 + $0x8] sm:$0xff] }
  0x32   :  { %2290 = vmatmul.msk.f32.gmra.mxu1 %vm78_vm1, %v228_v60 }
  0x33   :  { %641 = vmatpush.msra.mxu3 %v553_v44 }
  0x35   :  { %2297 = vmatmul.msk.f32.gmra.mxu2 %vm78_vm1, %v318_v62  ;;  %642 = vmatpush.msra.mxu3 %v552_v47  ;;  %v566_v47 = vld [vmem:[%s4511_s5 + $0x20] sm:$0xff] }
  0x36   :  { %2305 = vmatmul.msk.f32.gmra.mxu3 %vm78_vm1, %v318_v62 }
  0x39   :  { %2281 = vmatmul.msk.f32.gmra.mxu0 %vm78_vm1, %v226_v51  ;;  %v551_v51 = vld [vmem:[%s4510_s4] sm:$0xff] }
  0x3a   :  { %2291 = vmatmul.msk.f32.gmra.mxu1 %vm78_vm1, %v227_v57  ;;  %643 = vmatpush.msra.mxu3 %v551_v51 }
  0x3c   :  { %2355 = vmatpush.msk.msrb.mxu3 %vm405_vm4, %v572_v55  ;;  %v2375_v55 = vld [vmem:[%s4511_s5 + $0xc8] sm:$0xff] }
  0x3d   :  { %2298 = vmatmul.msk.f32.gmra.mxu2 %vm78_vm1, %v320_v0 }
  0x3e   :  { %2306 = vmatmul.msk.f32.gmra.mxu3 %vm78_vm1, %v320_v0  ;;  %v570_v0 = vld [vmem:[%s4511_s5 + $0x40] sm:$0xff] }
  0x3f   :  { %698 = vmatpush.msrb.mxu3 %v571_v59 }
  0x41   :  { %2282 = vmatmul.msk.f32.gmra.mxu0 %vm78_vm1, %v228_v60  ;;  %v2381_v60 = vld [vmem:[%s4511_s5 + $0xf8] sm:$0xff]  ;;  %699 = vmatpush.msrb.mxu3 %v570_v0  ;;  %v2418_v0 = vld [vmem:[%s4510_s4 + $0x180] sm:$0xff] }
  0x42   :  { %2320 = vmatmul.msk.f32.vlgmr.msra.gmra.mxu1 %vm78_vm1, %v408_v3 }
  0x43   :  { %783 = vmatpush.msrb.mxu1 %v2381_v60  ;;  %700 = vmatpush.msrb.mxu3 %v569_v4  ;;  %v564_v60 = vld [vmem:[%s4511_s5 + $0x10] sm:$0xff]  ;;  %v563_v4 = vld [vmem:[%s4511_s5 + $0x8] sm:$0xff] }
  0x45   :  { %2299 = vmatmul.msk.f32.gmra.mxu2 %vm78_vm1, %v319_v63  ;;  %784 = vmatpush.msrb.mxu1 %v2380_v1  ;;  %v2350_v1 = vld [vmem:[%s4511_s5 + $0xa0] sm:$0xff] }
  0x46   :  { %2307 = vmatmul.msk.f32.gmra.mxu3 %vm78_vm1, %v319_v63  ;;  %v2330_v63 = vld [vmem:[%s4510_s4 + $0x88] sm:$0xff] }
  0x47   :  { %607 = vmatpush.msra.mxu2 %v2330_v63  ;;  %v2374_v63 = vld [vmem:[%s4511_s5 + $0xc0] sm:$0xff] }
  0x49   :  { %2283 = vmatmul.msk.f32.gmra.mxu0 %vm78_vm1, %v227_v57  ;;  %608 = vmatpush.msra.mxu2 %v2329_v2 }
  0x4a   :  { %2321 = vmatmul.msk.f32.gmra.mxu1 %vm78_vm1, %v410_v5 }
  0x51   :  { %2312 = vmatmul.msk.f32.vlgmr.msrb.gmra.mxu0 %vm78_vm1, %v408_v3  ;;  %v2424_v3 = vld [vmem:[%s4510_s4 + $0x1b0] sm:$0xf] }
  0x52   :  { %2322 = vmatmul.msk.f32.gmra.mxu1 %vm78_vm1, %v412_v7  ;;  %2425 = vmatpush.msk.msra.mxu0 %vm405_vm4, %v2424_v3 }
  0x59   :  { %2313 = vmatmul.msk.f32.gmra.mxu0 %vm78_vm1, %v410_v5  ;;  %v2379_v5 = vld [vmem:[%s4511_s5 + $0xe8] sm:$0xff] }
  0x5a   :  { %2323 = vmatmul.msk.f32.gmra.mxu1 %vm78_vm1, %v411_v6 }
  0x5b   :  { %785 = vmatpush.msrb.mxu1 %v2379_v5  ;;  %v2373_v5 = vld [vmem:[%s4511_s5 + $0xb8] sm:$0xff] }
  0x61   :  { %2314 = vmatmul.msk.f32.gmra.mxu0 %vm78_vm1, %v412_v7 }
  0x69   :  { %2315 = vmatmul.msk.f32.gmra.mxu0 %vm78_vm1, %v411_v6 }
  0x86   :  { %v104_v8 = vpop.f32.mrf.mxu0 }
  0x87   :  { %v2981_v9 = vpop.f32.mrf.mxu1 }
  0x8e   :  { %v2983_v10 = vpop.f32.mrf.mxu0 }
  0x8f   :  { %v2985_v11 = vpop.f32.mrf.mxu1  ;;  %v145_v25 = vadd.f32 %v2981_v9, %v2983_v10  ;;  %v567_v9 = vld [vmem:[%s4511_s5 + $0x28] sm:$0xff]  ;;  %v2377_v10 = vld [vmem:[%s4511_s5 + $0xd8] sm:$0xff] }
  0x90   :  { %v175_v14 = vpop.f32.mrf.mxu2 }
  0x91   :  { %v204_v15 = vpop.f32.mrf.mxu3 }
  0x92   :  { %v205_v49 = vadd.f32 %v204_v15, %v175_v14  ;;  %v2328_v15 = vld [vmem:[%s4510_s4 + $0x78] sm:$0xff] }
  0x93   :  { %609 = vmatpush.msra.mxu2 %v2328_v15  ;;  %v2349_v15 = vld [vmem:[%s4511_s5 + $0x98] sm:$0xff] }
  0x95   :  { %610 = vmatpush.msra.mxu2 %v2327_v30  ;;  %v2348_v30 = vld [vmem:[%s4511_s5 + $0x90] sm:$0xff] }
  0x96   :  { %v2987_v12 = vpop.f32.mrf.mxu0 }
  0x97   :  { %v2989_v13 = vpop.f32.mrf.mxu1 }
  0x98   :  { %v2993_v18 = vpop.f32.mrf.mxu2 }
  0x99   :  { %v2995_v19 = vpop.f32.mrf.mxu3 }
  0x9a   :  { %v208_v6 = vadd.f32 %v2995_v19, %v2993_v18  ;;  %v568_v18 = vld [vmem:[%s4511_s5 + $0x30] sm:$0xff]  ;;  %v2378_v19 = vld [vmem:[%s4511_s5 + $0xe0] sm:$0xff] }
  0x9b   :  { %701 = vmatpush.msrb.mxu3 %v568_v18  ;;  %786 = vmatpush.msrb.mxu1 %v2378_v19  ;;  %v2372_v19 = vld [vmem:[%s4511_s5 + $0xb0] sm:$0xff] }
  0x9d   :  { %702 = vmatpush.msrb.mxu3 %v567_v9  ;;  %787 = vmatpush.msrb.mxu1 %v2377_v10  ;;  %v2415_v9 = vld [vmem:[%s4510_s4 + $0x168] sm:$0xff] }
  0x9e   :  { %v2991_v16 = vpop.f32.mrf.mxu0  ;;  %v2437_v10 = vld [vmem:[%s4511_s5 + $0x1a8] sm:$0xff] }
  0x9f   :  { %v292_v17 = vpop.f32.mrf.mxu1  ;;  %703 = vmatpush.msrb.mxu3 %v566_v47  ;;  %v2436_v47 = vld [vmem:[%s4511_s5 + $0x1a0] sm:$0xff] }
  0xa0   :  { %v2999_v23 = vpop.f32.mrf.mxu2  ;;  %v304_v61 = vadd.f32 %v292_v17, %v205_v49  ;;  %v2423_v17 = vld [vmem:[%s4510_s4 + $0x1a8] sm:$0xff]  ;;  %v2325_v49 = vld [vmem:[%s4510_s4 + $0x60] sm:$0xff] }
  0xa1   :  { %v3001_v24 = vpop.f32.mrf.mxu3  ;;  %917 = vmatpush.msra.mxu0 %v2423_v17 }
  0xa2   :  { %v211_v51 = vadd.f32 %v3001_v24, %v2999_v23  ;;  %v2419_v23 = vld [vmem:[%s4510_s4 + $0x188] sm:$0xff] }
  0xa3   :  { %918 = vmatpush.msra.mxu0 %v2422_v33  ;;  %v2351_v24 = vld [vmem:[%s4511_s5 + $0xa8] sm:$0xf] }
  0xa5   :  { %919 = vmatpush.msra.mxu0 %v2421_v46  ;;  %v2414_v46 = vld [vmem:[%s4510_s4 + $0x160] sm:$0xff] }
  0xa6   :  { %v141_v20 = vpop.f32.mrf.mxu0 }
  0xa7   :  { %v2997_v21 = vpop.f32.mrf.mxu1  ;;  %v142_v57 = vadd.f32 %v141_v20, %v104_v8  ;;  %920 = vmatpush.msra.mxu0 %v2420_v50  ;;  %v2435_v50 = vld [vmem:[%s4511_s5 + $0x198] sm:$0xff] }
  0xa8   :  { %v3020_v31 = vpop.f32.mrf.mxu2  ;;  %v305_v41 = vadd.f32 %v2997_v21, %v208_v6  ;;  %v2376_v21 = vld [vmem:[%s4511_s5 + $0xd0] sm:$0xff] }
  0xa9   :  { %v3025_v34 = vpop.f32.mrf.mxu3  ;;  %788 = vmatpush.msrb.mxu1 %v2376_v21  ;;  %921 = vmatpush.msra.mxu0 %v2419_v23 }
  0xaa   :  { %v214_v33 = vadd.f32 %v3025_v34, %v3020_v31  ;;  %v2347_v31 = vld [vmem:[%s4511_s5 + $0x88] sm:$0xff]  ;;  %v151_v34 = vadd.f32 %v2989_v13, %v2991_v16  ;;  %v2346_v13 = vld [vmem:[%s4511_s5 + $0x80] sm:$0xff] }
  0xab   :  { %789 = vmatpush.msrb.mxu1 %v2375_v55  ;;  %922 = vmatpush.msra.mxu0 %v2418_v0  ;;  %v2343_v0 = vld [vmem:[%s4511_s5 + $0x68] sm:$0xff] }
  0xad   :  { %790 = vmatpush.msrb.mxu1 %v2374_v63 }
  0xae   :  { %v254_v22 = vpop.f32.mrf.mxu0 }
  0xaf   :  { %v3006_v26 = vpop.f32.mrf.mxu1  ;;  %v266_v62 = vadd.f32 %v254_v22, %v142_v57  ;;  %791 = vmatpush.msrb.mxu1 %v2373_v5  ;;  %v2342_v5 = vld [vmem:[%s4511_s5 + $0x60] sm:$0xff] }
  0xb0   :  { %v346_v45 = vpop.f32.mrf.mxu2  ;;  %v306_v6 = vadd.f32 %v3006_v26, %v211_v51  ;;  %v562_v26 = vld [vmem:[%s4511_s5] sm:$0xff] }
  0xb1   :  { %v384_v48 = vpop.f32.mrf.mxu3  ;;  %v358_v7 = vadd.f32 %v346_v45, %v266_v62  ;;  %v2326_v45 = vld [vmem:[%s4510_s4 + $0x68] sm:$0xff]  ;;  %792 = vmatpush.msrb.mxu1 %v2372_v19 }
  0xb2   :  { %v396_v8 = vadd.f32 %v384_v48, %v304_v61  ;;  %611 = vmatpush.msra.mxu2 %v2326_v45  ;;  %v3148_v48 = vperm.slane %v3125_v38, 0  ;;  %v148_v61 = vadd.f32 %v2985_v11, %v2987_v12 }
  0xb4   :  { %612 = vmatpush.msra.mxu2 %v2325_v49 }
  0xb6   :  { %v3015_v29 = vpop.f32.mrf.mxu0  ;;  %613 = vmatpush.msra.mxu2 %v2324_v56 }
  0xb7   :  { %v3030_v36 = vpop.f32.mrf.mxu1  ;;  %v267_v42 = vadd.f32 %v3015_v29, %v145_v25 }
  0xb8   :  { %v349_v14 = vpop.f32.mrf.mxu2  ;;  %2352 = vmatpush.msk.msrb.mxu2 %vm405_vm4, %v2351_v24  ;;  %v307_v16 = vadd.f32 %v3030_v36, %v214_v33  ;;  %v2434_v36 = vld [vmem:[%s4511_s5 + $0x190] sm:$0xff] }
  0xb9   :  { %v387_v20 = vpop.f32.mrf.mxu3  ;;  %v359_v57 = vadd.f32 %v349_v14, %v267_v42  ;;  %v2417_v14 = vld [vmem:[%s4510_s4 + $0x178] sm:$0xff] }
  0xba   :  { %v397_v58 = vadd.f32 %v387_v20, %v305_v41  ;;  %672 = vmatpush.msrb.mxu2 %v2350_v1  ;;  %923 = vmatpush.msra.mxu0 %v2417_v14 }
  0xbc   :  { %673 = vmatpush.msrb.mxu2 %v2349_v15  ;;  %v2341_v15 = vld [vmem:[%s4511_s5 + $0x58] sm:$0xff] }
  0xbe   :  { %v3035_v39 = vpop.f32.mrf.mxu0  ;;  %674 = vmatpush.msrb.mxu2 %v2348_v30  ;;  %v3317_v30 = vld [vmem:[%s4510_s4 + $0xf0] sm:$0xff] }
  0xbf   :  { %v476_v52 = vpop.f32.mrf.mxu1  ;;  %v268_v17 = vadd.f32 %v3035_v39, %v148_v61  ;;  %v2416_v39 = vld [vmem:[%s4510_s4 + $0x170] sm:$0xff] }
  0xc0   :  { %v488_v27 = vadd.f32 %v476_v52, %v396_v8  ;;  %v565_v52 = vld [vmem:[%s4511_s5 + $0x18] sm:$0xff]  ;;  %924 = vmatpush.msra.mxu0 %v2416_v39  ;;  %675 = vmatpush.msrb.mxu2 %v2347_v31  ;;  %v2428_v39 = vld [vmem:[%s4511_s5 + $0x160] sm:$0xff] }
  0xc1   :  { %704 = vmatpush.msrb.mxu3 %v565_v52  ;;  %v390_v8 = vpop.f32.mrf.mxu3 }
  0xc2   :  { %925 = vmatpush.msra.mxu0 %v2415_v9  ;;  %676 = vmatpush.msrb.mxu2 %v2346_v13  ;;  %v3323_v9 = vld [vmem:[%s4510_s4 + $0xe8] sm:$0xff] }
  0xc3   :  { %705 = vmatpush.msrb.mxu3 %v564_v60  ;;  %v2433_v60 = vld [vmem:[%s4511_s5 + $0x188] sm:$0xff] }
  0xc4   :  { %926 = vmatpush.msra.mxu0 %v2414_v46 }
  0xc5   :  { %706 = vmatpush.msrb.mxu3 %v563_v4 }
  0xc6   :  { %v3059_v53 = vpop.f32.mrf.mxu0 }
  0xc7   :  { %v479_v35 = vpop.f32.mrf.mxu1  ;;  %707 = vmatpush.msrb.mxu3 %v562_v26  ;;  %v269_v51 = vadd.f32 %v3059_v53, %v151_v34  ;;  %v2344_v53 = vld [vmem:[%s4511_s5 + $0x70] sm:$0xff] }
  0xc8   :  { %v489_v2 = vadd.f32 %v479_v35, %v397_v58  ;;  %v398_v35 = vadd.f32 %v390_v8, %v306_v6  ;;  %v2431_v6 = vld [vmem:[%s4511_s5 + $0x178] sm:$0xff] }
  0xce   :  { %v438_v22 = vpop.f32.mrf.mxu0 }
  0xcf   :  { %v450_v28 = vadd.f32 %v438_v22, %v358_v7  ;;  %v352_v7 = vpop.f32.mrf.mxu2  ;;  %v482_v25 = vpop.f32.mrf.mxu1 }
  0xd0   :  { %v360_v41 = vadd.f32 %v352_v7, %v268_v17  ;;  %v2430_v17 = vld [vmem:[%s4511_s5 + $0x170] sm:$0xff] }
  0xd1   :  { %v492_v44 = vmax.f32 %v450_v28, %v488_v27  ;;  %v2438_v27 = vld [vmem:[%s4511_s5 + $0x1b0] sm:$0xf] }
  0xd2   :  { %2439 = vmatpush.msk.msra.mxu1 %vm405_vm4, %v2438_v27 }
  0xd3   :  { %v497_v29 = vrot.slane %v492_v44, 1 }
  0xd4   :  { %957 = vmatpush.msra.mxu1 %v2437_v10  ;;  %v3337_v10 = vld [vmem:[%s4510_s4 + $0xd8] sm:$0xff] }
  0xd5   :  { %v499_v59 = vmax.f32 %v492_v44, %v497_v29  ;;  %v490_v44 = vadd.f32 %v482_v25, %v398_v35  ;;  %v3306_v25 = vld [vmem:[%s4510_s4 + $0xf8] sm:$0xff] }
  0xd6   :  { %v441_v62 = vpop.f32.mrf.mxu0  ;;  %958 = vmatpush.msra.mxu1 %v2436_v47 }
  0xd7   :  { %v500_v3 = vadd.f32 %v499_v59, %v3125_v38  ;;  %v507_v11 = vadd.f32 %v3148_v48, %v499_v59  ;;  %v451_v12 = vadd.f32 %v441_v62, %v359_v57  ;;  %v2345_v57 = vld [vmem:[%s4511_s5 + $0x78] sm:$0xff]  ;;  %v355_v58 = vpop.f32.mrf.mxu2  ;;  %v393_v59 = vpop.f32.mrf.mxu3 }
  0xd8   :  { %959 = vmatpush.msra.mxu1 %v2435_v50  ;;  %v485_v24 = vpop.f32.mrf.mxu1  ;;  %677 = vmatpush.msrb.mxu2 %v2345_v57  ;;  %v361_v61 = vadd.f32 %v355_v58, %v269_v51  ;;  %v399_v62 = vadd.f32 %v393_v59, %v307_v16  ;;  %v2396_v50 = vld [vmem:[%s4510_s4 + $0x158] sm:$0xf]  ;;  %v2393_v58 = vld [vmem:[%s4510_s4 + $0x140] sm:$0xff]  ;;  %v2409_v59 = vld [vmem:[%s4511_s5 + $0x150] sm:$0xff] }
  0xd9   :  { %v501_v20 = vmax.f32 %v500_v3, 0.0  ;;  %v508_v22 = vmax.f32 %v507_v11, 0.0  ;;  %v493_v18 = vmax.f32 %v451_v12, %v489_v2  ;;  %v2432_v2 = vld [vmem:[%s4511_s5 + $0x180] sm:$0xff]  ;;  %v3388_v51 = vld [vmem:[%s4510_s4 + $0xb8] sm:$0xff] }
  0xda   :  { %960 = vmatpush.msra.mxu1 %v2434_v36  ;;  %678 = vmatpush.msrb.mxu2 %v2344_v53  ;;  %v491_v3 = vadd.f32 %v485_v24, %v399_v62  ;;  %v2410_v57 = vld [vmem:[%s4511_s5 + $0x158] sm:$0xf]  ;;  %v2391_v53 = vld [vmem:[%s4510_s4 + $0x130] sm:$0xff]  ;;  %v2407_v24 = vld [vmem:[%s4511_s5 + $0x140] sm:$0xff] }
  0xdb   :  { %503 = vst.msk [vmem:[#allocation2] sm:$0x1] %vm502_vm5, %v501_v20  ;;  %v516_v28 = vrot.slane %v493_v18, 1  ;;  %v2392_v36 = vld [vmem:[%s4510_s4 + $0x138] sm:$0xff]  ;;  %v2389_v62 = vld [vmem:[%s4510_s4 + $0x120] sm:$0xff] }
  0xdc   :  { %510 = vst.msk [vmem:[#allocation2 - $0x1] sm:$0x4] %vm509_vm6, %v508_v22  ;;  %961 = vmatpush.msra.mxu1 %v2433_v60  ;;  %679 = vmatpush.msrb.mxu2 %v2343_v0  ;;  %v2390_v60 = vld [vmem:[%s4510_s4 + $0x128] sm:$0xff]  ;;  %v2388_v0 = vld [vmem:[%s4510_s4 + $0x118] sm:$0xff] }
  0xdd   :  { %512 = vst.msk [vmem:[#allocation2 - $0x2] sm:$0x10] %vm511_vm7, %v508_v22  ;;  %v518_v42 = vmax.f32 %v493_v18, %v516_v28  ;;  %v2429_v18 = vld [vmem:[%s4511_s5 + $0x168] sm:$0xff] }
  0xde   :  { %514 = vst.msk [vmem:[#allocation2 - $0x3] sm:$0x40] %vm513_vm8, %v508_v22  ;;  %v444_v45 = vpop.f32.mrf.mxu0  ;;  %962 = vmatpush.msra.mxu1 %v2432_v2  ;;  %680 = vmatpush.msrb.mxu2 %v2342_v5  ;;  %v2368_v22 = vld [vmem:[%s4510_s4 + $0x100] sm:$0xf]  ;;  %v2460_v2 = vld [vmem:[%s4508_s2 + $0x30] sm:$0xff]  ;;  %v3478_v5 = vld [vmem:[%s4506_s0 + $0x28] sm:$0xff] }
  0xdf   :  { %v519_v21 = vadd.f32 %v518_v42, %v3125_v38  ;;  %v522_v29 = vadd.f32 %v518_v42, %v3148_v48  ;;  %v452_v49 = vadd.f32 %v444_v45, %v360_v41  ;;  %v3343_v41 = vld [vmem:[%s4510_s4 + $0xd0] sm:$0xff]  ;;  %v3349_v42 = vld [vmem:[%s4510_s4 + $0xc8] sm:$0xff] }
  0xe0   :  { %963 = vmatpush.msra.mxu1 %v2431_v6  ;;  %681 = vmatpush.msrb.mxu2 %v2341_v15  ;;  %v2459_v6 = vld [vmem:[%s4508_s2 + $0x28] sm:$0xff] }
  0xe1   :  { %v520_v52 = vmax.f32 %v519_v21, 0.0  ;;  %v523_v55 = vmax.f32 %v522_v29, 0.0  ;;  %v494_v56 = vmax.f32 %v452_v49, %v490_v44  ;;  %v3372_v29 = vld [vmem:[%s4510_s4 + $0xc0] sm:$0xff] }
  0xe2   :  { %964 = vmatpush.msra.mxu1 %v2430_v17  ;;  %v1036_v17 = vrot.slane %v3478_v5, 1 }
  0xe3   :  { %521 = vst.msk [vmem:[#allocation2 + $0x4] sm:$0x1] %vm502_vm5, %v520_v52  ;;  %v528_v23 = vrot.slane %v494_v56, 1  ;;  %v2395_v52 = vld [vmem:[%s4510_s4 + $0x150] sm:$0xff] }
  0xe4   :  { %524 = vst.msk [vmem:[#allocation2 + $0x3] sm:$0x4] %vm509_vm6, %v523_v55  ;;  %965 = vmatpush.msra.mxu1 %v2429_v18  ;;  %v2448_v18 = vld [vmem:[%s4507_s1 + $0x30] sm:$0xff] }
  0xe5   :  { %525 = vst.msk [vmem:[#allocation2 + $0x2] sm:$0x10] %vm511_vm7, %v523_v55  ;;  %v530_v63 = vmax.f32 %v494_v56, %v528_v23  ;;  %v2394_v56 = vld [vmem:[%s4510_s4 + $0x148] sm:$0xff] }
  0xe6   :  { %526 = vst.msk [vmem:[#allocation2 + $0x1] sm:$0x40] %vm513_vm8, %v523_v55  ;;  %v447_v1 = vpop.f32.mrf.mxu0  ;;  %966 = vmatpush.msra.mxu1 %v2428_v39  ;;  %v3400_v55 = vld [vmem:[%s4510_s4 + $0xb0] sm:$0xff]  ;;  %v2408_v23 = vld [vmem:[%s4511_s5 + $0x148] sm:$0xff] }
  0xe7   :  { %v531_v11 = vadd.f32 %v530_v63, %v3125_v38  ;;  %v534_v12 = vadd.f32 %v530_v63, %v3148_v48  ;;  %v453_v4 = vadd.f32 %v447_v1, %v361_v61  ;;  %v2406_v61 = vld [vmem:[%s4511_s5 + $0x138] sm:$0xff]  ;;  %v2405_v63 = vld [vmem:[%s4511_s5 + $0x130] sm:$0xff]  ;;  %v1024_v39 = vld [vmem:[%s4508_s2 + $0x8] sm:$0xff] }
  0xe8   :  { %v2461_v1 = vld [vmem:[%s4508_s2 + $0x38] sm:$0xff] }
  0xe9   :  { %v532_v7 = vmax.f32 %v531_v11, 0.0  ;;  %v535_v8 = vmax.f32 %v534_v12, 0.0  ;;  %v495_v14 = vmax.f32 %v453_v4, %v491_v3  ;;  %v2387_v3 = vld [vmem:[%s4510_s4 + $0x110] sm:$0xff]  ;;  %1132 = vmatpush.msrb.mxu0 %v2461_v1  ;;  %v2404_v11 = vld [vmem:[%s4511_s5 + $0x128] sm:$0xff]  ;;  %v3473_v4 = vld [vmem:[%s4506_s0 + $0x20] sm:$0xff] }
  0xea   :  { %v2386_v12 = vld [vmem:[%s4510_s4 + $0x108] sm:$0xff]  ;;  %v1035_v15 = vrot.slane %v3473_v4, 1  ;;  %v2504_v1 = vld [vmem:[%s4507_s1 + $0x90] sm:$0xff] }
  0xeb   :  { %533 = vst.msk [vmem:[#allocation2 + $0x8] sm:$0x1] %vm502_vm5, %v532_v7  ;;  %v540_v20 = vrot.slane %v495_v14, 1  ;;  %1133 = vmatpush.msrb.mxu0 %v2460_v2  ;;  %v1026_v7 = vld [vmem:[%s4508_s2 + $0x18] sm:$0xff]  ;;  %v2512_v2 = vld [vmem:[%s4508_s2 + $0x90] sm:$0xff] }
  0xec   :  { %536 = vst.msk [vmem:[#allocation2 + $0x7] sm:$0x4] %vm509_vm6, %v535_v8 }
  0xed   :  { %v3297_v26 = vld [vmem:[#allocation2] sm:$0xff]  ;;  %537 = vst.msk [vmem:[#allocation2 + $0x6] sm:$0x10] %vm511_vm7, %v535_v8  ;;  %v542_v19 = vmax.f32 %v495_v14, %v540_v20  ;;  %v2449_v14 = vld [vmem:[%s4507_s1 + $0x38] sm:$0xff]  ;;  %1134 = vmatpush.msrb.mxu0 %v2459_v6  ;;  %v2458_v20 = vld [vmem:[%s4508_s2 + $0x20] sm:$0xff] }
  0xee   :  { %538 = vst.msk [vmem:[#allocation2 + $0x5] sm:$0x40] %vm513_vm8, %v535_v8  ;;  %2339 = vmatmul.msk.f32.vlgmr.msra.gmra.mxu3 %vm590_vm9, %v3297_v26  ;;  %v587_v34 = vrot.slane %v3297_v26, 1  ;;  %v727_v44 = vrot.slane %v3297_v26, 2  ;;  %v901_v47 = vrot.slane %v3297_v26, 4  ;;  %v2403_v8 = vld [vmem:[%s4511_s5 + $0x120] sm:$0xff] }
  0xef   :  { %v543_v27 = vadd.f32 %v542_v19, %v3125_v38  ;;  %v546_v28 = vadd.f32 %v542_v19, %v3148_v48  ;;  %2369 = vmatpush.msk.msra.mxu3 %vm405_vm4, %v2368_v22  ;;  %v3331_v38 = vld [vmem:[%s4510_s4 + $0xe0] sm:$0xff]  ;;  %v2402_v22 = vld [vmem:[%s4511_s5 + $0x118] sm:$0xff]  ;;  %v1025_v19 = vld [vmem:[%s4508_s2 + $0x10] sm:$0xff]  ;;  %1135 = vmatpush.msrb.mxu0 %v2458_v20 }
  0xf0   :  { %v2511_v6 = vld [vmem:[%s4508_s2 + $0x88] sm:$0xff]  ;;  %v2502_v20 = vld [vmem:[%s4507_s1 + $0x80] sm:$0xff] }
  0xf1   :  { %v544_v33 = vmax.f32 %v543_v27, 0.0  ;;  %v547_v35 = vmax.f32 %v546_v28, 0.0  ;;  %743 = vmatpush.msra.mxu3 %v3306_v25  ;;  %v2447_v27 = vld [vmem:[%s4507_s1 + $0x28] sm:$0xff] }
  0xf3   :  { %545 = vst.msk [vmem:[#allocation2 + $0xc] sm:$0x1] %vm502_vm5, %v544_v33  ;;  %744 = vmatpush.msra.mxu3 %v3317_v30  ;;  %v2401_v33 = vld [vmem:[%s4511_s5 + $0x110] sm:$0xff] }
  0xf4   :  { %548 = vst.msk [vmem:[#allocation2 + $0xb] sm:$0x4] %vm509_vm6, %v547_v35  ;;  %v1037_v35 = vsel %vm70_vm0, %v1035_v15, %v1036_v17 }
  0xf5   :  { %745 = vmatpush.msra.mxu3 %v3323_v9 }
  0xf7   :  { %746 = vmatpush.msra.mxu3 %v3331_v38 }
  0xf9   :  { %747 = vmatpush.msra.mxu3 %v3337_v10 }
  0xfb   :  { %v3351_v31 = vld [vmem:[#allocation2 + $0x8] sm:$0x3f]  ;;  %748 = vmatpush.msra.mxu3 %v3343_v41 }
  0xfc   :  { %2340 = vmatmul.msk.f32.gmra.mxu3 %vm590_vm9, %v3351_v31  ;;  %v3359_v45 = vrot.slane %v3351_v31, 1  ;;  %v3362_v46 = vrot.slane %v3351_v31, 2  ;;  %v3366_v21 = vrot.slane %v3351_v31, 4  ;;  %v815_v28 = vrot.slane %v3351_v31, 3 }
  0xfd   :  { %749 = vmatpush.msra.mxu3 %v3349_v42 }
  0xfe   :  { %v589_v49 = vsel %vm70_vm0, %v587_v34, %v3359_v45  ;;  %v729_v13 = vsel %vm221_vm2, %v727_v44, %v3362_v46  ;;  %v903_v16 = vsel %vm405_vm4, %v901_v47, %v3366_v21  ;;  %v1023_v34 = vld [vmem:[%s4508_s2] sm:$0xff]  ;;  %v2400_v47 = vld [vmem:[%s4511_s5 + $0x108] sm:$0xff] }
  0xff   :  { %2336 = vmatmul.msk.f32.vlgmr.msra.gmra.mxu2 %vm590_vm9, %v589_v49  ;;  %2384 = vmatmul.msk.f32.vlgmr.msrb.gmra.mxu1 %vm590_vm9, %v729_v13  ;;  %v2446_v44 = vld [vmem:[%s4507_s1 + $0x20] sm:$0xff] }
 0x100   :  { %2426 = vmatmul.msk.f32.vlgmr.msra.gmra.mxu0 %vm590_vm9, %v903_v16  ;;  %750 = vmatpush.msra.mxu3 %v3372_v29 }
 0x101   :  { %2397 = vmatpush.msk.msra.mxu2 %vm405_vm4, %v2396_v50  ;;  %1161 = vmatpush.msrb.mxu1 %v1026_v7  ;;  %v3560_v50 = vld [vmem:[%s4506_s0 + $0x38] sm:$0xff] }
 0x102   :  { %751 = vmatpush.msra.mxu3 %v3388_v51  ;;  %v1276_v7 = vrot.slane %v3560_v50, 3 }
 0x103   :  { %830 = vmatpush.msra.mxu2 %v2395_v52  ;;  %1162 = vmatpush.msrb.mxu1 %v1025_v19  ;;  %v1040_v52 = vrot.slane %v3560_v50, 1 }
 0x104   :  { %2356 = vmatmul.msk.f32.vlgmr.msrb.gmra.mxu3 %vm590_vm9, %v3297_v26 }
 0x105   :  { %752 = vmatpush.msra.mxu3 %v3400_v55  ;;  %831 = vmatpush.msra.mxu2 %v2394_v56  ;;  %v2648_v56 = vld [vmem:[%s4508_s2 + $0x58] sm:$0xff] }
 0x106   :  { %1163 = vmatpush.msrb.mxu1 %v1024_v39  ;;  %v1187_v39 = vrot.slane %v3560_v50, 2 }
 0x107   :  { %2411 = vmatpush.msk.msrb.mxu3 %vm405_vm4, %v2410_v57  ;;  %2337 = vmatmul.msk.f32.gmra.mxu2 %vm590_vm9, %v3359_v45  ;;  %v2478_v57 = vld [vmem:[%s4508_s2 + $0x40] sm:$0xff] }
 0x108   :  { %2385 = vmatmul.msk.f32.gmra.mxu1 %vm590_vm9, %v3362_v46  ;;  %2427 = vmatmul.msk.f32.gmra.mxu0 %vm590_vm9, %v3366_v21 }
 0x109   :  { %832 = vmatpush.msra.mxu2 %v2393_v58  ;;  %870 = vmatpush.msrb.mxu3 %v2409_v59  ;;  %v2489_v58 = vld [vmem:[%s4507_s1 + $0x78] sm:$0xff]  ;;  %v2488_v59 = vld [vmem:[%s4507_s1 + $0x70] sm:$0xff] }
 0x10a   :  { %1164 = vmatpush.msrb.mxu1 %v1023_v34  ;;  %1298 = vmatpush.msra.mxu0 %v2489_v58 }
 0x10b   :  { %833 = vmatpush.msra.mxu2 %v2392_v36  ;;  %871 = vmatpush.msrb.mxu3 %v2408_v23  ;;  %v2487_v36 = vld [vmem:[%s4507_s1 + $0x68] sm:$0xff]  ;;  %v2497_v23 = vld [vmem:[%s4508_s2 + $0x78] sm:$0xff] }
 0x10c   :  { %2357 = vmatmul.msk.f32.gmra.mxu3 %vm590_vm9, %v3351_v31  ;;  %v3531_v31 = vld [vmem:[%s4506_s0 + $0x30] sm:$0xff]  ;;  %1299 = vmatpush.msra.mxu0 %v2488_v59 }
 0x10d   :  { %834 = vmatpush.msra.mxu2 %v2391_v53  ;;  %872 = vmatpush.msrb.mxu3 %v2407_v24  ;;  %v2649_v53 = vld [vmem:[%s4508_s2 + $0x98] sm:$0xff]  ;;  %v1271_v24 = vrot.slane %v3473_v4, 3  ;;  %v1363_v34 = vrot.slane %v3531_v31, 4 }
 0x10e   :  { %1300 = vmatpush.msra.mxu0 %v2487_v36 }
 0x10f   :  { %835 = vmatpush.msra.mxu2 %v2390_v60  ;;  %873 = vmatpush.msrb.mxu3 %v2406_v61  ;;  %v1272_v60 = vrot.slane %v3478_v5, 3  ;;  %v2496_v61 = vld [vmem:[%s4508_s2 + $0x70] sm:$0xff] }
 0x110   :  { %2353 = vmatmul.msk.f32.vlgmr.msrb.gmra.mxu2 %vm590_vm9, %v589_v49  ;;  %2440 = vmatmul.msk.f32.vlgmr.msra.gmra.mxu1 %vm590_vm9, %v903_v16 }
 0x111   :  { %836 = vmatpush.msra.mxu2 %v2389_v62  ;;  %874 = vmatpush.msrb.mxu3 %v2405_v63  ;;  %v2495_v62 = vld [vmem:[%s4508_s2 + $0x68] sm:$0xff]  ;;  %v1273_v63 = vsel %vm313_vm3, %v1271_v24, %v1272_v60 }
 0x112   :  { %2462 = vmatmul.msk.f32.vlgmr.msrb.gmra.mxu0 %vm78_vm1, %v1037_v35  ;;  %1335 = vmatpush.msra.mxu1 %v2497_v23 }
 0x113   :  { %837 = vmatpush.msra.mxu2 %v2388_v0  ;;  %875 = vmatpush.msrb.mxu3 %v2404_v11  ;;  %v2494_v0 = vld [vmem:[%s4508_s2 + $0x60] sm:$0xff] }
 0x114   :  { %2370 = vmatmul.msk.f32.vlgmr.msra.gmra.mxu3 %vm590_vm9, %v729_v13  ;;  %v1038_v13 = vrot.slane %v3531_v31, 1  ;;  %1336 = vmatpush.msra.mxu1 %v2496_v61 }
 0x115   :  { %838 = vmatpush.msra.mxu2 %v2387_v3  ;;  %876 = vmatpush.msrb.mxu3 %v2403_v8  ;;  %v1274_v3 = vrot.slane %v3531_v31, 3  ;;  %v1182_v8 = vrot.slane %v3473_v4, 2 }
 0x116   :  { %v1039_v16 = vsel %vm70_vm0, %v1036_v17, %v1038_v13  ;;  %1337 = vmatpush.msra.mxu1 %v2495_v62 }
 0x117   :  { %839 = vmatpush.msra.mxu2 %v2386_v12  ;;  %877 = vmatpush.msrb.mxu3 %v2402_v22  ;;  %v1275_v11 = vsel %vm313_vm3, %v1272_v60, %v1274_v3  ;;  %v2503_v12 = vld [vmem:[%s4507_s1 + $0x88] sm:$0xff]  ;;  %v1277_v15 = vsel %vm313_vm3, %v1274_v3, %v1276_v7  ;;  %v2510_v22 = vld [vmem:[%s4508_s2 + $0x80] sm:$0xff] }
 0x118   :  { %2354 = vmatmul.msk.f32.gmra.mxu2 %vm590_vm9, %v3359_v45  ;;  %2441 = vmatmul.msk.f32.gmra.mxu1 %vm590_vm9, %v3366_v21  ;;  %v814_v45 = vrot.slane %v3297_v26, 3  ;;  %v1022_v21 = vld [vmem:[%s4507_s1 + $0x18] sm:$0xff]  ;;  %v1021_v26 = vld [vmem:[%s4507_s1 + $0x10] sm:$0xff] }
 0x119   :  { %1062 = vmatpush.msrb.mxu2 %v2449_v14  ;;  %878 = vmatpush.msrb.mxu3 %v2401_v33  ;;  %v1183_v14 = vrot.slane %v3478_v5, 2  ;;  %v1361_v33 = vrot.slane %v3478_v5, 4 }
 0x11a   :  { %v816_v49 = vsel %vm313_vm3, %v814_v45, %v815_v28  ;;  %2463 = vmatmul.msk.f32.gmra.mxu0 %vm78_vm1, %v1039_v16  ;;  %1338 = vmatpush.msra.mxu1 %v2494_v0  ;;  %v3699_v0 = vld [vmem:[%s4512_s6] sm:$0x1] }
 0x11b   :  { %1063 = vmatpush.msrb.mxu2 %v2448_v18  ;;  %879 = vmatpush.msrb.mxu3 %v2400_v47  ;;  %v1184_v17 = vsel %vm221_vm2, %v1182_v8, %v1183_v14  ;;  %v1185_v18 = vrot.slane %v3531_v31, 2  ;;  %v1365_v47 = vrot.slane %v3560_v50, 4 }
 0x11c   :  { %2371 = vmatmul.msk.f32.gmra.mxu3 %vm590_vm9, %v3362_v46  ;;  %v1020_v46 = vld [vmem:[%s4507_s1 + $0x8] sm:$0xff] }
 0x11d   :  { %1064 = vmatpush.msrb.mxu2 %v2447_v27  ;;  %1099 = vmatpush.msra.mxu3 %v1022_v21  ;;  %v1186_v19 = vsel %vm221_vm2, %v1183_v14, %v1185_v18  ;;  %v1188_v27 = vsel %vm221_vm2, %v1185_v18, %v1187_v39 }
 0x11f   :  { %1065 = vmatpush.msrb.mxu2 %v2446_v44  ;;  %1100 = vmatpush.msra.mxu3 %v1021_v26  ;;  %v1364_v44 = vsel %vm405_vm4, %v1361_v33, %v1363_v34 }
 0x120   :  { %2398 = vmatmul.msk.f32.vlgmr.msra.gmra.mxu2 %vm590_vm9, %v816_v49  ;;  %2466 = vmatmul.msk.f32.vlgmr.msrb.gmra.mxu1 %vm78_vm1, %v3473_v4 }
 0x121   :  { %1209 = vmatpush.msra.mxu2 %v2853_v32  ;;  %v1019_v32 = vld [vmem:[%s4507_s1] sm:$0xff]  ;;  %1101 = vmatpush.msra.mxu3 %v1020_v46 }
 0x123   :  { %1210 = vmatpush.msra.mxu2 %v2872_v37  ;;  %1102 = vmatpush.msra.mxu3 %v1019_v32  ;;  %v2480_v37 = vld [vmem:[%s4508_s2 + $0x50] sm:$0xff] }
 0x124   :  { %2412 = vmatmul.msk.f32.vlgmr.msrb.gmra.mxu3 %vm590_vm9, %v816_v49 }
 0x125   :  { %1211 = vmatpush.msra.mxu2 %v2884_v40  ;;  %1246 = vmatpush.msrb.mxu3 %v2648_v56  ;;  %v1041_v40 = vsel %vm70_vm0, %v1038_v13, %v1040_v52 }
 0x126   :  { %2464 = vmatmul.msk.f32.gmra.mxu0 %vm78_vm1, %v1041_v40 }
 0x127   :  { %1212 = vmatpush.msra.mxu2 %v2896_v43  ;;  %1247 = vmatpush.msrb.mxu3 %v2480_v37  ;;  %v2479_v43 = vld [vmem:[%s4508_s2 + $0x48] sm:$0xff] }
 0x128   :  { %2399 = vmatmul.msk.f32.gmra.mxu2 %vm590_vm9, %v815_v28  ;;  %2467 = vmatmul.msk.f32.gmra.mxu1 %vm78_vm1, %v3478_v5 }
 0x129   :  { %1248 = vmatpush.msrb.mxu3 %v2479_v43 }
 0x12b   :  { %1249 = vmatpush.msrb.mxu3 %v2478_v57 }
 0x12c   :  { %2413 = vmatmul.msk.f32.gmra.mxu3 %vm590_vm9, %v815_v28  ;;  %v1360_v28 = vrot.slane %v3473_v4, 4 }
 0x12e   :  { %2465 = vmatmul.msk.f32.gmra.mxu0 %vm78_vm1, %v1040_v52 }
 0x130   :  { %2450 = vmatmul.msk.f32.vlgmr.msrb.gmra.mxu2 %vm78_vm1, %v1037_v35  ;;  %2468 = vmatmul.msk.f32.gmra.mxu1 %vm78_vm1, %v3531_v31  ;;  %v1362_v35 = vsel %vm405_vm4, %v1360_v28, %v1361_v33 }
 0x131   :  { %1387 = vmatpush.msrb.mxu2 %v2930_v54  ;;  %v2486_v54 = vld [vmem:[%s4507_s1 + $0x60] sm:$0xff] }
 0x132   :  { %1301 = vmatpush.msra.mxu0 %v2486_v54 }
 0x133   :  { %1388 = vmatpush.msrb.mxu2 %v2504_v1 }
 0x134   :  { %2454 = vmatmul.msk.f32.vlgmr.msra.gmra.mxu3 %vm78_vm1, %v3473_v4  ;;  %v1366_v4 = vsel %vm405_vm4, %v1363_v34, %v1365_v47 }
 0x135   :  { %1424 = vmatpush.msra.mxu3 %v2649_v53  ;;  %1389 = vmatpush.msrb.mxu2 %v2503_v12 }
 0x136   :  { %2490 = vmatmul.msk.f32.vlgmr.msra.gmra.mxu0 %vm78_vm1, %v1273_v63 }
 0x137   :  { %1425 = vmatpush.msra.mxu3 %v2512_v2  ;;  %1390 = vmatpush.msrb.mxu2 %v2502_v20 }
 0x138   :  { %2451 = vmatmul.msk.f32.gmra.mxu2 %vm78_vm1, %v1039_v16  ;;  %2469 = vmatmul.msk.f32.gmra.mxu1 %vm78_vm1, %v3560_v50 }
 0x139   :  { %1426 = vmatpush.msra.mxu3 %v2511_v6 }
 0x13b   :  { %1427 = vmatpush.msra.mxu3 %v2510_v22 }
 0x13c   :  { %2455 = vmatmul.msk.f32.gmra.mxu3 %vm78_vm1, %v3478_v5 }
 0x13e   :  { %2491 = vmatmul.msk.f32.gmra.mxu0 %vm78_vm1, %v1275_v11 }
 0x140   :  { %2452 = vmatmul.msk.f32.gmra.mxu2 %vm78_vm1, %v1041_v40  ;;  %2498 = vmatmul.msk.f32.vlgmr.msra.gmra.mxu1 %vm78_vm1, %v1273_v63 }
 0x144   :  { %2456 = vmatmul.msk.f32.gmra.mxu3 %vm78_vm1, %v3531_v31  ;;  %v2678_v31 = vmov 0.0  }
 0x145   :  { %45 = vst [vmem:[#allocation3] sm:$0xff] %v2678_v31 }
 0x146   :  { %2492 = vmatmul.msk.f32.gmra.mxu0 %vm78_vm1, %v1277_v15  ;;  %46 = vst [vmem:[#allocation3 + $0x8] sm:$0x3] %v2678_v31 }
 0x148   :  { %2453 = vmatmul.msk.f32.gmra.mxu2 %vm78_vm1, %v1040_v52  ;;  %2499 = vmatmul.msk.f32.gmra.mxu1 %vm78_vm1, %v1275_v11  ;;  %v987_v11 = vperm.slane %v3699_v0, 0 }
 0x14c   :  { %2457 = vmatmul.msk.f32.gmra.mxu3 %vm78_vm1, %v3560_v50 }
 0x14e   :  { %2493 = vmatmul.msk.f32.gmra.mxu0 %vm78_vm1, %v1276_v7 }
 0x150   :  { %2474 = vmatmul.msk.f32.vlgmr.msra.gmra.mxu2 %vm78_vm1, %v1184_v17  ;;  %2500 = vmatmul.msk.f32.gmra.mxu1 %vm78_vm1, %v1277_v15 }
 0x154   :  { %2482 = vmatmul.msk.f32.vlgmr.msrb.gmra.mxu3 %vm78_vm1, %v1184_v17 }
 0x158   :  { %2475 = vmatmul.msk.f32.gmra.mxu2 %vm78_vm1, %v1186_v19  ;;  %2501 = vmatmul.msk.f32.gmra.mxu1 %vm78_vm1, %v1276_v7 }
 0x15c   :  { %2483 = vmatmul.msk.f32.gmra.mxu3 %vm78_vm1, %v1186_v19 }
 0x160   :  { %2476 = vmatmul.msk.f32.gmra.mxu2 %vm78_vm1, %v1188_v27 }
 0x164   :  { %2484 = vmatmul.msk.f32.gmra.mxu3 %vm78_vm1, %v1188_v27 }
 0x168   :  { %2477 = vmatmul.msk.f32.gmra.mxu2 %vm78_vm1, %v1187_v39 }
 0x16c   :  { %2485 = vmatmul.msk.f32.gmra.mxu3 %vm78_vm1, %v1187_v39 }
 0x170   :  { %2506 = vmatmul.msk.f32.vlgmr.msrb.gmra.mxu2 %vm78_vm1, %v1362_v35 }
 0x171   :  { %v645_v45 = vpop.f32.mrf.mxu3 }
 0x174   :  { %2514 = vmatmul.msk.f32.vlgmr.msra.gmra.mxu3 %vm78_vm1, %v1362_v35 }
 0x178   :  { %2507 = vmatmul.msk.f32.gmra.mxu2 %vm78_vm1, %v1364_v44 }
 0x17c   :  { %2515 = vmatmul.msk.f32.gmra.mxu3 %vm78_vm1, %v1364_v44  ;;  %v794_v16 = vpop.f32.mrf.mxu1 }
 0x17d   :  { %v928_v58 = vpop.f32.mrf.mxu0 }
 0x17f   :  { %v648_v5 = vpop.f32.mrf.mxu3 }
 0x180   :  { %2508 = vmatmul.msk.f32.gmra.mxu2 %vm78_vm1, %v1366_v4 }
 0x182   :  { %v615_v21 = vpop.f32.mrf.mxu2 }
 0x183   :  { %v646_v56 = vadd.f32 %v645_v45, %v615_v21 }
 0x184   :  { %2516 = vmatmul.msk.f32.gmra.mxu3 %vm78_vm1, %v1366_v4 }
 0x185   :  { %v797_v52 = vpop.f32.mrf.mxu1  ;;  %v931_v15 = vpop.f32.mrf.mxu0 }
 0x187   :  { %v709_v49 = vpop.f32.mrf.mxu3 }
 0x188   :  { %2509 = vmatmul.msk.f32.gmra.mxu2 %vm78_vm1, %v1365_v47 }
 0x18a   :  { %v618_v13 = vpop.f32.mrf.mxu2 }
 0x18b   :  { %v649_v24 = vadd.f32 %v648_v5, %v618_v13 }
 0x18c   :  { %2517 = vmatmul.msk.f32.gmra.mxu3 %vm78_vm1, %v1365_v47 }
 0x18d   :  { %v968_v23 = vpop.f32.mrf.mxu1 }
 0x18f   :  { %v712_v26 = vpop.f32.mrf.mxu3 }
 0x193   :  { %v683_v46 = vpop.f32.mrf.mxu2 }
 0x194   :  { %v710_v40 = vadd.f32 %v709_v49, %v683_v46  ;;  %v1137_v49 = vpop.f32.mrf.mxu0 }
 0x195   :  { %v971_v17 = vpop.f32.mrf.mxu1 }
 0x196   :  { %v800_v36 = vadd.f32 %v794_v16, %v710_v40 }
 0x197   :  { %v754_v50 = vpop.f32.mrf.mxu3 }
 0x198   :  { %v760_v57 = vadd.f32 %v754_v50, %v646_v56 }
 0x19b   :  { %v686_v32 = vpop.f32.mrf.mxu2 }
 0x19c   :  { %v713_v60 = vadd.f32 %v712_v26, %v686_v32  ;;  %v3724_v50 = vpop.f32.mrf.mxu0 }
 0x19d   :  { %v1166_v13 = vpop.f32.mrf.mxu1 }
 0x19e   :  { %v801_v6 = vadd.f32 %v797_v52, %v713_v60  ;;  %v1505_v60 = vld [vmem:[%s4510_s4 + $0x40] sm:$0xff] }
 0x19f   :  { %v757_v37 = vpop.f32.mrf.mxu3 }
 0x1a0   :  { %v761_v1 = vadd.f32 %v757_v37, %v649_v24 }
 0x1a3   :  { %v841_v43 = vpop.f32.mrf.mxu2 }
 0x1a4   :  { %v847_v59 = vadd.f32 %v841_v43, %v760_v57  ;;  %v3731_v43 = vpop.f32.mrf.mxu0 }
 0x1a5   :  { %v3726_v32 = vpop.f32.mrf.mxu1 }
 0x1a6   :  { %v934_v61 = vadd.f32 %v928_v58, %v847_v59 }
 0x1a7   :  { %v881_v54 = vpop.f32.mrf.mxu3 }
 0x1a8   :  { %v887_v53 = vadd.f32 %v881_v54, %v800_v36  ;;  %v1507_v36 = vld [vmem:[%s4510_s4 + $0x50] sm:$0xf] }
 0x1a9   :  { %2532 = vmatpush.msk.msrb.mxu1 %vm405_vm4, %v1507_v36  ;;  %v1517_v36 = vld [vmem:[%s4511_s5 + $0x48] sm:$0xff] }
 0x1aa   :  { %v974_v62 = vadd.f32 %v968_v23, %v887_v53  ;;  %v1506_v23 = vld [vmem:[%s4510_s4 + $0x48] sm:$0xff] }
 0x1ab   :  { %v844_v63 = vpop.f32.mrf.mxu2  ;;  %1578 = vmatpush.msrb.mxu1 %v1506_v23 }
 0x1ac   :  { %v976_v2 = vmax.f32 %v934_v61, %v974_v62  ;;  %v848_v12 = vadd.f32 %v844_v63, %v761_v1  ;;  %v3746_v54 = vpop.f32.mrf.mxu0  ;;  %v1504_v61 = vld [vmem:[%s4510_s4 + $0x38] sm:$0xff]  ;;  %v1503_v63 = vld [vmem:[%s4510_s4 + $0x30] sm:$0xff]  ;;  %v1502_v1 = vld [vmem:[%s4510_s4 + $0x28] sm:$0xff] }
 0x1ad   :  { %v3733_v57 = vpop.f32.mrf.mxu1  ;;  %1579 = vmatpush.msrb.mxu1 %v1505_v60 }
 0x1ae   :  { %v979_v3 = vrot.slane %v976_v2, 1  ;;  %v935_v18 = vadd.f32 %v931_v15, %v848_v12  ;;  %v1501_v12 = vld [vmem:[%s4510_s4 + $0x20] sm:$0xff]  ;;  %v1167_v15 = vadd.f32 %v1166_v13, %v1137_v49  ;;  %v1518_v49 = vld [vmem:[%s4511_s5 + $0x50] sm:$0xf]  ;;  %v2573_v13 = vld [vmem:[%s4511_s5 + $0xe8] sm:$0xff] }
 0x1af   :  { %v884_v7 = vpop.f32.mrf.mxu3  ;;  %1580 = vmatpush.msrb.mxu1 %v1504_v61 }
 0x1b0   :  { %v981_v8 = vmax.f32 %v976_v2, %v979_v3  ;;  %v888_v14 = vadd.f32 %v884_v7, %v801_v6  ;;  %v2528_v3 = vld [vmem:[%s4510_s4 + $0xa8] sm:$0xf]  ;;  %v2527_v7 = vld [vmem:[%s4510_s4 + $0xa0] sm:$0xff] }
 0x1b1   :  { %1581 = vmatpush.msrb.mxu1 %v1503_v63  ;;  %2529 = vmatpush.msk.msrb.mxu0 %vm405_vm4, %v2528_v3  ;;  %v2521_v63 = vld [vmem:[%s4510_s4 + $0x70] sm:$0xff] }
 0x1b2   :  { %v982_v20 = vadd.f32 %v981_v8, %v3699_v0  ;;  %v989_v22 = vadd.f32 %v987_v11, %v981_v8  ;;  %v975_v19 = vadd.f32 %v971_v17, %v888_v14  ;;  %v1500_v14 = vld [vmem:[%s4510_s4 + $0x18] sm:$0xff] }
 0x1b3   :  { %v3705_v39 = vpop.f32.mrf.mxu2  ;;  %1582 = vmatpush.msrb.mxu1 %v1502_v1  ;;  %1548 = vmatpush.msrb.mxu0 %v2527_v7  ;;  %v2526_v17 = vld [vmem:[%s4510_s4 + $0x98] sm:$0xff]  ;;  %v2570_v7 = vld [vmem:[%s4511_s5 + $0xd0] sm:$0xff] }
 0x1b4   :  { %v983_v27 = vmax.f32 %v982_v20, 0.0  ;;  %v990_v28 = vmax.f32 %v989_v22, 0.0  ;;  %v977_v33 = vmax.f32 %v935_v18, %v975_v19  ;;  %v1303_v6 = vpop.f32.mrf.mxu0  ;;  %v1499_v22 = vld [vmem:[%s4510_s4 + $0x10] sm:$0xff]  ;;  %v2562_v18 = vld [vmem:[%s4510_s4 + $0x100] sm:$0xf]  ;;  %v2571_v1 = vld [vmem:[%s4511_s5 + $0xd8] sm:$0xff] }
 0x1b5   :  { %v3750_v24 = vpop.f32.mrf.mxu1  ;;  %1583 = vmatpush.msrb.mxu1 %v1501_v12  ;;  %1549 = vmatpush.msrb.mxu0 %v2526_v17  ;;  %v2576_v19 = vld [vmem:[%s4511_s5 + $0x100] sm:$0xf]  ;;  %v2518_v17 = vld [vmem:[%s4510_s4 + $0x58] sm:$0xff] }
 0x1b6   :  { %985 = vst.msk [vmem:[#allocation3] sm:$0x1] %vm984_vm10, %v983_v27  ;;  %v1008_v35 = vrot.slane %v977_v33, 1  ;;  %2563 = vmatpush.msk.msra.mxu2 %vm405_vm4, %v2562_v18  ;;  %2577 = vmatpush.msk.msrb.mxu3 %vm405_vm4, %v2576_v19 }
 0x1b7   :  { %992 = vst.sshfl [vmem:[#allocation1] sm:$0xff pattern:$0x73625140] %v990_v28  ;;  %v3708_v34 = vpop.f32.mrf.mxu3  ;;  %1584 = vmatpush.msrb.mxu1 %v1500_v14 }
 0x1b8   :  { %v1010_v44 = vmax.f32 %v977_v33, %v1008_v35  ;;  %v1105_v27 = vadd.f32 %v3708_v34, %v3705_v39  ;;  %v1498_v33 = vld [vmem:[%s4510_s4 + $0x8] sm:$0xff]  ;;  %v2575_v35 = vld [vmem:[%s4511_s5 + $0xf8] sm:$0xff]  ;;  %1685 = vmatpush.msra.mxu2 %v3306_v25  ;;  %v2523_v25 = vld [vmem:[%s4510_s4 + $0x80] sm:$0xff] }
 0x1b9   :  { %1585 = vmatpush.msrb.mxu1 %v1499_v22  ;;  %1724 = vmatpush.msrb.mxu3 %v2575_v35  ;;  %v1173_v22 = vadd.f32 %v3733_v57, %v3731_v43  ;;  %v1512_v43 = vld [vmem:[%s4511_s5 + $0x20] sm:$0xff] }
 0x1ba   :  { %v1011_v45 = vadd.f32 %v1010_v44, %v3699_v0  ;;  %1686 = vmatpush.msra.mxu2 %v3317_v30  ;;  %v3901_v57 = vld [vmem:[%s4509_s3] sm:$0x1]  ;;  %v2003_v0 = vld [vmem:[%s4513_s7 + $0x1b0] sm:$0xff] }
 0x1bb   :  { %v3711_v47 = vpop.f32.mrf.mxu2  ;;  %1586 = vmatpush.msrb.mxu1 %v1498_v33 }
 0x1bc   :  { %v1012_v4 = vmax.f32 %v1011_v45, 0.0  ;;  %v2524_v45 = vld [vmem:[%s4510_s4 + $0x88] sm:$0xff]  ;;  %v1306_v30 = vpop.f32.mrf.mxu0  ;;  %1687 = vmatpush.msra.mxu2 %v3323_v9 }
 0x1bd   :  { %v1340_v8 = vpop.f32.mrf.mxu1 }
 0x1be   :  { %v994_v5 = vld [vmem:[#allocation1 + $0x1] ss:$4 sm:$0xff]  ;;  %1013 = vst.msk [vmem:[#allocation3 + $0x8] sm:$0x1] %vm984_vm10, %v1012_v4  ;;  %1688 = vmatpush.msra.mxu2 %v3331_v38 }
 0x1bf   :  { %996 = vst.msk [vmem:[#allocation3 + $0x2] sm:$0x1] %vm984_vm10, %v994_v5  ;;  %v3715_v21 = vpop.f32.mrf.mxu3  ;;  %v1497_v4 = vld [vmem:[%s4510_s4] sm:$0xff]  ;;  %v2574_v5 = vld [vmem:[%s4511_s5 + $0xf0] sm:$0xff] }
 0x1c0   :  { %997 = vst.sshfl [vmem:[#allocation1] sm:$0xff pattern:$0x73625140] %v990_v28  ;;  %1587 = vmatpush.msrb.mxu1 %v1497_v4  ;;  %1725 = vmatpush.msrb.mxu3 %v2574_v5  ;;  %v1108_v23 = vadd.f32 %v3715_v21, %v3711_v47  ;;  %v1516_v47 = vld [vmem:[%s4511_s5 + $0x40] sm:$0xff] }
 0x1c1   :  { %1689 = vmatpush.msra.mxu2 %v3337_v10  ;;  %v2519_v10 = vld [vmem:[%s4510_s4 + $0x60] sm:$0xff] }
 0x1c2   :  { %2549 = vmatpush.msk.msra.mxu1 %vm405_vm4, %v1518_v49  ;;  %1726 = vmatpush.msrb.mxu3 %v2573_v13  ;;  %v2543_v49 = vld [vmem:[%s4511_s5 + $0x98] sm:$0xff] }
 0x1c3   :  { %v3717_v31 = vpop.f32.mrf.mxu2  ;;  %1690 = vmatpush.msra.mxu2 %v3343_v41  ;;  %v1513_v41 = vld [vmem:[%s4511_s5 + $0x28] sm:$0xff] }
 0x1c4   :  { %1641 = vmatpush.msra.mxu1 %v1517_v36  ;;  %v1309_v4 = vpop.f32.mrf.mxu0  ;;  %v2632_v36 = vld [vmem:[%s4511_s5 + $0x1b0] sm:$0xf] }
 0x1c5   :  { %v1343_v60 = vpop.f32.mrf.mxu1  ;;  %1691 = vmatpush.msra.mxu2 %v3349_v42  ;;  %v2544_v42 = vld [vmem:[%s4511_s5 + $0xa0] sm:$0xff] }
 0x1c6   :  { %1642 = vmatpush.msra.mxu1 %v1516_v47 }
 0x1c7   :  { %v999_v26 = vld [vmem:[#allocation1 + $0x2] ss:$4 sm:$0xff]  ;;  %v3719_v46 = vpop.f32.mrf.mxu3  ;;  %1692 = vmatpush.msra.mxu2 %v3372_v29 }
 0x1c8   :  { %1001 = vst.msk [vmem:[#allocation3 + $0x4] sm:$0x1] %vm984_vm10, %v999_v26  ;;  %v1170_v26 = vadd.f32 %v3726_v32, %v3724_v50  ;;  %v2572_v32 = vld [vmem:[%s4511_s5 + $0xe0] sm:$0xff]  ;;  %v1111_v33 = vadd.f32 %v3719_v46, %v3717_v31  ;;  %v2566_v29 = vld [vmem:[%s4511_s5 + $0xb0] sm:$0xff] }
 0x1c9   :  { %1002 = vst.sshfl [vmem:[#allocation1] sm:$0xff pattern:$0x73625140] %v990_v28  ;;  %v2525_v28 = vld [vmem:[%s4510_s4 + $0x90] sm:$0xff]  ;;  %1727 = vmatpush.msrb.mxu3 %v2572_v32  ;;  %1693 = vmatpush.msra.mxu2 %v3388_v51  ;;  %v1176_v32 = vadd.f32 %v3750_v24, %v3746_v54 }
 0x1ca   :  { %1550 = vmatpush.msrb.mxu0 %v2525_v28  ;;  %v2568_v28 = vld [vmem:[%s4511_s5 + $0xc0] sm:$0xff]  ;;  %v2542_v51 = vld [vmem:[%s4511_s5 + $0x90] sm:$0xff] }
 0x1cb   :  { %v3722_v16 = vpop.f32.mrf.mxu2  ;;  %1728 = vmatpush.msrb.mxu3 %v2571_v1  ;;  %1694 = vmatpush.msra.mxu2 %v3400_v55  ;;  %v2631_v55 = vld [vmem:[%s4511_s5 + $0x1a8] sm:$0xff]  ;;  %v2616_v1 = vld [vmem:[%s4510_s4 + $0x1a0] sm:$0xff] }
 0x1cc   :  { %1551 = vmatpush.msrb.mxu0 %v2524_v45 }
 0x1cd   :  { %1729 = vmatpush.msrb.mxu3 %v2570_v7  ;;  %v1346_v5 = vpop.f32.mrf.mxu1 }
 0x1ce   :  { %1552 = vmatpush.msrb.mxu0 %v2523_v25  ;;  %v1511_v25 = vld [vmem:[%s4511_s5 + $0x18] sm:$0xff] }
 0x1cf   :  { %v3728_v52 = vpop.f32.mrf.mxu3 }
 0x1d0   :  { %v1004_v37 = vld [vmem:[#allocation1 + $0x3] ss:$4 sm:$0xff]  ;;  %v1114_v47 = vadd.f32 %v3728_v52, %v3722_v16 }
 0x1d1   :  { %1006 = vst.msk [vmem:[#allocation3 + $0x6] sm:$0x1] %vm984_vm10, %v1004_v37  ;;  %v2630_v52 = vld [vmem:[%s4511_s5 + $0x1a0] sm:$0xff] }
 0x1d3   :  { %v1214_v56 = vpop.f32.mrf.mxu2 }
 0x1d4   :  { %v1226_v44 = vadd.f32 %v1214_v56, %v1105_v27  ;;  %v2545_v27 = vld [vmem:[%s4511_s5 + $0xa8] sm:$0xf] }
 0x1d6   :  { %v1315_v37 = vadd.f32 %v1303_v6, %v1226_v44  ;;  %v2520_v6 = vld [vmem:[%s4510_s4 + $0x68] sm:$0xff] }
 0x1d7   :  { %v1251_v40 = vpop.f32.mrf.mxu3 }
 0x1d8   :  { %v1263_v39 = vadd.f32 %v1251_v40, %v1167_v15  ;;  %v2522_v40 = vld [vmem:[%s4510_s4 + $0x78] sm:$0xff]  ;;  %v2569_v15 = vld [vmem:[%s4511_s5 + $0xc8] sm:$0xff] }
 0x1d9   :  { %1553 = vmatpush.msrb.mxu0 %v2522_v40  ;;  %1730 = vmatpush.msrb.mxu3 %v2569_v15  ;;  %v1312_v15 = vpop.f32.mrf.mxu0 }
 0x1da   :  { %v1352_v56 = vadd.f32 %v1340_v8, %v1263_v39  ;;  %v1514_v8 = vld [vmem:[%s4511_s5 + $0x30] sm:$0xff] }
 0x1db   :  { %v3735_v58 = vpop.f32.mrf.mxu2  ;;  %1554 = vmatpush.msrb.mxu0 %v2521_v63  ;;  %1731 = vmatpush.msrb.mxu3 %v2568_v28  ;;  %v2541_v63 = vld [vmem:[%s4511_s5 + $0x88] sm:$0xff] }
 0x1dc   :  { %v1227_v21 = vadd.f32 %v3735_v58, %v1108_v23  ;;  %v1515_v58 = vld [vmem:[%s4511_s5 + $0x38] sm:$0xff] }
 0x1dd   :  { %1555 = vmatpush.msrb.mxu0 %v2520_v6  ;;  %1643 = vmatpush.msra.mxu1 %v1515_v58  ;;  %v2615_v58 = vld [vmem:[%s4510_s4 + $0x198] sm:$0xff] }
 0x1de   :  { %v1316_v14 = vadd.f32 %v1306_v30, %v1227_v21  ;;  %v1510_v30 = vld [vmem:[%s4511_s5 + $0x10] sm:$0xff]  ;;  %v1508_v21 = vld [vmem:[%s4511_s5] sm:$0xff] }
 0x1df   :  { %v3737_v59 = vpop.f32.mrf.mxu3  ;;  %1556 = vmatpush.msrb.mxu0 %v2519_v10  ;;  %1644 = vmatpush.msra.mxu1 %v1514_v8 }
 0x1e0   :  { %v1264_v3 = vadd.f32 %v3737_v59, %v1170_v26 }
 0x1e1   :  { %1557 = vmatpush.msrb.mxu0 %v2518_v17  ;;  %1645 = vmatpush.msra.mxu1 %v1513_v41  ;;  %v1349_v17 = vpop.f32.mrf.mxu1 }
 0x1e2   :  { %v1353_v18 = vadd.f32 %v1343_v60, %v1264_v3  ;;  %v1509_v60 = vld [vmem:[%s4511_s5 + $0x8] sm:$0xff] }
 0x1e3   :  { %v3748_v53 = vpop.f32.mrf.mxu2  ;;  %2546 = vmatpush.msk.msra.mxu0 %vm405_vm4, %v2545_v27  ;;  %1646 = vmatpush.msra.mxu1 %v1512_v43  ;;  %v2613_v27 = vld [vmem:[%s4510_s4 + $0x188] sm:$0xff] }
 0x1e4   :  { %v1228_v45 = vadd.f32 %v3748_v53, %v1111_v33  ;;  %v2537_v43 = vld [vmem:[%s4511_s5 + $0x68] sm:$0xff] }
 0x1e5   :  { %1615 = vmatpush.msra.mxu0 %v2544_v42  ;;  %1647 = vmatpush.msra.mxu1 %v1511_v25  ;;  %v2611_v25 = vld [vmem:[%s4510_s4 + $0x178] sm:$0xff] }
 0x1e6   :  { %v1317_v23 = vadd.f32 %v1309_v4, %v1228_v45  ;;  %v2626_v4 = vld [vmem:[%s4511_s5 + $0x180] sm:$0xff] }
 0x1e7   :  { %v3758_v62 = vpop.f32.mrf.mxu3  ;;  %1616 = vmatpush.msra.mxu0 %v2543_v49  ;;  %1648 = vmatpush.msra.mxu1 %v1510_v30  ;;  %v2624_v30 = vld [vmem:[%s4511_s5 + $0x170] sm:$0xff] }
 0x1e8   :  { %v1265_v13 = vadd.f32 %v3758_v62, %v1173_v22  ;;  %v2618_v62 = vld [vmem:[%s4510_s4 + $0x1b0] sm:$0xf] }
 0x1e9   :  { %2619 = vmatpush.msk.msrb.mxu2 %vm405_vm4, %v2618_v62  ;;  %1617 = vmatpush.msra.mxu0 %v2542_v51  ;;  %v2628_v22 = vld [vmem:[%s4511_s5 + $0x190] sm:$0xff]  ;;  %v2604_v62 = vld [vmem:[%s4511_s5 + $0x158] sm:$0xf] }
 0x1ea   :  { %1649 = vmatpush.msra.mxu1 %v1509_v60  ;;  %v2603_v60 = vld [vmem:[%s4511_s5 + $0x150] sm:$0xff] }
 0x1eb   :  { %v3766_v2 = vpop.f32.mrf.mxu2  ;;  %1618 = vmatpush.msra.mxu0 %v2541_v63 }
 0x1ec   :  { %v1229_v6 = vadd.f32 %v3766_v2, %v1114_v47  ;;  %1650 = vmatpush.msra.mxu1 %v1508_v21  ;;  %v2539_v2 = vld [vmem:[%s4511_s5 + $0x78] sm:$0xff]  ;;  %v2597_v21 = vld [vmem:[%s4511_s5 + $0x120] sm:$0xff] }
 0x1ee   :  { %v1318_v28 = vadd.f32 %v1312_v15, %v1229_v6  ;;  %v2586_v15 = vld [vmem:[%s4510_s4 + $0x138] sm:$0xff] }
 0x1ef   :  { %v3784_v20 = vpop.f32.mrf.mxu3 }
 0x1f0   :  { %v1266_v7 = vadd.f32 %v3784_v20, %v1176_v32  ;;  %v2614_v20 = vld [vmem:[%s4510_s4 + $0x190] sm:$0xff] }
 0x1f2   :  { %v1355_v33 = vadd.f32 %v1349_v17, %v1266_v7  ;;  %v2596_v7 = vld [vmem:[%s4511_s5 + $0x118] sm:$0xff]  ;;  %v2585_v17 = vld [vmem:[%s4510_s4 + $0x130] sm:$0xff] }
 0x1f3   :  { %v1392_v34 = vpop.f32.mrf.mxu2 }
 0x1f4   :  { %v1404_v9 = vadd.f32 %v1392_v34, %v1315_v37  ;;  %v2567_v34 = vld [vmem:[%s4511_s5 + $0xb8] sm:$0xff] }
 0x1f5   :  { %1732 = vmatpush.msrb.mxu3 %v2567_v34 }
 0x1f7   :  { %v1429_v50 = vpop.f32.mrf.mxu3  ;;  %1733 = vmatpush.msrb.mxu3 %v2566_v29  ;;  %v2610_v29 = vld [vmem:[%s4510_s4 + $0x170] sm:$0xff] }
 0x1f8   :  { %v1441_v61 = vadd.f32 %v1429_v50, %v1352_v56  ;;  %v2617_v50 = vld [vmem:[%s4510_s4 + $0x1a8] sm:$0xff] }
 0x1f9   :  { %2633 = vmatpush.msk.msra.mxu3 %vm405_vm4, %v2632_v36  ;;  %1855 = vmatpush.msrb.mxu2 %v2617_v50  ;;  %v2608_v50 = vld [vmem:[%s4510_s4 + $0x160] sm:$0xff] }
 0x1fa   :  { %v1445_v12 = vmax.f32 %v1404_v9, %v1441_v61  ;;  %v1354_v9 = vadd.f32 %v1346_v5, %v1265_v13  ;;  %v2536_v5 = vld [vmem:[%s4511_s5 + $0x60] sm:$0xff] }
 0x1fb   :  { %v1395_v38 = vpop.f32.mrf.mxu2  ;;  %1894 = vmatpush.msra.mxu3 %v2631_v55  ;;  %1856 = vmatpush.msrb.mxu2 %v2616_v1  ;;  %v2602_v55 = vld [vmem:[%s4511_s5 + $0x148] sm:$0xff] }
 0x1fc   :  { %v1450_v59 = vrot.slane %v1445_v12, 1  ;;  %v1405_v35 = vadd.f32 %v1395_v38, %v1316_v14  ;;  %v2540_v38 = vld [vmem:[%s4511_s5 + $0x80] sm:$0xff]  ;;  %v2629_v14 = vld [vmem:[%s4511_s5 + $0x198] sm:$0xff] }
 0x1fd   :  { %1895 = vmatpush.msra.mxu3 %v2630_v52  ;;  %1619 = vmatpush.msra.mxu0 %v2540_v38  ;;  %v2590_v38 = vld [vmem:[%s4510_s4 + $0x158] sm:$0xf] }
 0x1fe   :  { %v1452_v19 = vmax.f32 %v1445_v12, %v1450_v59  ;;  %1857 = vmatpush.msrb.mxu2 %v2615_v58 }
 0x1ff   :  { %v1432_v44 = vpop.f32.mrf.mxu3  ;;  %1896 = vmatpush.msra.mxu3 %v2629_v14  ;;  %1620 = vmatpush.msra.mxu0 %v2539_v2  ;;  %v2594_v14 = vld [vmem:[%s4511_s5 + $0x108] sm:$0xff]  ;;  %v2587_v2 = vld [vmem:[%s4510_s4 + $0x140] sm:$0xff] }
 0x200   :  { %v1453_v39 = vadd.f32 %v3901_v57, %v1452_v19  ;;  %v1456_v31 = vadd.f32 %v1452_v19, %v3148_v48  ;;  %v1442_v46 = vadd.f32 %v1432_v44, %v1353_v18  ;;  %v2538_v18 = vld [vmem:[%s4511_s5 + $0x70] sm:$0xff]  ;;  %1858 = vmatpush.msrb.mxu2 %v2614_v20  ;;  %v2627_v44 = vld [vmem:[%s4511_s5 + $0x188] sm:$0xff] }
 0x201   :  { %1897 = vmatpush.msra.mxu3 %v2628_v22  ;;  %1621 = vmatpush.msra.mxu0 %v2538_v18  ;;  %v2584_v20 = vld [vmem:[%s4510_s4 + $0x128] sm:$0xff]  ;;  %v2583_v22 = vld [vmem:[%s4510_s4 + $0x120] sm:$0xff] }
 0x202   :  { %v1454_v26 = vmax.f32 %v1453_v39, 0.0  ;;  %v1457_v37 = vmax.f32 %v1456_v31, 0.0  ;;  %v1446_v56 = vmax.f32 %v1405_v35, %v1442_v46  ;;  %v2612_v39 = vld [vmem:[%s4510_s4 + $0x180] sm:$0xff]  ;;  %1859 = vmatpush.msrb.mxu2 %v2613_v27 }
 0x203   :  { %v1398_v53 = vpop.f32.mrf.mxu2  ;;  %1898 = vmatpush.msra.mxu3 %v2627_v44  ;;  %1622 = vmatpush.msra.mxu0 %v2537_v43  ;;  %v2580_v44 = vld [vmem:[%s4510_s4 + $0x108] sm:$0xff] }
 0x204   :  { %1455 = vst.msk [vmem:[#allocation2] sm:$0x1] %vm502_vm5, %v1454_v26  ;;  %v1462_v40 = vrot.slane %v1446_v56, 1  ;;  %v1406_v54 = vadd.f32 %v1398_v53, %v1317_v23  ;;  %1860 = vmatpush.msrb.mxu2 %v2612_v39  ;;  %v2623_v23 = vld [vmem:[%s4511_s5 + $0x168] sm:$0xff] }
 0x205   :  { %1458 = vst.msk [vmem:[#allocation2 - $0x1] sm:$0x4] %vm509_vm6, %v1457_v37  ;;  %1899 = vmatpush.msra.mxu3 %v2626_v4  ;;  %1623 = vmatpush.msra.mxu0 %v2536_v5  ;;  %v1962_v4 = vld [vmem:[%s4513_s7 + $0x68] sm:$0xff] }
 0x206   :  { %1459 = vst.msk [vmem:[#allocation2 - $0x2] sm:$0x10] %vm511_vm7, %v1457_v37  ;;  %v1464_v61 = vmax.f32 %v1446_v56, %v1462_v40  ;;  %v2535_v56 = vld [vmem:[%s4511_s5 + $0x58] sm:$0xff]  ;;  %1861 = vmatpush.msrb.mxu2 %v2611_v25  ;;  %v2609_v40 = vld [vmem:[%s4510_s4 + $0x168] sm:$0xff] }
 0x207   :  { %1460 = vst.msk [vmem:[#allocation2 - $0x3] sm:$0x40] %vm513_vm8, %v1457_v37  ;;  %v1435_v24 = vpop.f32.mrf.mxu3  ;;  %v2625_v37 = vld [vmem:[%s4511_s5 + $0x178] sm:$0xff]  ;;  %1624 = vmatpush.msra.mxu0 %v2535_v56 }
 0x208   :  { %v1465_v3 = vadd.f32 %v3901_v57, %v1464_v61  ;;  %v1468_v12 = vadd.f32 %v1464_v61, %v3148_v48  ;;  %v1443_v16 = vadd.f32 %v1435_v24, %v1354_v9  ;;  %1900 = vmatpush.msra.mxu3 %v2625_v37  ;;  %1862 = vmatpush.msrb.mxu2 %v2610_v29  ;;  %v2622_v61 = vld [vmem:[%s4511_s5 + $0x160] sm:$0xff]  ;;  %v2598_v24 = vld [vmem:[%s4511_s5 + $0x128] sm:$0xff]  ;;  %v1959_v37 = vld [vmem:[%s4513_s7 + $0x50] sm:$0xff] }
 0x209   :  { %v1958_v29 = vld [vmem:[%s4513_s7 + $0x48] sm:$0xff] }
 0x20a   :  { %v1466_v59 = vmax.f32 %v1465_v3, 0.0  ;;  %v1469_v10 = vmax.f32 %v1468_v12, 0.0  ;;  %v1447_v8 = vmax.f32 %v1406_v54, %v1443_v16  ;;  %1901 = vmatpush.msra.mxu3 %v2624_v30  ;;  %1863 = vmatpush.msrb.mxu2 %v2609_v40  ;;  %v2599_v54 = vld [vmem:[%s4511_s5 + $0x130] sm:$0xff]  ;;  %v1957_v30 = vld [vmem:[%s4513_s7 + $0x40] sm:$0xff]  ;;  %v1956_v40 = vld [vmem:[%s4513_s7 + $0x38] sm:$0xff] }
 0x20b   :  { %v1401_v19 = vpop.f32.mrf.mxu2 }
 0x20c   :  { %1467 = vst.msk [vmem:[#allocation2 + $0x4] sm:$0x1] %vm502_vm5, %v1466_v59  ;;  %v1474_v41 = vrot.slane %v1447_v8, 1  ;;  %v1407_v34 = vadd.f32 %v1401_v19, %v1318_v28  ;;  %1902 = vmatpush.msra.mxu3 %v2623_v23  ;;  %1864 = vmatpush.msrb.mxu2 %v2608_v50  ;;  %v2589_v59 = vld [vmem:[%s4510_s4 + $0x150] sm:$0xff]  ;;  %v2582_v19 = vld [vmem:[%s4510_s4 + $0x118] sm:$0xff] }
 0x20d   :  { %1470 = vst.msk [vmem:[#allocation2 + $0x3] sm:$0x4] %vm509_vm6, %v1469_v10 }
 0x20e   :  { %1471 = vst.msk [vmem:[#allocation2 + $0x2] sm:$0x10] %vm511_vm7, %v1469_v10  ;;  %v1476_v35 = vmax.f32 %v1447_v8, %v1474_v41  ;;  %1903 = vmatpush.msra.mxu3 %v2622_v61  ;;  %v2588_v8 = vld [vmem:[%s4510_s4 + $0x148] sm:$0xff]  ;;  %v1980_v61 = vld [vmem:[%s4513_s7 + $0xf8] sm:$0xff] }
 0x20f   :  { %1472 = vst.msk [vmem:[#allocation2 + $0x1] sm:$0x40] %vm513_vm8, %v1469_v10  ;;  %v1438_v42 = vpop.f32.mrf.mxu3  ;;  %v2595_v10 = vld [vmem:[%s4511_s5 + $0x110] sm:$0xff] }
 0x210   :  { %v1477_v31 = vadd.f32 %v3901_v57, %v1476_v35  ;;  %v1480_v46 = vadd.f32 %v1476_v35, %v3148_v48  ;;  %v1444_v45 = vadd.f32 %v1438_v42, %v1355_v33  ;;  %v2581_v33 = vld [vmem:[%s4510_s4 + $0x110] sm:$0xff] }
 0x212   :  { %v1478_v49 = vmax.f32 %v1477_v31, 0.0  ;;  %v1481_v13 = vmax.f32 %v1480_v46, 0.0  ;;  %v1448_v26 = vmax.f32 %v1407_v34, %v1444_v45  ;;  %v1964_v46 = vld [vmem:[%s4513_s7 + $0x78] sm:$0xff]  ;;  %v1963_v45 = vld [vmem:[%s4513_s7 + $0x70] sm:$0xff] }
 0x214   :  { %1479 = vst.msk [vmem:[#allocation2 + $0x8] sm:$0x1] %vm502_vm5, %v1478_v49  ;;  %v1486_v53 = vrot.slane %v1448_v26, 1  ;;  %v1961_v49 = vld [vmem:[%s4513_s7 + $0x60] sm:$0xff] }
 0x215   :  { %1482 = vst.msk [vmem:[#allocation2 + $0x7] sm:$0x4] %vm509_vm6, %v1481_v13 }
 0x216   :  { %1483 = vst.msk [vmem:[#allocation2 + $0x6] sm:$0x10] %vm511_vm7, %v1481_v13  ;;  %v1488_v36 = vmax.f32 %v1448_v26, %v1486_v53  ;;  %v4039_v51 = vld [vmem:[#allocation2] sm:$0xff] }
 0x217   :  { %1484 = vst.msk [vmem:[#allocation2 + $0x5] sm:$0x40] %vm513_vm8, %v1481_v13  ;;  %2533 = vmatmul.msk.f32.vlgmr.msrb.gmra.mxu1 %vm590_vm9, %v4039_v51  ;;  %v1532_v3 = vrot.slane %v4039_v51, 1  ;;  %v1669_v16 = vrot.slane %v4039_v51, 2  ;;  %v1839_v18 = vrot.slane %v4039_v51, 4  ;;  %v1754_v35 = vrot.slane %v4039_v51, 3 }
 0x218   :  { %v1489_v32 = vadd.f32 %v3901_v57, %v1488_v36  ;;  %v1492_v9 = vadd.f32 %v1488_v36, %v3148_v48  ;;  %2605 = vmatpush.msk.msrb.mxu1 %vm405_vm4, %v2604_v62  ;;  %v2601_v48 = vld [vmem:[%s4511_s5 + $0x140] sm:$0xff]  ;;  %v2600_v57 = vld [vmem:[%s4511_s5 + $0x138] sm:$0xff]  ;;  %v1955_v36 = vld [vmem:[%s4513_s7 + $0x30] sm:$0xff] }
 0x219   :  { %v1960_v13 = vld [vmem:[%s4513_s7 + $0x58] sm:$0xff] }
 0x21a   :  { %v1490_v63 = vmax.f32 %v1489_v32, 0.0  ;;  %v1493_v47 = vmax.f32 %v1492_v9, 0.0  ;;  %1809 = vmatpush.msrb.mxu1 %v2603_v60  ;;  %v1954_v60 = vld [vmem:[%s4513_s7 + $0x28] sm:$0xff]  ;;  %v1953_v9 = vld [vmem:[%s4513_s7 + $0x20] sm:$0xff] }
 0x21c   :  { %1491 = vst.msk [vmem:[#allocation2 + $0xc] sm:$0x1] %vm502_vm5, %v1490_v63  ;;  %1810 = vmatpush.msrb.mxu1 %v2602_v55  ;;  %v1996_v55 = vld [vmem:[%s4513_s7 + $0x178] sm:$0xff] }
 0x21d   :  { %1494 = vst.msk [vmem:[#allocation2 + $0xb] sm:$0x4] %vm509_vm6, %v1493_v47  ;;  %v2012_v63 = vld [vmem:[%s4513_s7 + $0x1f8] sm:$0xff] }
 0x21e   :  { %1811 = vmatpush.msrb.mxu1 %v2601_v48  ;;  %v1952_v48 = vld [vmem:[%s4513_s7 + $0x18] sm:$0xff] }
 0x220   :  { %1812 = vmatpush.msrb.mxu1 %v2600_v57  ;;  %v1979_v57 = vld [vmem:[%s4513_s7 + $0xf0] sm:$0xff] }
 0x222   :  { %1813 = vmatpush.msrb.mxu1 %v2599_v54  ;;  %v1995_v54 = vld [vmem:[%s4513_s7 + $0x170] sm:$0xff] }
 0x224   :  { %v1496_v1 = vld [vmem:[#allocation2 + $0x8] sm:$0x3f]  ;;  %1814 = vmatpush.msrb.mxu1 %v2598_v24 }
 0x225   :  { %2534 = vmatmul.msk.f32.gmra.mxu1 %vm590_vm9, %v1496_v1  ;;  %v1533_v12 = vrot.slane %v1496_v1, 1  ;;  %v1670_v52 = vrot.slane %v1496_v1, 2  ;;  %v1840_v41 = vrot.slane %v1496_v1, 4  ;;  %v1755_v28 = vrot.slane %v1496_v1, 3  ;;  %v2011_v24 = vld [vmem:[%s4513_s7 + $0x1f0] sm:$0xff] }
 0x226   :  { %1815 = vmatpush.msrb.mxu1 %v2597_v21 }
 0x227   :  { %v1534_v6 = vsel %vm70_vm0, %v1532_v3, %v1533_v12  ;;  %v1671_v58 = vsel %vm221_vm2, %v1669_v16, %v1670_v52  ;;  %v1841_v27 = vsel %vm405_vm4, %v1839_v18, %v1840_v41  ;;  %v1756_v43 = vsel %vm313_vm3, %v1754_v35, %v1755_v28  ;;  %v1951_v3 = vld [vmem:[%s4513_s7 + $0x10] sm:$0xff]  ;;  %v1978_v16 = vld [vmem:[%s4513_s7 + $0xe8] sm:$0xff]  ;;  %v2008_v18 = vld [vmem:[%s4513_s7 + $0x1d8] sm:$0xff] }
 0x228   :  { %2530 = vmatmul.msk.f32.vlgmr.msrb.gmra.mxu0 %vm590_vm9, %v1534_v6  ;;  %2564 = vmatmul.msk.f32.vlgmr.msra.gmra.mxu2 %vm590_vm9, %v1671_v58  ;;  %v1975_v35 = vld [vmem:[%s4513_s7 + $0xd0] sm:$0xff] }
 0x229   :  { %2578 = vmatmul.msk.f32.vlgmr.msrb.gmra.mxu3 %vm590_vm9, %v1671_v58  ;;  %2591 = vmatpush.msk.msrb.mxu0 %vm405_vm4, %v2590_v38  ;;  %v2010_v38 = vld [vmem:[%s4513_s7 + $0x1e8] sm:$0xff] }
 0x22a   :  { %1816 = vmatpush.msrb.mxu1 %v2596_v7  ;;  %2088 = vmatpush.msra.mxu2 %v1996_v55  ;;  %v1950_v7 = vld [vmem:[%s4513_s7 + $0x8] sm:$0xff]  ;;  %v2024_v55 = vld [vmem:[%s4513_s7 + $0x258] sm:$0xff] }
 0x22b   :  { %1770 = vmatpush.msrb.mxu0 %v2589_v59  ;;  %2108 = vmatpush.msrb.mxu3 %v2012_v63  ;;  %v1971_v63 = vld [vmem:[%s4513_s7 + $0xb0] sm:$0xff] }
 0x22c   :  { %1817 = vmatpush.msrb.mxu1 %v2595_v10  ;;  %2089 = vmatpush.msra.mxu2 %v1995_v54  ;;  %v2023_v54 = vld [vmem:[%s4513_s7 + $0x250] sm:$0xff] }
 0x22d   :  { %2550 = vmatmul.msk.f32.vlgmr.msra.gmra.mxu1 %vm590_vm9, %v4039_v51  ;;  %1771 = vmatpush.msrb.mxu0 %v2588_v8  ;;  %v1977_v8 = vld [vmem:[%s4513_s7 + $0xe0] sm:$0xff] }
 0x22e   :  { %1818 = vmatpush.msrb.mxu1 %v2594_v14  ;;  %2109 = vmatpush.msrb.mxu3 %v2011_v24  ;;  %v1993_v14 = vld [vmem:[%s4513_s7 + $0x160] sm:$0xff]  ;;  %v1970_v24 = vld [vmem:[%s4513_s7 + $0xa8] sm:$0xff] }
 0x22f   :  { %1772 = vmatpush.msrb.mxu0 %v2587_v2  ;;  %v2009_v2 = vld [vmem:[%s4513_s7 + $0x1e0] sm:$0xff] }
 0x230   :  { %2531 = vmatmul.msk.f32.gmra.mxu0 %vm590_vm9, %v1533_v12  ;;  %2565 = vmatmul.msk.f32.gmra.mxu2 %vm590_vm9, %v1670_v52 }
 0x231   :  { %2579 = vmatmul.msk.f32.gmra.mxu3 %vm590_vm9, %v1670_v52  ;;  %1773 = vmatpush.msrb.mxu0 %v2586_v15  ;;  %v1994_v52 = vld [vmem:[%s4513_s7 + $0x168] sm:$0xff] }
 0x232   :  { %2068 = vmatpush.msra.mxu1 %v1980_v61  ;;  %2090 = vmatpush.msra.mxu2 %v1994_v52  ;;  %v1985_v52 = vld [vmem:[%s4513_s7 + $0x120] sm:$0xff] }
 0x233   :  { %1774 = vmatpush.msrb.mxu0 %v2585_v17  ;;  %2110 = vmatpush.msrb.mxu3 %v2010_v38  ;;  %v1949_v17 = vld [vmem:[%s4513_s7] sm:$0xff] }
 0x234   :  { %2069 = vmatpush.msra.mxu1 %v1979_v57  ;;  %2091 = vmatpush.msra.mxu2 %v1993_v14  ;;  %v2001_v38 = vld [vmem:[%s4513_s7 + $0x1a0] sm:$0xff]  ;;  %v2020_v14 = vld [vmem:[%s4513_s7 + $0x238] sm:$0xff] }
 0x235   :  { %2551 = vmatmul.msk.f32.gmra.mxu1 %vm590_vm9, %v1496_v1  ;;  %1775 = vmatpush.msrb.mxu0 %v2584_v20 }
 0x236   :  { %2070 = vmatpush.msra.mxu1 %v1978_v16  ;;  %2111 = vmatpush.msrb.mxu3 %v2009_v2  ;;  %v1969_v16 = vld [vmem:[%s4513_s7 + $0xa0] sm:$0xff]  ;;  %v1967_v2 = vld [vmem:[%s4513_s7 + $0x90] sm:$0xff] }
 0x237   :  { %1776 = vmatpush.msrb.mxu0 %v2583_v22  ;;  %v1992_v22 = vld [vmem:[%s4513_s7 + $0x158] sm:$0xff] }
 0x238   :  { %2547 = vmatmul.msk.f32.vlgmr.msra.gmra.mxu0 %vm590_vm9, %v1534_v6  ;;  %2620 = vmatmul.msk.f32.vlgmr.msrb.gmra.mxu2 %vm590_vm9, %v1841_v27 }
 0x239   :  { %2634 = vmatmul.msk.f32.vlgmr.msra.gmra.mxu3 %vm590_vm9, %v1841_v27  ;;  %1777 = vmatpush.msrb.mxu0 %v2582_v19 }
 0x23a   :  { %2071 = vmatpush.msra.mxu1 %v1977_v8  ;;  %2092 = vmatpush.msra.mxu2 %v1992_v22 }
 0x23b   :  { %1778 = vmatpush.msrb.mxu0 %v2581_v33  ;;  %v2028_v33 = vld [vmem:[%s4513_s7 + $0x278] sm:$0xff]  ;;  %2112 = vmatpush.msrb.mxu3 %v2008_v18  ;;  %v1982_v18 = vld [vmem:[%s4513_s7 + $0x108] sm:$0xff] }
 0x23d   :  { %2606 = vmatmul.msk.f32.vlgmr.msrb.gmra.mxu1 %vm590_vm9, %v1756_v43  ;;  %1779 = vmatpush.msrb.mxu0 %v2580_v44  ;;  %v1991_v44 = vld [vmem:[%s4513_s7 + $0x150] sm:$0xff] }
 0x23e   :  { %2093 = vmatpush.msra.mxu2 %v1991_v44  ;;  %v1997_v44 = vld [vmem:[%s4513_s7 + $0x180] sm:$0xff] }
 0x23f   :  { %2048 = vmatpush.msra.mxu0 %v1964_v46  ;;  %v2027_v46 = vld [vmem:[%s4513_s7 + $0x270] sm:$0xff] }
 0x240   :  { %2548 = vmatmul.msk.f32.gmra.mxu0 %vm590_vm9, %v1533_v12  ;;  %2621 = vmatmul.msk.f32.gmra.mxu2 %vm590_vm9, %v1840_v41 }
 0x241   :  { %2635 = vmatmul.msk.f32.gmra.mxu3 %vm590_vm9, %v1840_v41  ;;  %2049 = vmatpush.msra.mxu0 %v1963_v45  ;;  %v1976_v41 = vld [vmem:[%s4513_s7 + $0xd8] sm:$0xff]  ;;  %v1974_v45 = vld [vmem:[%s4513_s7 + $0xc8] sm:$0xff] }
 0x242   :  { %2072 = vmatpush.msra.mxu1 %v1976_v41  ;;  %v1966_v41 = vld [vmem:[%s4513_s7 + $0x88] sm:$0xff] }
 0x243   :  { %2050 = vmatpush.msra.mxu0 %v1962_v4  ;;  %v1990_v4 = vld [vmem:[%s4513_s7 + $0x148] sm:$0xff] }
 0x244   :  { %2073 = vmatpush.msra.mxu1 %v1975_v35  ;;  %2094 = vmatpush.msra.mxu2 %v1990_v4 }
 0x245   :  { %2607 = vmatmul.msk.f32.gmra.mxu1 %vm590_vm9, %v1755_v28  ;;  %2051 = vmatpush.msra.mxu0 %v1961_v49 }
 0x246   :  { %2074 = vmatpush.msra.mxu1 %v1974_v45  ;;  %v2013_v45 = vld [vmem:[%s4513_s7 + $0x200] sm:$0xff] }
 0x247   :  { %2052 = vmatpush.msra.mxu0 %v1960_v13  ;;  %v2026_v13 = vld [vmem:[%s4513_s7 + $0x268] sm:$0xff] }
 0x248   :  { %2592 = vmatmul.msk.f32.vlgmr.msrb.gmra.mxu0 %vm590_vm9, %v1756_v43  ;;  %v2007_v43 = vld [vmem:[%s4513_s7 + $0x1d0] sm:$0xff] }
 0x249   :  { %2053 = vmatpush.msra.mxu0 %v1959_v37  ;;  %2113 = vmatpush.msrb.mxu3 %v2007_v43  ;;  %v1973_v37 = vld [vmem:[%s4513_s7 + $0xc0] sm:$0xff] }
 0x24a   :  { %2075 = vmatpush.msra.mxu1 %v1973_v37  ;;  %v2017_v43 = vld [vmem:[%s4513_s7 + $0x220] sm:$0xff]  ;;  %v2158_v37 = vld [vmem:[%s4515_s9 + $0x48] sm:$0xff] }
 0x24b   :  { %2054 = vmatpush.msra.mxu0 %v1958_v29  ;;  %v2005_v29 = vld [vmem:[%s4513_s7 + $0x1c0] sm:$0xff] }
 0x24d   :  { %2055 = vmatpush.msra.mxu0 %v1957_v30 }
 0x24f   :  { %2056 = vmatpush.msra.mxu0 %v1956_v40 }
 0x250   :  { %2593 = vmatmul.msk.f32.gmra.mxu0 %vm590_vm9, %v1755_v28 }
 0x251   :  { %2057 = vmatpush.msra.mxu0 %v1955_v36 }
 0x253   :  { %2058 = vmatpush.msra.mxu0 %v1954_v60  ;;  %v2004_v60 = vld [vmem:[%s4513_s7 + $0x1b8] sm:$0xff] }
 0x255   :  { %2059 = vmatpush.msra.mxu0 %v1953_v9 }
 0x257   :  { %2060 = vmatpush.msra.mxu0 %v1952_v48 }
 0x259   :  { %2061 = vmatpush.msra.mxu0 %v1951_v3 }
 0x25b   :  { %2062 = vmatpush.msra.mxu0 %v1950_v7  ;;  %v1968_v7 = vld [vmem:[%s4513_s7 + $0x98] sm:$0xff] }
 0x25d   :  { %2063 = vmatpush.msra.mxu0 %v1949_v17  ;;  %v1999_v17 = vld [vmem:[%s4513_s7 + $0x190] sm:$0xff] }
 0x25f   :  { %2128 = vmatpush.msrb.mxu0 %v2028_v33  ;;  %v1981_v33 = vld [vmem:[%s4513_s7 + $0x100] sm:$0xff] }
 0x261   :  { %2129 = vmatpush.msrb.mxu0 %v2027_v46  ;;  %v2014_v46 = vld [vmem:[%s4513_s7 + $0x208] sm:$0xff] }
 0x263   :  { %2130 = vmatpush.msrb.mxu0 %v2026_v13  ;;  %v2159_v13 = vld [vmem:[%s4515_s9 + $0x50] sm:$0xff] }
 0x294   :  { %v1589_v42 = vpop.f32.mrf.mxu1 }
 0x2a2   :  { %v4150_v39 = vpop.f32.mrf.mxu1 }
 0x2a5   :  { %v1559_v31 = vpop.f32.mrf.mxu0 }
 0x2a6   :  { %v1590_v21 = vadd.f32 %v1589_v42, %v1559_v31 }
 0x2aa   :  { %v1652_v34 = vpop.f32.mrf.mxu1 }
 0x2ab   :  { %v1696_v26 = vpop.f32.mrf.mxu2 }
 0x2ac   :  { %v1735_v25 = vpop.f32.mrf.mxu3  ;;  %v1702_v6 = vadd.f32 %v1696_v26, %v1590_v21  ;;  %v1986_v21 = vld [vmem:[%s4513_s7 + $0x128] sm:$0xff] }
 0x2ad   :  { %v4161_v5 = vpop.f32.mrf.mxu0 }
 0x2ae   :  { %v1593_v42 = vadd.f32 %v4150_v39, %v4161_v5  ;;  %v2006_v39 = vld [vmem:[%s4513_s7 + $0x1c8] sm:$0xff] }
 0x2af   :  { %2114 = vmatpush.msrb.mxu3 %v2006_v39  ;;  %v2163_v39 = vld [vmem:[%s4515_s9 + $0x70] sm:$0xff] }
 0x2b1   :  { %2115 = vmatpush.msrb.mxu3 %v2005_v29 }
 0x2b2   :  { %v1655_v56 = vpop.f32.mrf.mxu1 }
 0x2b3   :  { %v4184_v51 = vpop.f32.mrf.mxu2  ;;  %2116 = vmatpush.msrb.mxu3 %v2004_v60  ;;  %v2154_v60 = vld [vmem:[%s4515_s9 + $0x28] sm:$0xff] }
 0x2b4   :  { %v1738_v62 = vpop.f32.mrf.mxu3  ;;  %v1703_v5 = vadd.f32 %v4184_v51, %v1593_v42  ;;  %v1972_v51 = vld [vmem:[%s4513_s7 + $0xb8] sm:$0xff] }
 0x2b5   :  { %v1626_v53 = vpop.f32.mrf.mxu0  ;;  %2076 = vmatpush.msra.mxu1 %v1972_v51  ;;  %2117 = vmatpush.msrb.mxu3 %v2003_v0  ;;  %v2016_v42 = vld [vmem:[%s4513_s7 + $0x218] sm:$0xff]  ;;  %v2201_v0 = vld [vmem:[%s4517_s11 + $0x40] sm:$0xff] }
 0x2b6   :  { %v1653_v23 = vadd.f32 %v1652_v34, %v1626_v53  ;;  %v2156_v51 = vld [vmem:[%s4515_s9 + $0x38] sm:$0xff] }
 0x2b7   :  { %2077 = vmatpush.msra.mxu1 %v1971_v63  ;;  %v2203_v63 = vld [vmem:[%s4517_s11 + $0x50] sm:$0xf] }
 0x2b8   :  { %v1741_v47 = vadd.f32 %v1735_v25, %v1653_v23  ;;  %v1988_v23 = vld [vmem:[%s4513_s7 + $0x138] sm:$0xff] }
 0x2b9   :  { %2078 = vmatpush.msra.mxu1 %v1970_v24  ;;  %v2196_v24 = vld [vmem:[%s4517_s11 + $0x18] sm:$0xff] }
 0x2ba   :  { %v1820_v32 = vpop.f32.mrf.mxu1 }
 0x2bb   :  { %v1826_v58 = vadd.f32 %v1820_v32, %v1741_v47  ;;  %v1866_v59 = vpop.f32.mrf.mxu2  ;;  %v1987_v47 = vld [vmem:[%s4513_s7 + $0x130] sm:$0xff]  ;;  %2079 = vmatpush.msra.mxu1 %v1969_v16 }
 0x2bc   :  { %v1905_v1 = vpop.f32.mrf.mxu3 }
 0x2bd   :  { %v1629_v50 = vpop.f32.mrf.mxu0  ;;  %v1911_v19 = vadd.f32 %v1905_v1, %v1826_v58  ;;  %v2002_v1 = vld [vmem:[%s4513_s7 + $0x1a8] sm:$0xff]  ;;  %v2021_v58 = vld [vmem:[%s4513_s7 + $0x240] sm:$0xff]  ;;  %2080 = vmatpush.msra.mxu1 %v1968_v7 }
 0x2be   :  { %v1656_v12 = vadd.f32 %v1655_v56, %v1629_v50  ;;  %v1989_v56 = vld [vmem:[%s4513_s7 + $0x140] sm:$0xff]  ;;  %2118 = vmatpush.msrb.mxu3 %v2002_v1 }
 0x2bf   :  { %2095 = vmatpush.msra.mxu2 %v1989_v56  ;;  %v2651_v50 = vld [vmem:[%s4512_s6] sm:$0x1]  ;;  %2081 = vmatpush.msra.mxu1 %v1967_v2 }
 0x2c0   :  { %v1742_v20 = vadd.f32 %v1738_v62, %v1656_v12  ;;  %v2025_v62 = vld [vmem:[%s4513_s7 + $0x260] sm:$0xff]  ;;  %v2022_v12 = vld [vmem:[%s4513_s7 + $0x248] sm:$0xff]  ;;  %2119 = vmatpush.msrb.mxu3 %v2001_v38 }
 0x2c1   :  { %2131 = vmatpush.msrb.mxu0 %v2025_v62  ;;  %2096 = vmatpush.msra.mxu2 %v1988_v23  ;;  %v2157_v56 = vld [vmem:[%s4515_s9 + $0x40] sm:$0xff]  ;;  %v2155_v23 = vld [vmem:[%s4515_s9 + $0x30] sm:$0xff] }
 0x2c2   :  { %v1823_v27 = vpop.f32.mrf.mxu1  ;;  %2082 = vmatpush.msra.mxu1 %v1966_v41  ;;  %v2193_v2 = vld [vmem:[%s4517_s11] sm:$0xff] }
 0x2c3   :  { %v1827_v34 = vadd.f32 %v1823_v27, %v1742_v20  ;;  %v1869_v40 = vpop.f32.mrf.mxu2  ;;  %2132 = vmatpush.msrb.mxu0 %v2024_v55  ;;  %2097 = vmatpush.msra.mxu2 %v1987_v47  ;;  %v2019_v20 = vld [vmem:[%s4513_s7 + $0x230] sm:$0xff]  ;;  %v2018_v27 = vld [vmem:[%s4513_s7 + $0x228] sm:$0xff]  ;;  %v2149_v55 = vld [vmem:[%s4515_s9] sm:$0xff] }
 0x2c4   :  { %v1908_v25 = vpop.f32.mrf.mxu3  ;;  %v2202_v47 = vld [vmem:[%s4517_s11 + $0x48] sm:$0xff] }
 0x2c5   :  { %v1781_v10 = vpop.f32.mrf.mxu0  ;;  %v1912_v36 = vadd.f32 %v1908_v25, %v1827_v34  ;;  %2133 = vmatpush.msrb.mxu0 %v2023_v54  ;;  %2098 = vmatpush.msra.mxu2 %v1986_v21  ;;  %v2161_v25 = vld [vmem:[%s4515_s9 + $0x60] sm:$0xff] }
 0x2c6   :  { %v1787_v15 = vadd.f32 %v1781_v10, %v1702_v6  ;;  %v2000_v10 = vld [vmem:[%s4513_s7 + $0x198] sm:$0xff]  ;;  %v2197_v54 = vld [vmem:[%s4517_s11 + $0x20] sm:$0xff] }
 0x2c7   :  { %2134 = vmatpush.msrb.mxu0 %v2022_v12  ;;  %2099 = vmatpush.msra.mxu2 %v1985_v52  ;;  %v2645_v21 = vld [vmem:[%s4514_s8] ss:$0 sm:$0xff] }
 0x2c8   :  { %v1872_v28 = vadd.f32 %v1866_v59, %v1787_v15  ;;  %v1984_v59 = vld [vmem:[%s4513_s7 + $0x118] sm:$0xff]  ;;  %v1983_v15 = vld [vmem:[%s4513_s7 + $0x110] sm:$0xff]  ;;  %2120 = vmatpush.msrb.mxu3 %v2000_v10 }
 0x2c9   :  { %2135 = vmatpush.msrb.mxu0 %v2021_v58  ;;  %2100 = vmatpush.msra.mxu2 %v1984_v59 }
 0x2ca   :  { %v1913_v31 = vmax.f32 %v1872_v28, %v1911_v19  ;;  %v1998_v19 = vld [vmem:[%s4513_s7 + $0x188] sm:$0xff]  ;;  %2121 = vmatpush.msrb.mxu3 %v1999_v17  ;;  %v1965_v28 = vld [vmem:[%s4513_s7 + $0x80] sm:$0xff] }
 0x2cb   :  { %2136 = vmatpush.msrb.mxu0 %v2020_v14  ;;  %2101 = vmatpush.msra.mxu2 %v1983_v15  ;;  %v2194_v14 = vld [vmem:[%s4517_s11 + $0x8] sm:$0xff]  ;;  %v2646_v15 = vld [vmem:[%s4516_s10] ss:$0 sm:$0xff] }
 0x2cc   :  { %v1916_v49 = vrot.slane %v1913_v31, 1  ;;  %2122 = vmatpush.msrb.mxu3 %v1998_v19  ;;  %2083 = vmatpush.msra.mxu1 %v1965_v28 }
 0x2cd   :  { %v1784_v26 = vpop.f32.mrf.mxu0  ;;  %2137 = vmatpush.msrb.mxu0 %v2019_v20  ;;  %2102 = vmatpush.msra.mxu2 %v1982_v18 }
 0x2ce   :  { %v1918_v53 = vmax.f32 %v1913_v31, %v1916_v49  ;;  %v1788_v30 = vadd.f32 %v1784_v26, %v1703_v5  ;;  %2123 = vmatpush.msrb.mxu3 %v1997_v44  ;;  %v2015_v31 = vld [vmem:[%s4513_s7 + $0x210] sm:$0xff]  ;;  %v2162_v5 = vld [vmem:[%s4515_s9 + $0x68] sm:$0xff]  ;;  %2173 = vmatpush.msrb.mxu1 %v2163_v39  ;;  %v2160_v49 = vld [vmem:[%s4515_s9 + $0x58] sm:$0xff]  ;;  %s2679_s7 = smov [#allocation4]  }
 0x2cf   :  { %2138 = vmatpush.msrb.mxu0 %v2018_v27  ;;  %2103 = vmatpush.msra.mxu2 %v1981_v33  ;;  %s2241_s1 = sshll.u32 %s2679_s7, 4  ;;  %s2242_s1 = int_to_ptr.vmem [resolvable:$true] %s2241_s1 }
 0x2d0   :  { %v1919_v32 = vadd.f32 %v2651_v50, %v1918_v53  ;;  %v1922_v9 = vadd.f32 %v1918_v53, %v987_v11  ;;  %v1873_v61 = vadd.f32 %v1869_v40, %v1788_v30  ;;  %2174 = vmatpush.msrb.mxu1 %v2162_v5 }
 0x2d1   :  { %2139 = vmatpush.msrb.mxu0 %v2017_v43  ;;  %2637 = vmatpush.msk.msrb.mxu2 %vm405_vm4, %v2203_v63 }
 0x2d2   :  { %v1920_v11 = vmax.f32 %v1919_v32, 0.0  ;;  %v4317_v48 = vmax.f32 %v1922_v9, 0.0  ;;  %v1914_v57 = vmax.f32 %v1873_v61, %v1912_v36  ;;  %2175 = vmatpush.msrb.mxu1 %v2161_v25  ;;  %v2152_v32 = vld [vmem:[%s4515_s9 + $0x18] sm:$0xff]  ;;  %v2151_v9 = vld [vmem:[%s4515_s9 + $0x10] sm:$0xff]  ;;  %v2150_v61 = vld [vmem:[%s4515_s9 + $0x8] sm:$0xff] }
 0x2d3   :  { %2140 = vmatpush.msrb.mxu0 %v2016_v42  ;;  %2220 = vmatpush.msrb.mxu2 %v2202_v47 }
 0x2d4   :  { %1921 = vst.msk [vmem:[#allocation3 + $0x1] sm:$0x1] %vm984_vm10, %v1920_v11  ;;  %v1941_v3 = vrot.slane %v1914_v57, 1  ;;  %2176 = vmatpush.msrb.mxu1 %v2160_v49  ;;  %v2200_v11 = vld [vmem:[%s4517_s11 + $0x38] sm:$0xff] }
 0x2d5   :  { %1925 = vst.sshfl [vmem:[#allocation1] sm:$0xff pattern:$0x73625140] %v4317_v48  ;;  %2141 = vmatpush.msrb.mxu0 %v2015_v31  ;;  %2221 = vmatpush.msrb.mxu2 %v2201_v0 }
 0x2d6   :  { %v1943_v6 = vmax.f32 %v1914_v57, %v1941_v3  ;;  %2177 = vmatpush.msrb.mxu1 %v2159_v13  ;;  %v2198_v57 = vld [vmem:[%s4517_s11 + $0x28] sm:$0xff] }
 0x2d7   :  { %2142 = vmatpush.msrb.mxu0 %v2014_v46  ;;  %2222 = vmatpush.msrb.mxu2 %v2200_v11 }
 0x2d8   :  { %v1944_v8 = vadd.f32 %v2651_v50, %v1943_v6  ;;  %2178 = vmatpush.msrb.mxu1 %v2158_v37  ;;  %v2153_v50 = vld [vmem:[%s4515_s9 + $0x20] sm:$0xff] }
 0x2d9   :  { %2143 = vmatpush.msrb.mxu0 %v2013_v45 }
 0x2da   :  { %v1945_v22 = vmax.f32 %v1944_v8, 0.0  ;;  %2179 = vmatpush.msrb.mxu1 %v2157_v56  ;;  %v2195_v8 = vld [vmem:[%s4517_s11 + $0x10] sm:$0xff] }
 0x2dc   :  { %v1927_v35 = vld [vmem:[#allocation1 + $0x1] ss:$4 sm:$0xff]  ;;  %1946 = vst.msk [vmem:[#allocation3 + $0x9] sm:$0x1] %vm984_vm10, %v1945_v22  ;;  %2180 = vmatpush.msrb.mxu1 %v2156_v51  ;;  %v2647_v22 = vld [vmem:[%s4518_s12] ss:$0 sm:$0xff] }
 0x2dd   :  { %1929 = vst.msk [vmem:[#allocation3 + $0x3] sm:$0x1] %vm984_vm10, %v1927_v35 }
 0x2de   :  { %1930 = vst.sshfl [vmem:[#allocation1] sm:$0xff pattern:$0x73625140] %v4317_v48  ;;  %2181 = vmatpush.msrb.mxu1 %v2155_v23 }
 0x2e0   :  { %2182 = vmatpush.msrb.mxu1 %v2154_v60 }
 0x2e2   :  { %2183 = vmatpush.msrb.mxu1 %v2153_v50 }
 0x2e3   :  { %v1948_v34 = vld [vmem:[#allocation3 + $0x8] sm:$0x3] }
 0x2e4   :  { %2037 = vst [vmem:[#allocation1 + $0x20] ss:$4 sm:$0xff] %v1948_v34  ;;  %2184 = vmatpush.msrb.mxu1 %v2152_v32 }
 0x2e5   :  { %v1932_v4 = vld [vmem:[#allocation1 + $0x2] ss:$4 sm:$0xff] }
 0x2e6   :  { %1934 = vst.msk [vmem:[#allocation3 + $0x5] sm:$0x1] %vm984_vm10, %v1932_v4  ;;  %2185 = vmatpush.msrb.mxu1 %v2151_v9 }
 0x2e7   :  { %1935 = vst.sshfl [vmem:[#allocation1] sm:$0xff pattern:$0x73625140] %v4317_v48  ;;  %v2199_v48 = vld [vmem:[%s4517_s11 + $0x30] sm:$0xff]  ;;  %s2243_s11 = sshll.u32 %s4519_s13, 4  ;;  %s2244_s11 = int_to_ptr.hbm [resolvable:$true] %s2243_s11 }
 0x2e8   :  { %2186 = vmatpush.msrb.mxu1 %v2150_v61  ;;  %2223 = vmatpush.msrb.mxu2 %v2199_v48 }
 0x2ea   :  { %2187 = vmatpush.msrb.mxu1 %v2149_v55  ;;  %2224 = vmatpush.msrb.mxu2 %v2198_v57 }
 0x2eb   :  { %v2042_v36 = vld.sshfl [vmem:[#allocation1 + $0x20] sm:$0xff pattern:$0x73625140] }
 0x2ec   :  { %2225 = vmatpush.msrb.mxu2 %v2197_v54 }
 0x2ee   :  { %v1937_v26 = vld [vmem:[#allocation1 + $0x3] ss:$4 sm:$0xff]  ;;  %2226 = vmatpush.msrb.mxu2 %v2196_v24 }
 0x2ef   :  { %1939 = vst.msk [vmem:[#allocation3 + $0x7] sm:$0x1] %vm984_vm10, %v1937_v26 }
 0x2f0   :  { %2227 = vmatpush.msrb.mxu2 %v2195_v8 }
 0x2f2   :  { %2228 = vmatpush.msrb.mxu2 %v2194_v14 }
 0x2f4   :  { %2229 = vmatpush.msrb.mxu2 %v2193_v2 }
 0x2f6   :  { %v1947_v29 = vld [vmem:[#allocation3] sm:$0xff] }
 0x2f7   :  { %2035 = vst [vmem:[#allocation1] ss:$4 sm:$0xff] %v1947_v29 }
 0x2fe   :  { %v2038_v53 = vld.sshfl [vmem:[#allocation1] sm:$0xff pattern:$0x73625140]  ;;  %v2039_v30 = vld.sshfl [vmem:[#allocation1 + $0x8] sm:$0xff pattern:$0x73625140] }
 0x2ff   :  { %2064 = vmatmul.f32.vlgmr.msra.gmra.mxu0 %v2038_v53  ;;  %2084 = vmatmul.f32.vlgmr.msra.gmra.mxu1 %v2039_v30  ;;  %v2040_v62 = vld.sshfl [vmem:[#allocation1 + $0x10] sm:$0xff pattern:$0x73625140]  ;;  %v2041_v40 = vld.sshfl [vmem:[#allocation1 + $0x18] sm:$0xff pattern:$0x73625140] }
 0x300   :  { %2104 = vmatmul.f32.vlgmr.msra.gmra.mxu2 %v2040_v62  ;;  %2124 = vmatmul.f32.vlgmr.msrb.gmra.mxu3 %v2041_v40 }
 0x307   :  { %2144 = vmatmul.f32.vlgmr.msrb.gmra.mxu0 %v2042_v36 }
 0x37c   :  { %v2065_v1 = vpop.f32.mrf.mxu0  ;;  %v2085_v12 = vpop.f32.mrf.mxu1 }
 0x37d   :  { %v2066_v3 = vadd.f32 %v2645_v21, %v2065_v1 }
 0x37f   :  { %v2086_v16 = vadd.f32 %v2085_v12, %v2066_v3 }
 0x383   :  { %v2105_v52 = vpop.f32.mrf.mxu2  ;;  %v2125_v6 = vpop.f32.mrf.mxu3 }
 0x384   :  { %v2106_v38 = vadd.f32 %v2105_v52, %v2086_v16  ;;  %v2145_v7 = vpop.f32.mrf.mxu0 }
 0x386   :  { %v2126_v58 = vadd.f32 %v2125_v6, %v2106_v38 }
 0x388   :  { %v2146_v59 = vadd.f32 %v2145_v7, %v2126_v58 }
 0x38a   :  { %v2148_v10 = vmax.f32 %v2146_v59, 0.0 }
 0x38c   :  { %2636 = vmatmul.msk.f32.vlgmr.msrb.gmra.mxu1 %vm2168_vm11, %v2148_v10 }
 0x409   :  { %v2189_v17 = vpop.f32.mrf.mxu1 }
 0x40a   :  { %v2190_v20 = vadd.f32 %v2646_v15, %v2189_v17 }
 0x40c   :  { %v2192_v41 = vmax.f32 %v2190_v20, 0.0 }
 0x40e   :  { %2638 = vmatmul.msk.f32.vlgmr.msrb.gmra.mxu2 %vm590_vm9, %v2192_v41 }
 0x491   :  { %v2231_v18 = vpop.f32.mrf.mxu2 }
 0x492   :  { %v2232_v19 = vadd.f32 %v2647_v22, %v2231_v18 }
 0x494   :  { %2235 = vst.msk [vmem:[#allocation4] sm:$0x3] %vm2234_vm12, %v2232_v19 }
 0x495   :  { %2246 = dma.vmem_to_hbm [thread:$0]  %s2242_s1, 32, %s2244_s11, [#allocation5]  }
 0x496   :  { %2676 = dma.done.wait [#allocation5], 32  }
 0x497   :  { %2677 = vsyncadd [#allocation5], 4294967264 }
 0x498   :  { %2251 = vsyncpa [#allocation5], 1 }

</bundles_post_ra>
